<compile_context>
chip_gen: v6e
topology: v6e:2x2x1
jax: 0.10.0
libtpu: 0.0.40
codegen_flags: <defaults>
</compile_context>

<pallas_src>
import jax
import jax.numpy as jnp
from jax.experimental import pallas as pl
from jax.experimental.pallas import tpu as pltpu


def _se_gate_mul_kernel(s_ref, w_ref, b_ref, x_ref, out_ref):
    # ReLU on the squeeze vector (tiny; compute gate path in f32).
    s = jnp.maximum(s_ref[...].astype(jnp.float32), 0.0)                 # (1, Cin)
    # 1x1 conv on a 1x1 map == per-output-channel dot product over Cin.
    # VPU multiply + XLU lane-reduction (avoids a 1-lane MXU matmul).
    g = jnp.sum(w_ref[...].astype(jnp.float32) * s, axis=-1, keepdims=True)  # (TC, 1)
    g = g + b_ref[...].astype(jnp.float32)
    gate = jax.nn.sigmoid(g)                                             # (TC, 1)
    # Broadcast the per-channel gate across the lane (HW) axis.
    out_ref[...] = (x_ref[...].astype(jnp.float32) * gate).astype(out_ref.dtype)


def _pick_row_tile(c_out, hw, itemsize, max_block_bytes=4 << 20):
    """Multiple-of-8 divisor of c_out whose (tile, hw) block stays small,
    preferring >= 2 grid steps so pipelining / megacore have work to split."""
    if c_out % 8 != 0:
        return c_out  # full-extent block is always a legal block shape
    cap = max(8, max_block_bytes // max(1, hw * itemsize))
    if c_out // 2 >= 8:
        cap = min(cap, c_out // 2)
    cap = min(cap, c_out)
    best = None
    for t in range(8, cap + 1, 8):
        if c_out % t == 0:
            best = t
    return best if best is not None else c_out


def se_gate_mul(x257, x255, weight, bias):
    """x257: (1, Cin, 1, 1), x255: (1, Cout, H, W),
    weight: (Cout, Cin, 1, 1), bias: (Cout,).  Returns (1, Cout, H, W)."""
    _, c_in, _, _ = x257.shape
    n, c_out, h, w = x255.shape
    assert n == 1, "module is specified for batch size 1"
    hw = h * w

    # All of these reshapes are free views (no data movement, no transpose).
    s = x257.reshape(1, c_in)
    w2d = weight.reshape(c_out, c_in)
    b2d = bias.reshape(c_out, 1)
    x = x255.reshape(c_out, hw)            # native dtype, native layout

    tc = _pick_row_tile(c_out, hw, x.dtype.itemsize)
    grid = (pl.cdiv(c_out, tc),)

    out = pl.pallas_call(
        _se_gate_mul_kernel,
        out_shape=jax.ShapeDtypeStruct((c_out, hw), x.dtype),
        grid=grid,
        in_specs=[
            pl.BlockSpec((1, c_in), lambda i: (0, 0)),     # squeeze vector (resident)
            pl.BlockSpec((tc, c_in), lambda i: (i, 0)),    # weight slice for this block
            pl.BlockSpec((tc, 1), lambda i: (i, 0)),       # bias slice
            pl.BlockSpec((tc, hw), lambda i: (i, 0)),      # activation slice
        ],
        out_specs=pl.BlockSpec((tc, hw), lambda i: (i, 0)),
        compiler_params=pltpu.CompilerParams(
            dimension_semantics=("parallel",),
        ),
    )(s, w2d, b2d, x)

    return out.reshape(n, c_out, h, w)


def _reference(x257, x255, weight, bias):
    s = jnp.maximum(x257.reshape(1, -1).astype(jnp.float32), 0.0)
    w2d = weight.reshape(weight.shape[0], -1).astype(jnp.float32)
    g = jnp.einsum("oc,bc->bo", w2d, s,
                   precision=jax.lax.Precision.HIGHEST) + bias[None, :].astype(jnp.float32)
    gate = jax.nn.sigmoid(g)                               # (1, Cout)
    return (gate.reshape(1, -1, 1, 1) * x255.astype(jnp.float32)).astype(x255.dtype)


if __name__ == "__main__":
    # Shapes from the module spec: Conv2d(348 -> 1392, 1x1), 14x14 feature map.
    c_in, c_out, h, w = 348, 1392, 14, 14

    key = jax.random.PRNGKey(0)
    k1, k2, k3, k4 = jax.random.split(key, 4)
    x257 = jax.random.normal(k1, (1, c_in, 1, 1), dtype=jnp.float32)
    x255 = jax.random.normal(k2, (1, c_out, h, w), dtype=jnp.float32)
    # Deterministic synthetic parameters (not a checkpoint load).
    weight = jax.random.normal(k3, (c_out, c_in, 1, 1), dtype=jnp.float32) * 0.05
    bias = jax.random.normal(k4, (c_out,), dtype=jnp.float32) * 0.05

    out = se_gate_mul(x257, x255, weight, bias)
    out = jax.block_until_ready(out)

    ref = _reference(x257, x255, weight, bias)
    assert out.shape == (1, c_out, h, w)
    assert out.dtype == x255.dtype
    assert jnp.allclose(out, ref, atol=1e-5, rtol=1e-5), "mismatch vs reference"

    print("KERNEL_OK")
</pallas_src>

<mosaic_0001>
module attributes {stable_mosaic.version = 11 : i64} {
  func.func @_se_gate_mul_kernel(%arg0: i32, %arg1: memref<1x348xf32, #tpu.memory_space<vmem>>, %arg2: memref<696x348xf32, #tpu.memory_space<vmem>>, %arg3: memref<696x1xf32, #tpu.memory_space<vmem>>, %arg4: memref<696x196xf32, #tpu.memory_space<vmem>>, %arg5: memref<696x196xf32, #tpu.memory_space<vmem>>) attributes {dimension_semantics = [#tpu.dimension_semantics<parallel>], iteration_bounds = array<i64: 2>, scalar_prefetch = 0 : i64, scratch_operands = 0 : i64, tpu.core_type = #tpu.core_type<tc>, window_params = [{pipeline_mode = #tpu.pipeline_mode<synchronous>, transform_indices = @transform_0, window_bounds = array<i64: 1, 348>}, {transform_indices = @transform_1, window_bounds = array<i64: 696, 348>}, {transform_indices = @transform_2, window_bounds = array<i64: 696, 1>}, {transform_indices = @transform_3, window_bounds = array<i64: 696, 196>}, {transform_indices = @transform_4, window_bounds = array<i64: 696, 196>}]} {
    %c0 = arith.constant 0 : index
    %c0_0 = arith.constant 0 : index
    %0 = vector.load %arg1[%c0, %c0_0] : memref<1x348xf32, #tpu.memory_space<vmem>>, vector<1x348xf32>
    %cst = arith.constant 0.000000e+00 : f32
    %1 = vector.broadcast %cst : f32 to vector<1x348xf32>
    %2 = arith.maximumf %0, %1 : vector<1x348xf32>
    %c0_1 = arith.constant 0 : index
    %c0_2 = arith.constant 0 : index
    %3 = vector.load %arg2[%c0_1, %c0_2] : memref<696x348xf32, #tpu.memory_space<vmem>>, vector<696x348xf32>
    %4 = vector.broadcast %2 : vector<1x348xf32> to vector<696x348xf32>
    %5 = arith.mulf %3, %4 : vector<696x348xf32>
    %cst_3 = arith.constant dense<0.000000e+00> : vector<696xf32>
    %6 = vector.multi_reduction <add>, %5, %cst_3 [1] : vector<696x348xf32> to vector<696xf32>
    %7 = vector.shape_cast %6 : vector<696xf32> to vector<696x1xf32>
    %c0_4 = arith.constant 0 : index
    %c0_5 = arith.constant 0 : index
    %8 = vector.load %arg3[%c0_4, %c0_5] : memref<696x1xf32, #tpu.memory_space<vmem>>, vector<696x1xf32>
    %9 = arith.addf %7, %8 : vector<696x1xf32>
    %10 = arith.negf %9 : vector<696x1xf32>
    %11 = math.exp %10 : vector<696x1xf32>
    %cst_6 = arith.constant 1.000000e+00 : f32
    %12 = vector.broadcast %cst_6 : f32 to vector<696x1xf32>
    %13 = arith.addf %12, %11 : vector<696x1xf32>
    %14 = arith.divf %12, %13 : vector<696x1xf32>
    %c0_7 = arith.constant 0 : index
    %c0_8 = arith.constant 0 : index
    %15 = vector.load %arg4[%c0_7, %c0_8] : memref<696x196xf32, #tpu.memory_space<vmem>>, vector<696x196xf32>
    %16 = vector.broadcast %14 : vector<696x1xf32> to vector<696x196xf32>
    %17 = arith.mulf %15, %16 : vector<696x196xf32>
    %c0_9 = arith.constant 0 : index
    %c0_10 = arith.constant 0 : index
    %18 = vector.load %arg5[%c0_9, %c0_10] : memref<696x196xf32, #tpu.memory_space<vmem>>, vector<696x196xf32>
    tpu.vector_store %arg5[%c0_9, %c0_10], %17 {strides = array<i32>} : memref<696x196xf32, #tpu.memory_space<vmem>>, vector<696x196xf32>,
    return
  }
  func.func @transform_0(%arg0: i32) -> (i32, i32) {
    %c0_i32 = arith.constant 0 : i32
    %c0_i32_0 = arith.constant 0 : i32
    %c0_i32_1 = arith.constant 0 : i32
    return %c0_i32, %c0_i32_0 : i32, i32
  }
  func.func @transform_1(%arg0: i32) -> (i32, i32) {
    %c0_i32 = arith.constant 0 : i32
    %c0_i32_0 = arith.constant 0 : i32
    return %arg0, %c0_i32 : i32, i32
  }
  func.func @transform_2(%arg0: i32) -> (i32, i32) {
    %c0_i32 = arith.constant 0 : i32
    %c0_i32_0 = arith.constant 0 : i32
    return %arg0, %c0_i32 : i32, i32
  }
  func.func @transform_3(%arg0: i32) -> (i32, i32) {
    %c0_i32 = arith.constant 0 : i32
    %c0_i32_0 = arith.constant 0 : i32
    return %arg0, %c0_i32 : i32, i32
  }
  func.func @transform_4(%arg0: i32) -> (i32, i32) {
    %c0_i32 = arith.constant 0 : i32
    %c0_i32_0 = arith.constant 0 : i32
    return %arg0, %c0_i32 : i32, i32
  }
}

</mosaic_0001>

<bundles_post_ra>
// kernel: tpu_custom_call.1
= control target key start
LH: loop header
LB: loop body
LE: loop exit
PB: predicated region body
PF: predicated region fallthrough
CT: control target
= control target key end

     0   :  { %s3461_s15 = smov 0   ;;  %s4758_s0 = inlined_call_operand.vmem [shape: f32[1,348], index: 0, kind: input, shape index: {}]   ;;  %s4759_s1 = inlined_call_operand.vmem [shape: f32[1392,348], index: 1, kind: input, shape index: {}]   ;;  %s4760_s2 = inlined_call_operand.vmem [shape: f32[1392,1], index: 2, kind: input, shape index: {}]   ;;  %s4761_s3 = inlined_call_operand.vmem [shape: f32[1392,196], index: 3, kind: input, shape index: {}]   ;;  %s4762_s4 = inlined_call_operand.vmem [shape: f32[1392,196], index: 4, kind: output, shape index: {}]  }
   0x1 LB: > { %s2965_s16 = sadd.s32 4294967295, %s3433_s15   ;;  %p2969_p0 = scmp.ge.s32.totalorder %s3433_s15, 1  ;;  %s3433_s15 = sphi %s3461_s15, %s14_s15  }
   0x2   : > { %p187_p1 = scmp.lt.s32.totalorder %s3433_s15, 3 }
   0x4   : > { %p188_p2 = pnand %p2969_p0, %p187_p1 }
   0x5   : > { %s226_s17 = smul.u32 (!%p188_p2), 87, %s2965_s16 }
   0x6   : > { %191 = sbr.rel (%p188_p2) target bundleno = 522 (0x20a), region = 36 }
   0x7   : > { %p227_p3 = scmp.lt.s32.totalorder (!%p188_p2), %s226_s17, 173 }
   0xb   : > { %v253_v0 = vld [vmem:[%s4758_s0] sm:$0x7]  ;;  %v517_v1 = vlaneseq  ;;  %s4764_s17 = smov (!%p227_p3, %s226_s17), 173  ;;  %vm794_vm0 = vcmask 752640   ;;  %vm2709_vm1 = vcmask 556032  }
   0xc   : > { %v254_v2 = vmax.f32 %v253_v0, 0.0  ;;  %s3067_s20 = smul.u32 24, %s4764_s17  ;;  %s2971_s24 = sshll.u32 %s4764_s17, 3 }
   0xd   : > { %v518_v3 = vshrl.u32 %v517_v1, 7  ;;  %s4016_s27 = scalar_lea.vmem %s4760_s2, %s2971_s24  ;;  %s3065_s28 = sshll.u32 %s4764_s17, 4 }
   0xe   : > { %s3484_s23 = scalar_lea.vmem %s4759_s1, %s3067_s20  ;;  %s4296_s5 = scalar_lea.vmem %s4761_s3, %s3065_s28 }
   0xf   : > { %v519_v4 = vsub.s32 0, %v518_v3  ;;  %v523_v5 = vsub.s32 1, %v518_v3  ;;  %v527_v6 = vsub.s32 2, %v518_v3  ;;  %v261_v10 = vld [vmem:[%s3484_s23 + $0x30] sm:$0xff]  ;;  %v262_v11 = vld [vmem:[%s3484_s23 + $0x38] sm:$0xff]  ;;  %v263_v12 = vld [vmem:[%s3484_s23 + $0x40] sm:$0xff]  ;;  %s4312_s8 = scalar_lea.vmem %s4762_s4, %s3065_s28 }
  0x10   : > { %v255_v16 = vld [vmem:[%s3484_s23] sm:$0xff]  ;;  %v256_v17 = vld [vmem:[%s3484_s23 + $0x8] sm:$0xff]  ;;  %v257_v18 = vld [vmem:[%s3484_s23 + $0x10] sm:$0xff] }
  0x11   : > { %v3475_v7 = vrot.slane %v254_v2, %v519_v4  ;;  %v3477_v8 = vrot.slane %v254_v2, %v523_v5  ;;  %v3479_v9 = vrot.slane %v254_v2, %v527_v6  ;;  %v264_v22 = vld [vmem:[%s3484_s23 + $0x48] sm:$0xff]  ;;  %v265_v23 = vld [vmem:[%s3484_s23 + $0x50] sm:$0xff]  ;;  %v266_v24 = vld [vmem:[%s3484_s23 + $0x58] sm:$0xff] }
  0x12   : > { %v258_v29 = vld [vmem:[%s3484_s23 + $0x18] sm:$0xff]  ;;  %v259_v30 = vld [vmem:[%s3484_s23 + $0x20] sm:$0xff]  ;;  %v260_v31 = vld [vmem:[%s3484_s23 + $0x28] sm:$0xff] }
  0x13   : > { %v538_v13 = vmul.f32 %v3475_v7, %v261_v10  ;;  %v539_v14 = vmul.f32 %v3477_v8, %v262_v11  ;;  %v540_v15 = vmul.f32 %v3479_v9, %v263_v12  ;;  %v532_v19 = vmul.f32 %v3475_v7, %v255_v16  ;;  %v270_v36 = vld [vmem:[%s3484_s23 + $0x78] sm:$0xff]  ;;  %v271_v37 = vld [vmem:[%s3484_s23 + $0x80] sm:$0xff]  ;;  %v272_v38 = vld [vmem:[%s3484_s23 + $0x88] sm:$0xff] }
  0x14   : > { %v533_v20 = vmul.f32 %v3477_v8, %v256_v17  ;;  %v534_v21 = vmul.f32 %v3479_v9, %v257_v18  ;;  %v541_v27 = vmul.f32 %v3475_v7, %v264_v22  ;;  %v542_v28 = vmul.f32 %v3477_v8, %v265_v23  ;;  %v267_v43 = vld [vmem:[%s3484_s23 + $0x60] sm:$0xff]  ;;  %v268_v44 = vld [vmem:[%s3484_s23 + $0x68] sm:$0xff]  ;;  %v269_v45 = vld [vmem:[%s3484_s23 + $0x70] sm:$0xff] }
  0x15   : > { %v804_v25 = vadd.f32 %v539_v14, %v538_v13  ;;  %v805_v26 = vsel %vm794_vm0, %v540_v15, 0.0  ;;  %v543_v34 = vmul.f32 %v3479_v9, %v266_v24  ;;  %v535_v35 = vmul.f32 %v3475_v7, %v258_v29  ;;  %v276_v50 = vld [vmem:[%s3484_s23 + $0xa8] sm:$0xff]  ;;  %v277_v51 = vld [vmem:[%s3484_s23 + $0xb0] sm:$0xff]  ;;  %v278_v56 = vld [vmem:[%s3484_s23 + $0xb8] sm:$0xff] }
  0x16   : > { %v793_v32 = vadd.f32 %v533_v20, %v532_v19  ;;  %v795_v33 = vsel %vm794_vm0, %v534_v21, 0.0  ;;  %v809_v40 = vadd.f32 %v542_v28, %v541_v27  ;;  %v536_v41 = vmul.f32 %v3477_v8, %v259_v30  ;;  %v273_v61 = vld [vmem:[%s3484_s23 + $0x90] sm:$0xff]  ;;  %v274_v62 = vld [vmem:[%s3484_s23 + $0x98] sm:$0xff]  ;;  %v275_v63 = vld [vmem:[%s3484_s23 + $0xa0] sm:$0xff] }
  0x17   : > { %v806_v39 = vadd.f32 %v805_v26, %v804_v25  ;;  %v537_v42 = vmul.f32 %v3479_v9, %v260_v31  ;;  %v810_v47 = vsel %vm794_vm0, %v543_v34, 0.0  ;;  %v547_v48 = vmul.f32 %v3475_v7, %v270_v36  ;;  %v282_v4 = vld [vmem:[%s3484_s23 + $0xd8] sm:$0xff]  ;;  %v283_v5 = vld [vmem:[%s3484_s23 + $0xe0] sm:$0xff]  ;;  %v284_v13 = vld [vmem:[%s3484_s23 + $0xe8] sm:$0xff] }
  0x18   : > { %v796_v46 = vadd.f32 %v795_v33, %v793_v32  ;;  %v548_v49 = vmul.f32 %v3477_v8, %v271_v37  ;;  %v811_v52 = vadd.f32 %v810_v47, %v809_v40  ;;  %v799_v53 = vadd.f32 %v536_v41, %v535_v35  ;;  %v279_v18 = vld [vmem:[%s3484_s23 + $0xc0] sm:$0xff]  ;;  %v280_v19 = vld [vmem:[%s3484_s23 + $0xc8] sm:$0xff]  ;;  %v281_v20 = vld [vmem:[%s3484_s23 + $0xd0] sm:$0xff] }
  0x19   : > { %807 = vadd.xlane.f32.xlu1 %v806_v39  ;;  %v800_v54 = vsel %vm794_vm0, %v537_v42, 0.0  ;;  %v549_v55 = vmul.f32 %v3479_v9, %v272_v38  ;;  %v544_v58 = vmul.f32 %v3475_v7, %v267_v43  ;;  %v545_v59 = vmul.f32 %v3477_v8, %v268_v44  ;;  %v288_v25 = vld [vmem:[%s3484_s23 + $0x108] sm:$0xff]  ;;  %v289_v26 = vld [vmem:[%s3484_s23 + $0x110] sm:$0xff]  ;;  %v290_v30 = vld [vmem:[%s3484_s23 + $0x118] sm:$0xff] }
  0x1a   : > { %797 = vadd.xlane.f32.xlu0 %v796_v46  ;;  %v819_v57 = vadd.f32 %v548_v49, %v547_v48  ;;  %v546_v60 = vmul.f32 %v3479_v9, %v269_v45  ;;  %v801_v0 = vadd.f32 %v800_v54, %v799_v53  ;;  %v553_v2 = vmul.f32 %v3475_v7, %v276_v50  ;;  %v285_v35 = vld [vmem:[%s3484_s23 + $0xf0] sm:$0xff]  ;;  %v286_v36 = vld [vmem:[%s3484_s23 + $0xf8] sm:$0xff]  ;;  %v287_v37 = vld [vmem:[%s3484_s23 + $0x100] sm:$0xff] }
  0x1b   : > { %v820_v1 = vsel %vm794_vm0, %v549_v55, 0.0  ;;  %v554_v3 = vmul.f32 %v3477_v8, %v277_v51  ;;  %v814_v10 = vadd.f32 %v545_v59, %v544_v58  ;;  %v555_v12 = vmul.f32 %v3479_v9, %v278_v56  ;;  %v294_v42 = vld [vmem:[%s3484_s23 + $0x138] sm:$0xff]  ;;  %v295_v43 = vld [vmem:[%s3484_s23 + $0x140] sm:$0xff]  ;;  %v296_v48 = vld [vmem:[%s3484_s23 + $0x148] sm:$0xff] }
  0x1c   : > { %v821_v6 = vadd.f32 %v820_v1, %v819_v57  ;;  %v815_v11 = vsel %vm794_vm0, %v546_v60, 0.0  ;;  %v550_v15 = vmul.f32 %v3475_v7, %v273_v61  ;;  %v551_v16 = vmul.f32 %v3477_v8, %v274_v62  ;;  %v291_v53 = vld [vmem:[%s3484_s23 + $0x120] sm:$0xff]  ;;  %v292_v54 = vld [vmem:[%s3484_s23 + $0x128] sm:$0xff]  ;;  %v293_v55 = vld [vmem:[%s3484_s23 + $0x130] sm:$0xff] }
  0x1d   : > { %812 = vadd.xlane.f32.xlu1 %v811_v52  ;;  %v829_v14 = vadd.f32 %v554_v3, %v553_v2  ;;  %v552_v17 = vmul.f32 %v3479_v9, %v275_v63  ;;  %v816_v21 = vadd.f32 %v815_v11, %v814_v10  ;;  %v830_v22 = vsel %vm794_vm0, %v555_v12, 0.0  ;;  %v300_v62 = vld [vmem:[%s3484_s23 + $0x168] sm:$0xff]  ;;  %v301_v63 = vld [vmem:[%s3484_s23 + $0x170] sm:$0xff] }
  0x1e   : > { %802 = vadd.xlane.f32.xlu0 %v801_v0  ;;  %v559_v23 = vmul.f32 %v3475_v7, %v282_v4  ;;  %v560_v24 = vmul.f32 %v3477_v8, %v283_v5  ;;  %v824_v27 = vadd.f32 %v551_v16, %v550_v15  ;;  %v561_v29 = vmul.f32 %v3479_v9, %v284_v13  ;;  %v302_v0 = vld [vmem:[%s3484_s23 + $0x178] sm:$0xff]  ;;  %v297_v5 = vld [vmem:[%s3484_s23 + $0x150] sm:$0xff]  ;;  %v299_v13 = vld [vmem:[%s3484_s23 + $0x160] sm:$0xff] }
  0x1f   : > { %v825_v28 = vsel %vm794_vm0, %v552_v17, 0.0  ;;  %v831_v31 = vadd.f32 %v830_v22, %v829_v14  ;;  %v556_v32 = vmul.f32 %v3475_v7, %v279_v18  ;;  %v557_v33 = vmul.f32 %v3477_v8, %v280_v19 }
  0x20   : > { %v558_v34 = vmul.f32 %v3479_v9, %v281_v20  ;;  %v826_v38 = vadd.f32 %v825_v28, %v824_v27  ;;  %v839_v39 = vadd.f32 %v560_v24, %v559_v23  ;;  %v565_v40 = vmul.f32 %v3475_v7, %v288_v25  ;;  %v306_v24 = vld [vmem:[%s3484_s23 + $0x198] sm:$0xff]  ;;  %v307_v25 = vld [vmem:[%s3484_s23 + $0x1a0] sm:$0xff]  ;;  %v304_v28 = vld [vmem:[%s3484_s23 + $0x188] sm:$0xff] }
  0x21   : > { %822 = vadd.xlane.f32.xlu1 %v821_v6  ;;  %v566_v41 = vmul.f32 %v3477_v8, %v289_v26  ;;  %v840_v44 = vsel %vm794_vm0, %v561_v29, 0.0  ;;  %v834_v45 = vadd.f32 %v557_v33, %v556_v32  ;;  %v567_v47 = vmul.f32 %v3479_v9, %v290_v30  ;;  %v298_v6 = vld [vmem:[%s3484_s23 + $0x158] sm:$0xff]  ;;  %v308_v26 = vld [vmem:[%s3484_s23 + $0x1a8] sm:$0xff]  ;;  %v303_v27 = vld [vmem:[%s3484_s23 + $0x180] sm:$0xff] }
  0x22   : > { %817 = vadd.xlane.f32.xlu0 %v816_v21  ;;  %v835_v46 = vsel %vm794_vm0, %v558_v34, 0.0  ;;  %v562_v50 = vmul.f32 %v3475_v7, %v285_v35  ;;  %v563_v51 = vmul.f32 %v3477_v8, %v286_v36  ;;  %v564_v52 = vmul.f32 %v3479_v9, %v287_v37  ;;  %v305_v29 = vld [vmem:[%s3484_s23 + $0x190] sm:$0xff]  ;;  %v312_v34 = vld [vmem:[%s3484_s23 + $0x1c8] sm:$0xff] }
  0x23   : > { %v849_v49 = vadd.f32 %v566_v41, %v565_v40  ;;  %v850_v56 = vsel %vm794_vm0, %v567_v47, 0.0  ;;  %v571_v57 = vmul.f32 %v3475_v7, %v294_v42  ;;  %v572_v58 = vmul.f32 %v3477_v8, %v295_v43  ;;  %v313_v35 = vld [vmem:[%s3484_s23 + $0x1d0] sm:$0xff]  ;;  %v314_v40 = vld [vmem:[%s3484_s23 + $0x1d8] sm:$0xff] }
  0x24   : > { %v841_v59 = vadd.f32 %v840_v44, %v839_v39  ;;  %v836_v60 = vadd.f32 %v835_v46, %v834_v45  ;;  %v573_v61 = vmul.f32 %v3479_v9, %v296_v48  ;;  %v844_v1 = vadd.f32 %v563_v51, %v562_v50  ;;  %v309_v47 = vld [vmem:[%s3484_s23 + $0x1b0] sm:$0xff]  ;;  %v310_v48 = vld [vmem:[%s3484_s23 + $0x1b8] sm:$0xff]  ;;  %v311_v50 = vld [vmem:[%s3484_s23 + $0x1c0] sm:$0xff] }
  0x25   : > { %832 = vadd.xlane.f32.xlu1 %v831_v31  ;;  %v568_v2 = vmul.f32 %v3475_v7, %v291_v53  ;;  %v569_v3 = vmul.f32 %v3477_v8, %v292_v54  ;;  %v570_v4 = vmul.f32 %v3479_v9, %v293_v55  ;;  %v851_v10 = vadd.f32 %v850_v56, %v849_v49  ;;  %v318_v51 = vld [vmem:[%s3484_s23 + $0x1f8] sm:$0xff] }
  0x26   : > { %827 = vadd.xlane.f32.xlu0 %v826_v38  ;;  %v845_v11 = vsel %vm794_vm0, %v564_v52, 0.0  ;;  %v859_v12 = vadd.f32 %v572_v58, %v571_v57  ;;  %v577_v15 = vmul.f32 %v3475_v7, %v300_v62  ;;  %v578_v16 = vmul.f32 %v3477_v8, %v301_v63  ;;  %v319_v52 = vld [vmem:[%s3484_s23 + $0x200] sm:$0xff]  ;;  %v316_v58 = vld [vmem:[%s3484_s23 + $0x1e8] sm:$0xff] }
  0x27   : > { %v854_v14 = vadd.f32 %v569_v3, %v568_v2  ;;  %v579_v17 = vmul.f32 %v3479_v9, %v302_v0  ;;  %v860_v18 = vsel %vm794_vm0, %v573_v61, 0.0  ;;  %v855_v19 = vsel %vm794_vm0, %v570_v4, 0.0  ;;  %v315_v57 = vld [vmem:[%s3484_s23 + $0x1e0] sm:$0xff]  ;;  %v320_v63 = vld [vmem:[%s3484_s23 + $0x208] sm:$0xff]  ;;  %v317_v0 = vld [vmem:[%s3484_s23 + $0x1f0] sm:$0xff] }
  0x28   : > { %v574_v20 = vmul.f32 %v3475_v7, %v297_v5  ;;  %v575_v21 = vmul.f32 %v3477_v8, %v298_v6  ;;  %v846_v22 = vadd.f32 %v845_v11, %v844_v1  ;;  %v576_v23 = vmul.f32 %v3479_v9, %v299_v13 }
  0x29   : > { %842 = vadd.xlane.f32.xlu1 %v841_v59  ;;  %v861_v30 = vadd.f32 %v860_v18, %v859_v12  ;;  %v856_v31 = vadd.f32 %v855_v19, %v854_v14  ;;  %v869_v32 = vadd.f32 %v578_v16, %v577_v15  ;;  %v870_v33 = vsel %vm794_vm0, %v579_v17, 0.0  ;;  %v324_v14 = vld [vmem:[%s3484_s23 + $0x228] sm:$0xff]  ;;  %v325_v15 = vld [vmem:[%s3484_s23 + $0x230] sm:$0xff]  ;;  %v326_v16 = vld [vmem:[%s3484_s23 + $0x238] sm:$0xff] }
  0x2a   : > { %837 = vadd.xlane.f32.xlu0 %v836_v60  ;;  %v864_v36 = vadd.f32 %v575_v21, %v574_v20  ;;  %v583_v37 = vmul.f32 %v3475_v7, %v306_v24  ;;  %v584_v38 = vmul.f32 %v3477_v8, %v307_v25  ;;  %v585_v39 = vmul.f32 %v3479_v9, %v308_v26  ;;  %v321_v19 = vld [vmem:[%s3484_s23 + $0x210] sm:$0xff]  ;;  %v322_v20 = vld [vmem:[%s3484_s23 + $0x218] sm:$0xff]  ;;  %v323_v24 = vld [vmem:[%s3484_s23 + $0x220] sm:$0xff] }
  0x2b   : > { %v865_v41 = vsel %vm794_vm0, %v576_v23, 0.0  ;;  %v580_v42 = vmul.f32 %v3475_v7, %v303_v27  ;;  %v581_v43 = vmul.f32 %v3477_v8, %v304_v28  ;;  %v582_v44 = vmul.f32 %v3479_v9, %v305_v29 }
  0x2c   : > { %v589_v45 = vmul.f32 %v3475_v7, %v312_v34  ;;  %v590_v46 = vmul.f32 %v3477_v8, %v313_v35  ;;  %v591_v49 = vmul.f32 %v3479_v9, %v314_v40  ;;  %v871_v53 = vadd.f32 %v870_v33, %v869_v32  ;;  %v330_v35 = vld [vmem:[%s3484_s23 + $0x258] sm:$0xff]  ;;  %v329_v40 = vld [vmem:[%s3484_s23 + $0x250] sm:$0xff] }
  0x2d   : > { %852 = vadd.xlane.f32.xlu1 %v851_v10  ;;  %v866_v54 = vadd.f32 %v865_v41, %v864_v36  ;;  %v879_v55 = vadd.f32 %v584_v38, %v583_v37  ;;  %v880_v56 = vsel %vm794_vm0, %v585_v39, 0.0  ;;  %v874_v59 = vadd.f32 %v581_v43, %v580_v42  ;;  %v331_v36 = vld [vmem:[%s3484_s23 + $0x260] sm:$0xff]  ;;  %v332_v37 = vld [vmem:[%s3484_s23 + $0x268] sm:$0xff] }
  0x2e   : > { %847 = vadd.xlane.f32.xlu0 %v846_v22  ;;  %v875_v60 = vsel %vm794_vm0, %v582_v44, 0.0  ;;  %v586_v61 = vmul.f32 %v3475_v7, %v309_v47  ;;  %v587_v62 = vmul.f32 %v3477_v8, %v310_v48  ;;  %v889_v1 = vadd.f32 %v590_v46, %v589_v45  ;;  %v327_v38 = vld [vmem:[%s3484_s23 + $0x240] sm:$0xff]  ;;  %v328_v39 = vld [vmem:[%s3484_s23 + $0x248] sm:$0xff]  ;;  %v337_v46 = vld [vmem:[%s3484_s23 + $0x290] sm:$0xff] }
  0x2f   : > { %v588_v2 = vmul.f32 %v3479_v9, %v311_v50  ;;  %v595_v3 = vmul.f32 %v3475_v7, %v318_v51  ;;  %v596_v4 = vmul.f32 %v3477_v8, %v319_v52  ;;  %v890_v5 = vsel %vm794_vm0, %v591_v49, 0.0  ;;  %v336_v45 = vld [vmem:[%s3484_s23 + $0x288] sm:$0xff]  ;;  %v338_v51 = vld [vmem:[%s3484_s23 + $0x298] sm:$0xff] }
  0x30   : > { %v592_v6 = vmul.f32 %v3475_v7, %v315_v57  ;;  %v593_v10 = vmul.f32 %v3477_v8, %v316_v58  ;;  %v881_v11 = vadd.f32 %v880_v56, %v879_v55  ;;  %v597_v12 = vmul.f32 %v3479_v9, %v320_v63  ;;  %v333_v58 = vld [vmem:[%s3484_s23 + $0x270] sm:$0xff]  ;;  %v343_v63 = vld [vmem:[%s3484_s23 + $0x2c0] sm:$0xff] }
  0x31   : > { %862 = vadd.xlane.f32.xlu1 %v861_v30  ;;  %v594_v13 = vmul.f32 %v3479_v9, %v317_v0  ;;  %v876_v17 = vadd.f32 %v875_v60, %v874_v59  ;;  %v884_v18 = vadd.f32 %v587_v62, %v586_v61  ;;  %v891_v21 = vadd.f32 %v890_v5, %v889_v1  ;;  %v334_v59 = vld [vmem:[%s3484_s23 + $0x278] sm:$0xff]  ;;  %v335_v61 = vld [vmem:[%s3484_s23 + $0x280] sm:$0xff]  ;;  %v340_v5 = vld [vmem:[%s3484_s23 + $0x2a8] sm:$0xff] }
  0x32   : > { %857 = vadd.xlane.f32.xlu0 %v856_v31  ;;  %v885_v22 = vsel %vm794_vm0, %v588_v2, 0.0  ;;  %v899_v23 = vadd.f32 %v596_v4, %v595_v3  ;;  %v894_v25 = vadd.f32 %v593_v10, %v592_v6  ;;  %v601_v26 = vmul.f32 %v3475_v7, %v324_v14  ;;  %v342_v62 = vld [vmem:[%s3484_s23 + $0x2b8] sm:$0xff]  ;;  %v339_v4 = vld [vmem:[%s3484_s23 + $0x2a0] sm:$0xff]  ;;  %v341_v14 = vld [vmem:[%s3484_s23 + $0x2b0] sm:$0xff] }
  0x33   : > { %v602_v27 = vmul.f32 %v3477_v8, %v325_v15  ;;  %v603_v28 = vmul.f32 %v3479_v9, %v326_v16  ;;  %v900_v29 = vsel %vm794_vm0, %v597_v12, 0.0  ;;  %v895_v30 = vsel %vm794_vm0, %v594_v13, 0.0  ;;  %v344_v13 = vld [vmem:[%s3484_s23 + $0x2c8] sm:$0xff] }
  0x34   : > { %v598_v31 = vmul.f32 %v3475_v7, %v321_v19  ;;  %v599_v32 = vmul.f32 %v3477_v8, %v322_v20  ;;  %v886_v33 = vadd.f32 %v885_v22, %v884_v18  ;;  %v600_v34 = vmul.f32 %v3479_v9, %v323_v24 }
  0x35   : > { %872 = vadd.xlane.f32.xlu1 %v871_v53  ;;  %v901_v41 = vadd.f32 %v900_v29, %v899_v23  ;;  %v896_v42 = vadd.f32 %v895_v30, %v894_v25  ;;  %v909_v43 = vadd.f32 %v602_v27, %v601_v26  ;;  %v910_v44 = vsel %vm794_vm0, %v603_v28, 0.0  ;;  %v348_v25 = vld [vmem:[%s3484_s23 + $0x2e8] sm:$0xff]  ;;  %v349_v26 = vld [vmem:[%s3484_s23 + $0x2f0] sm:$0xff]  ;;  %v350_v27 = vld [vmem:[%s3484_s23 + $0x2f8] sm:$0xff] }
  0x36   : > { %867 = vadd.xlane.f32.xlu0 %v866_v54  ;;  %v904_v47 = vadd.f32 %v599_v32, %v598_v31  ;;  %v607_v48 = vmul.f32 %v3475_v7, %v330_v35  ;;  %v608_v49 = vmul.f32 %v3477_v8, %v331_v36  ;;  %v609_v50 = vmul.f32 %v3479_v9, %v332_v37  ;;  %v345_v30 = vld [vmem:[%s3484_s23 + $0x2d0] sm:$0xff]  ;;  %v346_v31 = vld [vmem:[%s3484_s23 + $0x2d8] sm:$0xff]  ;;  %v347_v35 = vld [vmem:[%s3484_s23 + $0x2e0] sm:$0xff] }
  0x37   : > { %v905_v52 = vsel %vm794_vm0, %v600_v34, 0.0  ;;  %v604_v53 = vmul.f32 %v3475_v7, %v327_v38  ;;  %v605_v54 = vmul.f32 %v3477_v8, %v328_v39  ;;  %v606_v55 = vmul.f32 %v3479_v9, %v329_v40 }
  0x38   : > { %v613_v56 = vmul.f32 %v3475_v7, %v336_v45  ;;  %v614_v57 = vmul.f32 %v3477_v8, %v337_v46  ;;  %v615_v60 = vmul.f32 %v3479_v9, %v338_v51  ;;  %v911_v0 = vadd.f32 %v910_v44, %v909_v43  ;;  %v354_v46 = vld [vmem:[%s3484_s23 + $0x318] sm:$0xff]  ;;  %v353_v51 = vld [vmem:[%s3484_s23 + $0x310] sm:$0xff] }
  0x39   : > { %882 = vadd.xlane.f32.xlu1 %v881_v11  ;;  %v906_v1 = vadd.f32 %v905_v52, %v904_v47  ;;  %v919_v2 = vadd.f32 %v608_v49, %v607_v48  ;;  %v920_v3 = vsel %vm794_vm0, %v609_v50, 0.0  ;;  %v914_v6 = vadd.f32 %v605_v54, %v604_v53  ;;  %v355_v47 = vld [vmem:[%s3484_s23 + $0x320] sm:$0xff]  ;;  %v356_v48 = vld [vmem:[%s3484_s23 + $0x328] sm:$0xff] }
  0x3a   : > { %877 = vadd.xlane.f32.xlu0 %v876_v17  ;;  %v915_v10 = vsel %vm794_vm0, %v606_v55, 0.0  ;;  %v610_v11 = vmul.f32 %v3475_v7, %v333_v58  ;;  %v611_v12 = vmul.f32 %v3477_v8, %v334_v59  ;;  %v929_v15 = vadd.f32 %v614_v57, %v613_v56  ;;  %v351_v49 = vld [vmem:[%s3484_s23 + $0x300] sm:$0xff]  ;;  %v352_v50 = vld [vmem:[%s3484_s23 + $0x308] sm:$0xff]  ;;  %v361_v57 = vld [vmem:[%s3484_s23 + $0x350] sm:$0xff] }
  0x3b   : > { %v612_v16 = vmul.f32 %v3479_v9, %v335_v61  ;;  %v619_v17 = vmul.f32 %v3475_v7, %v342_v62  ;;  %v620_v18 = vmul.f32 %v3477_v8, %v343_v63  ;;  %v930_v19 = vsel %vm794_vm0, %v615_v60, 0.0  ;;  %v360_v56 = vld [vmem:[%s3484_s23 + $0x348] sm:$0xff]  ;;  %v362_v62 = vld [vmem:[%s3484_s23 + $0x358] sm:$0xff] }
  0x3c   : > { %v616_v20 = vmul.f32 %v3475_v7, %v339_v4  ;;  %v921_v22 = vadd.f32 %v920_v3, %v919_v2  ;;  %v621_v23 = vmul.f32 %v3479_v9, %v344_v13  ;;  %v618_v24 = vmul.f32 %v3479_v9, %v341_v14  ;;  %v367_v13 = vld [vmem:[%s3484_s23 + $0x380] sm:$0xff] }
  0x3d   : > { %892 = vadd.xlane.f32.xlu1 %v891_v21  ;;  %v617_v21 = vmul.f32 %v3477_v8, %v340_v5  ;;  %v916_v28 = vadd.f32 %v915_v10, %v914_v6  ;;  %v924_v29 = vadd.f32 %v611_v12, %v610_v11  ;;  %v931_v32 = vadd.f32 %v930_v19, %v929_v15  ;;  %v357_v5 = vld [vmem:[%s3484_s23 + $0x330] sm:$0xff]  ;;  %v358_v6 = vld [vmem:[%s3484_s23 + $0x338] sm:$0xff]  ;;  %v359_v11 = vld [vmem:[%s3484_s23 + $0x340] sm:$0xff] }
  0x3e   : > { %887 = vadd.xlane.f32.xlu0 %v886_v33  ;;  %v925_v33 = vsel %vm794_vm0, %v612_v16, 0.0  ;;  %v939_v34 = vadd.f32 %v620_v18, %v619_v17  ;;  %v625_v37 = vmul.f32 %v3475_v7, %v348_v25  ;;  %v626_v38 = vmul.f32 %v3477_v8, %v349_v26  ;;  %v366_v12 = vld [vmem:[%s3484_s23 + $0x378] sm:$0xff]  ;;  %v363_v18 = vld [vmem:[%s3484_s23 + $0x360] sm:$0xff]  ;;  %v364_v19 = vld [vmem:[%s3484_s23 + $0x368] sm:$0xff] }
  0x3f   : > { %v934_v36 = vadd.f32 %v617_v21, %v616_v20  ;;  %v627_v39 = vmul.f32 %v3479_v9, %v350_v27  ;;  %v940_v40 = vsel %vm794_vm0, %v621_v23, 0.0  ;;  %v623_v43 = vmul.f32 %v3477_v8, %v346_v31  ;;  %v365_v25 = vld [vmem:[%s3484_s23 + $0x370] sm:$0xff] }
  0x40   : > { %v926_v44 = vadd.f32 %v925_v33, %v924_v29  ;;  %v624_v45 = vmul.f32 %v3479_v9, %v347_v35  ;;  %v941_v52 = vadd.f32 %v940_v40, %v939_v34  ;;  %v949_v54 = vadd.f32 %v626_v38, %v625_v37  ;;  %v373_v37 = vld [vmem:[%s3484_s23 + $0x3b0] sm:$0xff]  ;;  %v374_v38 = vld [vmem:[%s3484_s23 + $0x3b8] sm:$0xff] }
  0x41   : > { %902 = vadd.xlane.f32.xlu1 %v901_v41  ;;  %v935_v41 = vsel %vm794_vm0, %v618_v24, 0.0  ;;  %v950_v55 = vsel %vm794_vm0, %v627_v39, 0.0  ;;  %v631_v59 = vmul.f32 %v3475_v7, %v354_v46  ;;  %v632_v60 = vmul.f32 %v3477_v8, %v355_v47  ;;  %v368_v24 = vld [vmem:[%s3484_s23 + $0x388] sm:$0xff]  ;;  %v371_v46 = vld [vmem:[%s3484_s23 + $0x3a0] sm:$0xff] }
  0x42   : > { %897 = vadd.xlane.f32.xlu0 %v896_v42  ;;  %v622_v42 = vmul.f32 %v3475_v7, %v345_v30  ;;  %v936_v53 = vadd.f32 %v935_v41, %v934_v36  ;;  %v633_v61 = vmul.f32 %v3479_v9, %v356_v48  ;;  %v945_v63 = vsel %vm794_vm0, %v624_v45, 0.0  ;;  %v372_v36 = vld [vmem:[%s3484_s23 + $0x3a8] sm:$0xff]  ;;  %v369_v41 = vld [vmem:[%s3484_s23 + $0x390] sm:$0xff] }
  0x43   : > { %v630_v2 = vmul.f32 %v3479_v9, %v353_v51  ;;  %v637_v3 = vmul.f32 %v3475_v7, %v360_v56  ;;  %v638_v4 = vmul.f32 %v3477_v8, %v361_v57  ;;  %v639_v10 = vmul.f32 %v3479_v9, %v362_v62  ;;  %v378_v57 = vld [vmem:[%s3484_s23 + $0x3d8] sm:$0xff]  ;;  %v377_v62 = vld [vmem:[%s3484_s23 + $0x3d0] sm:$0xff] }
  0x44   : > { %v944_v58 = vadd.f32 %v623_v43, %v622_v42  ;;  %v951_v14 = vadd.f32 %v950_v55, %v949_v54  ;;  %v959_v16 = vadd.f32 %v632_v60, %v631_v59  ;;  %v960_v17 = vsel %vm794_vm0, %v633_v61, 0.0  ;;  %v370_v42 = vld [vmem:[%s3484_s23 + $0x398] sm:$0xff]  ;;  %v380_v59 = vld [vmem:[%s3484_s23 + $0x3e8] sm:$0xff]  ;;  %v375_v60 = vld [vmem:[%s3484_s23 + $0x3c0] sm:$0xff] }
  0x45   : > { %912 = vadd.xlane.f32.xlu1 %v911_v0  ;;  %v628_v0 = vmul.f32 %v3475_v7, %v351_v49  ;;  %v955_v21 = vsel %vm794_vm0, %v630_v2, 0.0  ;;  %v635_v23 = vmul.f32 %v3477_v8, %v358_v6  ;;  %v969_v26 = vadd.f32 %v638_v4, %v637_v3  ;;  %v376_v61 = vld [vmem:[%s3484_s23 + $0x3c8] sm:$0xff]  ;;  %v385_v4 = vld [vmem:[%s3484_s23 + $0x410] sm:$0xff] }
  0x46   : > { %907 = vadd.xlane.f32.xlu0 %v906_v1  ;;  %v629_v1 = vmul.f32 %v3477_v8, %v352_v50  ;;  %v946_v15 = vadd.f32 %v945_v63, %v944_v58  ;;  %v636_v27 = vmul.f32 %v3479_v9, %v359_v11  ;;  %v644_v29 = vmul.f32 %v3477_v8, %v367_v13  ;;  %v379_v58 = vld [vmem:[%s3484_s23 + $0x3e0] sm:$0xff]  ;;  %v384_v3 = vld [vmem:[%s3484_s23 + $0x408] sm:$0xff] }
  0x47   : > { %v970_v30 = vsel %vm794_vm0, %v639_v10, 0.0  ;;  %v640_v31 = vmul.f32 %v3475_v7, %v363_v18  ;;  %v961_v33 = vadd.f32 %v960_v17, %v959_v16  ;;  %v645_v34 = vmul.f32 %v3479_v9, %v368_v24  ;;  %v391_v24 = vld [vmem:[%s3484_s23 + $0x440] sm:$0xff] }
  0x48   : > { %v954_v20 = vadd.f32 %v629_v1, %v628_v0  ;;  %v642_v35 = vmul.f32 %v3479_v9, %v365_v25  ;;  %v971_v43 = vadd.f32 %v970_v30, %v969_v26  ;;  %v649_v48 = vmul.f32 %v3475_v7, %v372_v36  ;;  %v388_v30 = vld [vmem:[%s3484_s23 + $0x428] sm:$0xff]  ;;  %v389_v36 = vld [vmem:[%s3484_s23 + $0x430] sm:$0xff] }
  0x49   : > { %922 = vadd.xlane.f32.xlu1 %v921_v22  ;;  %v634_v22 = vmul.f32 %v3475_v7, %v357_v5  ;;  %v650_v49 = vmul.f32 %v3477_v8, %v373_v37  ;;  %v651_v50 = vmul.f32 %v3479_v9, %v374_v38  ;;  %v980_v51 = vsel %vm794_vm0, %v645_v34, 0.0 }
  0x4a   : > { %917 = vadd.xlane.f32.xlu0 %v916_v28  ;;  %v643_v28 = vmul.f32 %v3475_v7, %v366_v12  ;;  %v956_v39 = vadd.f32 %v955_v21, %v954_v20  ;;  %v647_v54 = vmul.f32 %v3477_v8, %v370_v42  ;;  %v648_v56 = vmul.f32 %v3479_v9, %v371_v46  ;;  %v386_v12 = vld [vmem:[%s3484_s23 + $0x418] sm:$0xff] }
  0x4b   : > { %v964_v40 = vadd.f32 %v635_v23, %v634_v22  ;;  %v989_v1 = vadd.f32 %v650_v49, %v649_v48  ;;  %v990_v2 = vsel %vm794_vm0, %v651_v50, 0.0  ;;  %v655_v6 = vmul.f32 %v3475_v7, %v378_v57  ;;  %v382_v20 = vld [vmem:[%s3484_s23 + $0x3f8] sm:$0xff]  ;;  %v383_v22 = vld [vmem:[%s3484_s23 + $0x400] sm:$0xff]  ;;  %v397_v48 = vld [vmem:[%s3484_s23 + $0x470] sm:$0xff] }
  0x4c   : > { %v979_v45 = vadd.f32 %v644_v29, %v643_v28  ;;  %v656_v10 = vmul.f32 %v3477_v8, %v379_v58  ;;  %v657_v11 = vmul.f32 %v3479_v9, %v380_v59  ;;  %v985_v13 = vsel %vm794_vm0, %v648_v56, 0.0  ;;  %v390_v23 = vld [vmem:[%s3484_s23 + $0x438] sm:$0xff]  ;;  %v387_v29 = vld [vmem:[%s3484_s23 + $0x420] sm:$0xff] }
  0x4d   : > { %932 = vadd.xlane.f32.xlu1 %v931_v32  ;;  %v641_v32 = vmul.f32 %v3477_v8, %v364_v19  ;;  %v654_v16 = vmul.f32 %v3479_v9, %v377_v62  ;;  %v661_v17 = vmul.f32 %v3475_v7, %v384_v3  ;;  %v662_v18 = vmul.f32 %v3477_v8, %v385_v4  ;;  %v381_v19 = vld [vmem:[%s3484_s23 + $0x3f0] sm:$0xff]  ;;  %v398_v49 = vld [vmem:[%s3484_s23 + $0x478] sm:$0xff]  ;;  %v395_v57 = vld [vmem:[%s3484_s23 + $0x460] sm:$0xff] }
  0x4e   : > { %927 = vadd.xlane.f32.xlu0 %v926_v44  ;;  %v965_v44 = vsel %vm794_vm0, %v636_v27, 0.0  ;;  %v981_v63 = vadd.f32 %v980_v51, %v979_v45  ;;  %v663_v21 = vmul.f32 %v3479_v9, %v386_v12  ;;  %v991_v25 = vadd.f32 %v990_v2, %v989_v1  ;;  %v402_v4 = vld [vmem:[%s3484_s23 + $0x498] sm:$0xff]  ;;  %v401_v12 = vld [vmem:[%s3484_s23 + $0x490] sm:$0xff] }
  0x4f   : > { %v974_v47 = vadd.f32 %v641_v32, %v640_v31  ;;  %v966_v55 = vadd.f32 %v965_v44, %v964_v40  ;;  %v999_v27 = vadd.f32 %v656_v10, %v655_v6  ;;  %v1000_v28 = vsel %vm794_vm0, %v657_v11, 0.0  ;;  %v404_v6 = vld [vmem:[%s3484_s23 + $0x4a8] sm:$0xff]  ;;  %v399_v10 = vld [vmem:[%s3484_s23 + $0x480] sm:$0xff] }
  0x50   : > { %v995_v32 = vsel %vm794_vm0, %v654_v16, 0.0  ;;  %v659_v34 = vmul.f32 %v3477_v8, %v382_v20  ;;  %v1009_v37 = vadd.f32 %v662_v18, %v661_v17  ;;  %v660_v38 = vmul.f32 %v3479_v9, %v383_v22  ;;  %v400_v11 = vld [vmem:[%s3484_s23 + $0x488] sm:$0xff]  ;;  %v409_v18 = vld [vmem:[%s3484_s23 + $0x4d0] sm:$0xff] }
  0x51   : > { %942 = vadd.xlane.f32.xlu1 %v941_v52  ;;  %v975_v52 = vsel %vm794_vm0, %v642_v35, 0.0  ;;  %v392_v35 = vld [vmem:[%s3484_s23 + $0x448] sm:$0xff]  ;;  %v668_v40 = vmul.f32 %v3477_v8, %v391_v24  ;;  %v664_v42 = vmul.f32 %v3475_v7, %v387_v29  ;;  %v1001_v44 = vadd.f32 %v1000_v28, %v999_v27 }
  0x52   : > { %937 = vadd.xlane.f32.xlu0 %v936_v53  ;;  %v646_v53 = vmul.f32 %v3475_v7, %v369_v41  ;;  %v976_v0 = vadd.f32 %v975_v52, %v974_v47  ;;  %v1010_v41 = vsel %vm794_vm0, %v663_v21, 0.0  ;;  %v669_v45 = vmul.f32 %v3479_v9, %v392_v35  ;;  %v396_v47 = vld [vmem:[%s3484_s23 + $0x468] sm:$0xff]  ;;  %v393_v52 = vld [vmem:[%s3484_s23 + $0x450] sm:$0xff]  ;;  %v415_v35 = vld [vmem:[%s3484_s23 + $0x500] sm:$0xff] }
  0x53   : > { %v666_v46 = vmul.f32 %v3479_v9, %v389_v36  ;;  %v673_v59 = vmul.f32 %v3475_v7, %v396_v47  ;;  %v672_v3 = vmul.f32 %v3479_v9, %v395_v57  ;;  %v408_v17 = vld [vmem:[%s3484_s23 + $0x4c8] sm:$0xff]  ;;  %v679_v20 = vmul.f32 %v3475_v7, %v402_v4  ;;  %v413_v47 = vld [vmem:[%s3484_s23 + $0x4f0] sm:$0xff]  ;;  %v419_v4 = vld [vmem:[%s3484_s23 + $0x520] sm:$0xff] }
  0x54   : > { %v984_v5 = vadd.f32 %v647_v54, %v646_v53  ;;  %v394_v53 = vld [vmem:[%s3484_s23 + $0x458] sm:$0xff]  ;;  %v1011_v54 = vadd.f32 %v1010_v41, %v1009_v37  ;;  %v1020_v62 = vsel %vm794_vm0, %v669_v45, 0.0  ;;  %v681_v22 = vmul.f32 %v3479_v9, %v404_v6  ;;  %v412_v41 = vld [vmem:[%s3484_s23 + $0x4e8] sm:$0xff] }
  0x55   : > { %952 = vadd.xlane.f32.xlu1 %v951_v14  ;;  %v652_v14 = vmul.f32 %v3475_v7, %v375_v60  ;;  %v674_v60 = vmul.f32 %v3477_v8, %v397_v48  ;;  %v671_v1 = vmul.f32 %v3477_v8, %v394_v53  ;;  %v1025_v24 = vsel %vm794_vm0, %v672_v3, 0.0 }
  0x56   : > { %947 = vadd.xlane.f32.xlu0 %v946_v15  ;;  %v653_v15 = vmul.f32 %v3477_v8, %v376_v61  ;;  %v986_v26 = vadd.f32 %v985_v13, %v984_v5  ;;  %v675_v61 = vmul.f32 %v3479_v9, %v398_v49  ;;  %v403_v5 = vld [vmem:[%s3484_s23 + $0x4a0] sm:$0xff]  ;;  %v678_v27 = vmul.f32 %v3479_v9, %v401_v12 }
  0x57   : > { %v680_v21 = vmul.f32 %v3477_v8, %v403_v5  ;;  %v685_v28 = vmul.f32 %v3475_v7, %v408_v17  ;;  %v686_v29 = vmul.f32 %v3477_v8, %v409_v18  ;;  %v690_v57 = vmul.f32 %v3479_v9, %v413_v47  ;;  %v426_v18 = vld [vmem:[%s3484_s23 + $0x558] sm:$0xff] }
  0x58   : > { %v994_v31 = vadd.f32 %v653_v15, %v652_v14  ;;  %v1029_v15 = vadd.f32 %v674_v60, %v673_v59  ;;  %v1030_v16 = vsel %vm794_vm0, %v675_v61, 0.0  ;;  %v421_v59 = vld [vmem:[%s3484_s23 + $0x530] sm:$0xff]  ;;  %v422_v60 = vld [vmem:[%s3484_s23 + $0x538] sm:$0xff]  ;;  %v696_v17 = vmul.f32 %v3479_v9, %v419_v4 }
  0x59   : > { %962 = vadd.xlane.f32.xlu1 %v961_v33  ;;  %v658_v33 = vmul.f32 %v3475_v7, %v381_v19  ;;  %v1049_v48 = vadd.f32 %v686_v29, %v685_v28  ;;  %v432_v28 = vld [vmem:[%s3484_s23 + $0x588] sm:$0xff]  ;;  %v433_v29 = vld [vmem:[%s3484_s23 + $0x590] sm:$0xff] }
  0x5a   : > { %957 = vadd.xlane.f32.xlu0 %v956_v39  ;;  %v667_v39 = vmul.f32 %v3475_v7, %v390_v23  ;;  %v996_v50 = vadd.f32 %v995_v32, %v994_v31  ;;  %v410_v23 = vld [vmem:[%s3484_s23 + $0x4d8] sm:$0xff]  ;;  %v1031_v36 = vadd.f32 %v1030_v16, %v1029_v15 }
  0x5b   : > { %v1004_v51 = vadd.f32 %v659_v34, %v658_v33  ;;  %v406_v31 = vld [vmem:[%s3484_s23 + $0x4b8] sm:$0xff]  ;;  %v687_v32 = vmul.f32 %v3479_v9, %v410_v23  ;;  %v407_v33 = vld [vmem:[%s3484_s23 + $0x4c0] sm:$0xff]  ;;  %v425_v23 = vld [vmem:[%s3484_s23 + $0x550] sm:$0xff] }
  0x5c   : > { %v1019_v56 = vadd.f32 %v668_v40, %v667_v39  ;;  %v414_v34 = vld [vmem:[%s3484_s23 + $0x4f8] sm:$0xff]  ;;  %v1040_v39 = vsel %vm794_vm0, %v681_v22, 0.0  ;;  %v411_v40 = vld [vmem:[%s3484_s23 + $0x4e0] sm:$0xff]  ;;  %v683_v45 = vmul.f32 %v3477_v8, %v406_v31  ;;  %v684_v49 = vmul.f32 %v3479_v9, %v407_v33  ;;  %v424_v22 = vld [vmem:[%s3484_s23 + $0x548] sm:$0xff] }
  0x5d   : > { %972 = vadd.xlane.f32.xlu1 %v971_v43  ;;  %v665_v43 = vmul.f32 %v3477_v8, %v388_v30  ;;  %v405_v30 = vld [vmem:[%s3484_s23 + $0x4b0] sm:$0xff]  ;;  %v688_v53 = vmul.f32 %v3475_v7, %v411_v40  ;;  %v703_v31 = vmul.f32 %v3475_v7, %v426_v18  ;;  %v710_v40 = vmul.f32 %v3477_v8, %v433_v29  ;;  %v443_v18 = vld [vmem:[%s3484_s23 + $0x5e0] sm:$0xff]  ;;  %v450_v29 = vld [vmem:[%s3484_s23 + $0x618] sm:$0xff] }
  0x5e   : > { %967 = vadd.xlane.f32.xlu0 %v966_v55  ;;  %v1005_v55 = vsel %vm794_vm0, %v660_v38, 0.0  ;;  %v1021_v13 = vadd.f32 %v1020_v62, %v1019_v56  ;;  %v1039_v38 = vadd.f32 %v680_v21, %v679_v20  ;;  %v428_v20 = vld [vmem:[%s3484_s23 + $0x568] sm:$0xff]  ;;  %v423_v21 = vld [vmem:[%s3484_s23 + $0x540] sm:$0xff] }
  0x5f   : > { %v1014_v58 = vadd.f32 %v665_v43, %v664_v42  ;;  %v1006_v2 = vadd.f32 %v1005_v55, %v1004_v51  ;;  %v1035_v43 = vsel %vm794_vm0, %v678_v27, 0.0  ;;  %v692_v51 = vmul.f32 %v3477_v8, %v415_v35 }
  0x60   : > { %v1041_v55 = vadd.f32 %v1040_v39, %v1039_v38  ;;  %v705_v33 = vmul.f32 %v3479_v9, %v428_v20  ;;  %v1065_v35 = vsel %vm794_vm0, %v696_v17, 0.0  ;;  %v702_v38 = vmul.f32 %v3479_v9, %v425_v23 }
  0x61   : > { %982 = vadd.xlane.f32.xlu1 %v981_v63  ;;  %v1015_v63 = vsel %vm794_vm0, %v666_v46, 0.0  ;;  %v416_v46 = vld [vmem:[%s3484_s23 + $0x508] sm:$0xff]  ;;  %v709_v39 = vmul.f32 %v3475_v7, %v432_v28  ;;  %v720_v28 = vmul.f32 %v3479_v9, %v443_v18 }
  0x62   : > { %977 = vadd.xlane.f32.xlu0 %v976_v0  ;;  %v670_v0 = vmul.f32 %v3475_v7, %v393_v52  ;;  %v1016_v14 = vadd.f32 %v1015_v63, %v1014_v58  ;;  %v1050_v52 = vsel %vm794_vm0, %v687_v32, 0.0  ;;  %v693_v56 = vmul.f32 %v3479_v9, %v416_v46  ;;  %v420_v58 = vld [vmem:[%s3484_s23 + $0x528] sm:$0xff]  ;;  %v417_v63 = vld [vmem:[%s3484_s23 + $0x510] sm:$0xff]  ;;  %v439_v46 = vld [vmem:[%s3484_s23 + $0x5c0] sm:$0xff] }
  0x63   : > { %v697_v6 = vmul.f32 %v3475_v7, %v420_v58  ;;  %v437_v58 = vld [vmem:[%s3484_s23 + $0x5b0] sm:$0xff]  ;;  %v468_v18 = vld [vmem:[%s3484_s23 + $0x6a8] sm:$0xff] }
  0x64   : > { %v1024_v19 = vadd.f32 %v671_v1, %v670_v0  ;;  %v418_v0 = vld [vmem:[%s3484_s23 + $0x518] sm:$0xff]  ;;  %v1051_v1 = vadd.f32 %v1050_v52, %v1049_v48  ;;  %v1060_v12 = vsel %vm794_vm0, %v693_v56, 0.0  ;;  %v436_v52 = vld [vmem:[%s3484_s23 + $0x5a8] sm:$0xff]  ;;  %v714_v4 = vmul.f32 %v3479_v9, %v437_v58 }
  0x65   : > { %992 = vadd.xlane.f32.xlu1 %v991_v25  ;;  %v676_v25 = vmul.f32 %v3475_v7, %v399_v10  ;;  %v698_v10 = vmul.f32 %v3477_v8, %v421_v59  ;;  %v695_v15 = vmul.f32 %v3477_v8, %v418_v0  ;;  %v1089_v59 = vadd.f32 %v710_v40, %v709_v39  ;;  %v456_v39 = vld [vmem:[%s3484_s23 + $0x648] sm:$0xff]  ;;  %v457_v40 = vld [vmem:[%s3484_s23 + $0x650] sm:$0xff] }
  0x66   : > { %987 = vadd.xlane.f32.xlu0 %v986_v26  ;;  %v677_v26 = vmul.f32 %v3477_v8, %v400_v11  ;;  %v1026_v37 = vadd.f32 %v1025_v24, %v1024_v19  ;;  %v699_v11 = vmul.f32 %v3479_v9, %v422_v60  ;;  %v427_v19 = vld [vmem:[%s3484_s23 + $0x560] sm:$0xff] }
  0x67   : > { %v704_v32 = vmul.f32 %v3477_v8, %v427_v19 }
  0x68   : > { %v1034_v42 = vadd.f32 %v677_v26, %v676_v25  ;;  %v1069_v26 = vadd.f32 %v698_v10, %v697_v6  ;;  %v1070_v27 = vsel %vm794_vm0, %v699_v11, 0.0  ;;  %v445_v6 = vld [vmem:[%s3484_s23 + $0x5f0] sm:$0xff]  ;;  %v446_v10 = vld [vmem:[%s3484_s23 + $0x5f8] sm:$0xff] }
  0x69   : > { %1002 = vadd.xlane.f32.xlu1 %v1001_v44  ;;  %v682_v44 = vmul.f32 %v3475_v7, %v405_v30 }
  0x6a   : > { %997 = vadd.xlane.f32.xlu0 %v996_v50  ;;  %v691_v50 = vmul.f32 %v3475_v7, %v414_v34  ;;  %v1036_v61 = vadd.f32 %v1035_v43, %v1034_v42  ;;  %v434_v34 = vld [vmem:[%s3484_s23 + $0x598] sm:$0xff]  ;;  %v1071_v47 = vadd.f32 %v1070_v27, %v1069_v26 }
  0x6b   : > { %v1044_v62 = vadd.f32 %v683_v45, %v682_v44  ;;  %v430_v42 = vld [vmem:[%s3484_s23 + $0x578] sm:$0xff]  ;;  %v711_v43 = vmul.f32 %v3479_v9, %v434_v34  ;;  %v431_v44 = vld [vmem:[%s3484_s23 + $0x580] sm:$0xff]  ;;  %v449_v34 = vld [vmem:[%s3484_s23 + $0x610] sm:$0xff] }
  0x6c   : > { %v1059_v3 = vadd.f32 %v692_v51, %v691_v50  ;;  %v438_v45 = vld [vmem:[%s3484_s23 + $0x5b8] sm:$0xff]  ;;  %v1080_v50 = vsel %vm794_vm0, %v705_v33, 0.0  ;;  %v435_v51 = vld [vmem:[%s3484_s23 + $0x5a0] sm:$0xff]  ;;  %v707_v56 = vmul.f32 %v3477_v8, %v430_v42  ;;  %v708_v60 = vmul.f32 %v3479_v9, %v431_v44  ;;  %v448_v33 = vld [vmem:[%s3484_s23 + $0x608] sm:$0xff] }
  0x6d   : > { %1012 = vadd.xlane.f32.xlu1 %v1011_v54  ;;  %v689_v54 = vmul.f32 %v3477_v8, %v412_v41  ;;  %v429_v41 = vld [vmem:[%s3484_s23 + $0x570] sm:$0xff]  ;;  %v712_v0 = vmul.f32 %v3475_v7, %v435_v51  ;;  %v727_v42 = vmul.f32 %v3475_v7, %v450_v29  ;;  %v734_v51 = vmul.f32 %v3477_v8, %v457_v40 }
  0x6e   : > { %1007 = vadd.xlane.f32.xlu0 %v1006_v2  ;;  %v1045_v2 = vsel %vm794_vm0, %v684_v49, 0.0  ;;  %v1061_v24 = vadd.f32 %v1060_v12, %v1059_v3  ;;  %v1079_v49 = vadd.f32 %v704_v32, %v703_v31  ;;  %v452_v31 = vld [vmem:[%s3484_s23 + $0x628] sm:$0xff]  ;;  %v447_v32 = vld [vmem:[%s3484_s23 + $0x600] sm:$0xff] }
  0x6f   : > { %v1054_v5 = vadd.f32 %v689_v54, %v688_v53  ;;  %v1046_v16 = vadd.f32 %v1045_v2, %v1044_v62  ;;  %v1075_v54 = vsel %vm794_vm0, %v702_v38, 0.0  ;;  %v716_v62 = vmul.f32 %v3477_v8, %v439_v46 }
  0x70   : > { %v1081_v2 = vadd.f32 %v1080_v50, %v1079_v49  ;;  %v729_v44 = vmul.f32 %v3479_v9, %v452_v31  ;;  %v1105_v46 = vsel %vm794_vm0, %v720_v28, 0.0  ;;  %v726_v49 = vmul.f32 %v3479_v9, %v449_v34  ;;  %v474_v31 = vld [vmem:[%s3484_s23 + $0x6d8] sm:$0xff] }
  0x71   : > { %1022 = vadd.xlane.f32.xlu1 %v1021_v13  ;;  %v1055_v13 = vsel %vm794_vm0, %v690_v57, 0.0  ;;  %v440_v57 = vld [vmem:[%s3484_s23 + $0x5c8] sm:$0xff]  ;;  %v733_v50 = vmul.f32 %v3475_v7, %v456_v39 }
  0x72   : > { %1017 = vadd.xlane.f32.xlu0 %v1016_v14  ;;  %v694_v14 = vmul.f32 %v3475_v7, %v417_v63  ;;  %v1056_v25 = vadd.f32 %v1055_v13, %v1054_v5  ;;  %v1090_v63 = vsel %vm794_vm0, %v711_v43, 0.0  ;;  %v717_v3 = vmul.f32 %v3479_v9, %v440_v57  ;;  %v444_v5 = vld [vmem:[%s3484_s23 + $0x5e8] sm:$0xff]  ;;  %v441_v13 = vld [vmem:[%s3484_s23 + $0x5d0] sm:$0xff]  ;;  %v463_v57 = vld [vmem:[%s3484_s23 + $0x680] sm:$0xff] }
  0x73   : > { %v721_v20 = vmul.f32 %v3475_v7, %v444_v5  ;;  %v1129_v5 = vadd.f32 %v734_v51, %v733_v50 }
  0x74   : > { %v1064_v30 = vadd.f32 %v695_v15, %v694_v14  ;;  %v442_v14 = vld [vmem:[%s3484_s23 + $0x5d8] sm:$0xff]  ;;  %v1091_v15 = vadd.f32 %v1090_v63, %v1089_v59  ;;  %v1100_v23 = vsel %vm794_vm0, %v717_v3, 0.0  ;;  %v459_v63 = vld [vmem:[%s3484_s23 + $0x660] sm:$0xff] }
  0x75   : > { %1032 = vadd.xlane.f32.xlu1 %v1031_v36  ;;  %v700_v36 = vmul.f32 %v3475_v7, %v423_v21  ;;  %v722_v21 = vmul.f32 %v3477_v8, %v445_v6  ;;  %v719_v26 = vmul.f32 %v3477_v8, %v442_v14 }
  0x76   : > { %1027 = vadd.xlane.f32.xlu0 %v1026_v37  ;;  %v701_v37 = vmul.f32 %v3477_v8, %v424_v22  ;;  %v1066_v48 = vadd.f32 %v1065_v35, %v1064_v30  ;;  %v723_v22 = vmul.f32 %v3479_v9, %v446_v10  ;;  %v451_v30 = vld [vmem:[%s3484_s23 + $0x620] sm:$0xff] }
  0x77   : > { %v728_v43 = vmul.f32 %v3477_v8, %v451_v30 }
  0x78   : > { %v1074_v53 = vadd.f32 %v701_v37, %v700_v36  ;;  %v1109_v37 = vadd.f32 %v722_v21, %v721_v20  ;;  %v1110_v38 = vsel %vm794_vm0, %v723_v22, 0.0  ;;  %v470_v20 = vld [vmem:[%s3484_s23 + $0x6b8] sm:$0xff] }
  0x79   : > { %1042 = vadd.xlane.f32.xlu1 %v1041_v55  ;;  %v706_v55 = vmul.f32 %v3475_v7, %v429_v41 }
  0x7a   : > { %1037 = vadd.xlane.f32.xlu0 %v1036_v61  ;;  %v715_v61 = vmul.f32 %v3475_v7, %v438_v45  ;;  %v1076_v11 = vadd.f32 %v1075_v54, %v1074_v53  ;;  %v458_v45 = vld [vmem:[%s3484_s23 + $0x658] sm:$0xff]  ;;  %v1111_v58 = vadd.f32 %v1110_v38, %v1109_v37  ;;  %v476_v37 = vld [vmem:[%s3484_s23 + $0x6e8] sm:$0xff]  ;;  %v747_v38 = vmul.f32 %v3479_v9, %v470_v20 }
  0x7b   : > { %v1084_v12 = vadd.f32 %v707_v56, %v706_v55  ;;  %v454_v53 = vld [vmem:[%s3484_s23 + $0x638] sm:$0xff]  ;;  %v735_v54 = vmul.f32 %v3479_v9, %v458_v45  ;;  %v455_v55 = vld [vmem:[%s3484_s23 + $0x640] sm:$0xff] }
  0x7c   : > { %v1099_v17 = vadd.f32 %v716_v62, %v715_v61  ;;  %v462_v56 = vld [vmem:[%s3484_s23 + $0x678] sm:$0xff]  ;;  %v1120_v61 = vsel %vm794_vm0, %v729_v44, 0.0  ;;  %v464_v62 = vld [vmem:[%s3484_s23 + $0x688] sm:$0xff]  ;;  %v732_v6 = vmul.f32 %v3479_v9, %v455_v55  ;;  %v751_v44 = vmul.f32 %v3475_v7, %v474_v31 }
  0x7d   : > { %1052 = vadd.xlane.f32.xlu1 %v1051_v1  ;;  %v713_v1 = vmul.f32 %v3477_v8, %v436_v52  ;;  %v453_v52 = vld [vmem:[%s3484_s23 + $0x630] sm:$0xff]  ;;  %v739_v10 = vmul.f32 %v3475_v7, %v462_v56  ;;  %v741_v14 = vmul.f32 %v3479_v9, %v464_v62  ;;  %v1150_v56 = vsel %vm794_vm0, %v747_v38, 0.0 }
  0x7e   : > { %1047 = vadd.xlane.f32.xlu0 %v1046_v16  ;;  %v1085_v16 = vsel %vm794_vm0, %v708_v60, 0.0  ;;  %v1101_v35 = vadd.f32 %v1100_v23, %v1099_v17  ;;  %v1119_v60 = vadd.f32 %v728_v43, %v727_v42  ;;  %v730_v3 = vmul.f32 %v3475_v7, %v453_v52  ;;  %v480_v52 = vld [vmem:[%s3484_s23 + $0x708] sm:$0xff] }
  0x7f   : > { %v1094_v19 = vadd.f32 %v713_v1, %v712_v0  ;;  %v1086_v27 = vadd.f32 %v1085_v16, %v1084_v12  ;;  %v460_v0 = vld [vmem:[%s3484_s23 + $0x668] sm:$0xff]  ;;  %v461_v12 = vld [vmem:[%s3484_s23 + $0x670] sm:$0xff]  ;;  %v1125_v29 = vsel %vm794_vm0, %v732_v6, 0.0 }
  0x80   : > { %v737_v16 = vmul.f32 %v3477_v8, %v460_v0  ;;  %v1121_v17 = vadd.f32 %v1120_v61, %v1119_v60  ;;  %v738_v23 = vmul.f32 %v3479_v9, %v461_v12  ;;  %v478_v60 = vld [vmem:[%s3484_s23 + $0x6f8] sm:$0xff]  ;;  %v479_v61 = vld [vmem:[%s3484_s23 + $0x700] sm:$0xff] }
  0x81   : > { %1062 = vadd.xlane.f32.xlu1 %v1061_v24  ;;  %v1095_v24 = vsel %vm794_vm0, %v714_v4, 0.0  ;;  %v731_v4 = vmul.f32 %v3477_v8, %v454_v53  ;;  %v481_v53 = vld [vmem:[%s3484_s23 + $0x710] sm:$0xff]  ;;  %v486_v12 = vld [vmem:[%s3484_s23 + $0x738] sm:$0xff] }
  0x82   : > { %1057 = vadd.xlane.f32.xlu0 %v1056_v25  ;;  %v718_v25 = vmul.f32 %v3475_v7, %v441_v13  ;;  %v1096_v36 = vadd.f32 %v1095_v24, %v1094_v19  ;;  %v1130_v13 = vsel %vm794_vm0, %v735_v54, 0.0  ;;  %v469_v19 = vld [vmem:[%s3484_s23 + $0x6b0] sm:$0xff]  ;;  %v1135_v43 = vsel %vm794_vm0, %v738_v23, 0.0  ;;  %v482_v54 = vld [vmem:[%s3484_s23 + $0x718] sm:$0xff] }
  0x83   : > { %v1124_v22 = vadd.f32 %v731_v4, %v730_v3  ;;  %v465_v24 = vld [vmem:[%s3484_s23 + $0x690] sm:$0xff]  ;;  %v1131_v28 = vadd.f32 %v1130_v13, %v1129_v5  ;;  %v757_v3 = vmul.f32 %v3475_v7, %v480_v52  ;;  %v758_v4 = vmul.f32 %v3477_v8, %v481_v53 }
  0x84   : > { %v1104_v41 = vadd.f32 %v719_v26, %v718_v25  ;;  %v466_v25 = vld [vmem:[%s3484_s23 + $0x698] sm:$0xff]  ;;  %v467_v26 = vld [vmem:[%s3484_s23 + $0x6a0] sm:$0xff]  ;;  %v742_v39 = vmul.f32 %v3475_v7, %v465_v24  ;;  %v759_v5 = vmul.f32 %v3479_v9, %v482_v54  ;;  %v485_v23 = vld [vmem:[%s3484_s23 + $0x730] sm:$0xff] }
  0x85   : > { %1072 = vadd.xlane.f32.xlu1 %v1071_v47  ;;  %v724_v47 = vmul.f32 %v3475_v7, %v447_v32  ;;  %v475_v32 = vld [vmem:[%s3484_s23 + $0x6e0] sm:$0xff]  ;;  %v743_v40 = vmul.f32 %v3477_v8, %v466_v25  ;;  %v1126_v42 = vadd.f32 %v1125_v29, %v1124_v22  ;;  %v484_v22 = vld [vmem:[%s3484_s23 + $0x728] sm:$0xff]  ;;  %v498_v54 = vld [vmem:[%s3484_s23 + $0x798] sm:$0xff] }
  0x86   : > { %1067 = vadd.xlane.f32.xlu0 %v1066_v48  ;;  %v725_v48 = vmul.f32 %v3477_v8, %v448_v33  ;;  %v1106_v59 = vadd.f32 %v1105_v46, %v1104_v41  ;;  %v1140_v33 = vsel %vm794_vm0, %v741_v14, 0.0  ;;  %v744_v41 = vmul.f32 %v3479_v9, %v467_v26  ;;  %v1229_v14 = vld [vmem:[%s4016_s27] sm:$0xff]  ;;  %v492_v29 = vld [vmem:[%s3484_s23 + $0x768] sm:$0xff] }
  0x87   : > { %v752_v45 = vmul.f32 %v3477_v8, %v475_v32  ;;  %v753_v46 = vmul.f32 %v3479_v9, %v476_v37  ;;  %v1169_v26 = vadd.f32 %v758_v4, %v757_v3  ;;  %v761_v38 = vmul.f32 %v3477_v8, %v484_v22 }
  0x88   : > { %v1114_v1 = vadd.f32 %v725_v48, %v724_v47  ;;  %v471_v47 = vld [vmem:[%s3484_s23 + $0x6c0] sm:$0xff]  ;;  %v472_v48 = vld [vmem:[%s3484_s23 + $0x6c8] sm:$0xff] }
  0x89   : > { %1082 = vadd.xlane.f32.xlu1 %v1081_v2  ;;  %v1115_v2 = vsel %vm794_vm0, %v726_v49, 0.0  ;;  %v473_v49 = vld [vmem:[%s3484_s23 + $0x6d0] sm:$0xff]  ;;  %v1159_v62 = vadd.f32 %v752_v45, %v751_v44  ;;  %v749_v0 = vmul.f32 %v3477_v8, %v472_v48  ;;  %v490_v48 = vld [vmem:[%s3484_s23 + $0x758] sm:$0xff] }
  0x8a   : > { %1077 = vadd.xlane.f32.xlu0 %v1076_v11  ;;  %v740_v11 = vmul.f32 %v3477_v8, %v463_v57  ;;  %v1116_v21 = vadd.f32 %v1115_v2, %v1114_v1  ;;  %v1144_v57 = vadd.f32 %v743_v40, %v742_v39  ;;  %v750_v1 = vmul.f32 %v3479_v9, %v473_v49  ;;  %v1231_v40 = vld [vmem:[%s4016_s27 + $0x10] sm:$0xff]  ;;  %v491_v49 = vld [vmem:[%s3484_s23 + $0x760] sm:$0xff] }
  0x8b   : > { %v1160_v2 = vsel %vm794_vm0, %v753_v46, 0.0  ;;  %v762_v39 = vmul.f32 %v3479_v9, %v485_v23  ;;  %v767_v3 = vmul.f32 %v3477_v8, %v490_v48  ;;  %v768_v4 = vmul.f32 %v3479_v9, %v491_v49  ;;  %v506_v23 = vld [vmem:[%s3484_s23 + $0x7d8] sm:$0xff]  ;;  %v1234_v48 = vld [vmem:[%s4016_s27 + $0x28] sm:$0xff] }
  0x8c   : > { %v1139_v30 = vadd.f32 %v740_v11, %v739_v10  ;;  %v755_v10 = vmul.f32 %v3477_v8, %v478_v60  ;;  %v756_v11 = vmul.f32 %v3479_v9, %v479_v61  ;;  %v1155_v25 = vsel %vm794_vm0, %v750_v1, 0.0  ;;  %v495_v61 = vld [vmem:[%s3484_s23 + $0x780] sm:$0xff] }
  0x8d   : > { %1092 = vadd.xlane.f32.xlu1 %v1091_v15  ;;  %v736_v15 = vmul.f32 %v3475_v7, %v459_v63  ;;  %v748_v63 = vmul.f32 %v3475_v7, %v471_v47  ;;  %v489_v47 = vld [vmem:[%s3484_s23 + $0x750] sm:$0xff]  ;;  %v1175_v60 = vsel %vm794_vm0, %v762_v39, 0.0 }
  0x8e   : > { %1087 = vadd.xlane.f32.xlu0 %v1086_v27  ;;  %v3435_v27 = vmov 0   ;;  %v1141_v50 = vadd.f32 %v1140_v33, %v1139_v30  ;;  %v493_v30 = vld [vmem:[%s3484_s23 + $0x770] sm:$0xff]  ;;  %v1165_v32 = vsel %vm794_vm0, %v756_v11, 0.0  ;;  %v775_v11 = vmul.f32 %v3475_v7, %v498_v54 }
  0x8f   : > { %3077 = vset.pattern.permute.xlu1 %v3435_v27  ;;  %3078 = vset.pattern.permute.xlu0 %v3435_v27  ;;  %v1134_v34 = vadd.f32 %v737_v16, %v736_v15  ;;  %v487_v15 = vld [vmem:[%s3484_s23 + $0x740] sm:$0xff]  ;;  %v488_v16 = vld [vmem:[%s3484_s23 + $0x748] sm:$0xff]  ;;  %v1154_v20 = vadd.f32 %v749_v0, %v748_v63  ;;  %v1170_v27 = vsel %vm794_vm0, %v759_v5, 0.0  ;;  %v770_v44 = vmul.f32 %v3477_v8, %v493_v30  ;;  %v497_v63 = vld [vmem:[%s3484_s23 + $0x790] sm:$0xff] }
  0x90   : > { %v764_v33 = vmul.f32 %v3477_v8, %v487_v15  ;;  %v1232_v5 = vld [vmem:[%s4016_s27 + $0x18] sm:$0xff]  ;;  %v772_v15 = vmul.f32 %v3475_v7, %v495_v61 }
  0x91   : > { %1102 = vadd.xlane.f32.xlu1 %v1101_v35  ;;  %v745_v35 = vmul.f32 %v3475_v7, %v468_v18  ;;  %v1136_v55 = vadd.f32 %v1135_v43, %v1134_v34  ;;  %v765_v34 = vmul.f32 %v3479_v9, %v488_v16  ;;  %v769_v43 = vmul.f32 %v3475_v7, %v492_v29  ;;  %v501_v29 = vld [vmem:[%s3484_s23 + $0x7b0] sm:$0xff]  ;;  %v502_v30 = vld [vmem:[%s3484_s23 + $0x7b8] sm:$0xff] }
  0x92   : > { %1097 = vadd.xlane.f32.xlu0 %v1096_v36  ;;  %v746_v36 = vmul.f32 %v3477_v8, %v469_v19  ;;  %v1161_v19 = vadd.f32 %v1160_v2, %v1159_v62  ;;  %v496_v62 = vld [vmem:[%s3484_s23 + $0x788] sm:$0xff]  ;;  %v766_v2 = vmul.f32 %v3475_v7, %v489_v47 }
  0x93   : > { %v1180_v53 = vsel %vm794_vm0, %v765_v34, 0.0  ;;  %v1189_v1 = vadd.f32 %v770_v44, %v769_v43  ;;  %v773_v16 = vmul.f32 %v3477_v8, %v496_v62  ;;  %v779_v43 = vmul.f32 %v3477_v8, %v502_v30 }
  0x94   : > { %v1149_v51 = vadd.f32 %v746_v36, %v745_v35  ;;  %v494_v35 = vld [vmem:[%s3484_s23 + $0x778] sm:$0xff] }
  0x95   : > { %1112 = vadd.xlane.f32.xlu1 %v1111_v58  ;;  %v1145_v58 = vsel %vm794_vm0, %v744_v41, 0.0  ;;  %v771_v46 = vmul.f32 %v3479_v9, %v494_v35  ;;  %v1194_v39 = vadd.f32 %v773_v16, %v772_v15 }
  0x96   : > { %1107 = vadd.xlane.f32.xlu0 %v1106_v59  ;;  %v477_v59 = vld [vmem:[%s3484_s23 + $0x6f0] sm:$0xff]  ;;  %v1151_v13 = vadd.f32 %v1150_v56, %v1149_v51  ;;  %v1146_v18 = vadd.f32 %v1145_v58, %v1144_v57  ;;  %v500_v56 = vld [vmem:[%s3484_s23 + $0x7a8] sm:$0xff] }
  0x97   : > { %v754_v6 = vmul.f32 %v3475_v7, %v477_v59 }
  0x99   : > { %1122 = vadd.xlane.f32.xlu1 %v1121_v17  ;;  %v1164_v31 = vadd.f32 %v755_v10, %v754_v6  ;;  %v1190_v10 = vsel %vm794_vm0, %v771_v46, 0.0  ;;  %v511_v46 = vld [vmem:[%s3484_s23 + $0x800] sm:$0xff] }
  0x9a   : > { %1117 = vadd.xlane.f32.xlu0 %v1116_v21  ;;  %v483_v21 = vld [vmem:[%s3484_s23 + $0x720] sm:$0xff] }
  0x9b   : > { %v760_v37 = vmul.f32 %v3475_v7, %v483_v21  ;;  %v1166_v51 = vadd.f32 %v1165_v32, %v1164_v31  ;;  %v503_v31 = vld [vmem:[%s3484_s23 + $0x7c0] sm:$0xff] }
  0x9c   : > { %v780_v44 = vmul.f32 %v3479_v9, %v503_v31 }
  0x9d   : > { %1132 = vadd.xlane.f32.xlu1 %v1131_v28  ;;  %v763_v28 = vmul.f32 %v3475_v7, %v486_v12  ;;  %v1174_v59 = vadd.f32 %v761_v38, %v760_v37 }
  0x9e   : > { %1127 = vadd.xlane.f32.xlu0 %v1126_v42  ;;  %v1156_v42 = vadd.f32 %v1155_v25, %v1154_v20 }
  0x9f   : > { %v1179_v52 = vadd.f32 %v764_v33, %v763_v28  ;;  %v1176_v22 = vadd.f32 %v1175_v60, %v1174_v59  ;;  %v1185_v28 = vsel %vm794_vm0, %v768_v4, 0.0  ;;  %v1233_v33 = vld [vmem:[%s4016_s27 + $0x20] sm:$0xff]  ;;  %v1236_v59 = vld [vmem:[%s4016_s27 + $0x38] sm:$0xff]  ;;  %v1239_v4 = vld [vmem:[%s4016_s27 + $0x50] sm:$0xff] }
  0xa1   : > { %1142 = vadd.xlane.f32.xlu1 %v1141_v50  ;;  %v1171_v50 = vadd.f32 %v1170_v27, %v1169_v26  ;;  %v1181_v21 = vadd.f32 %v1180_v53, %v1179_v52  ;;  %v1191_v26 = vadd.f32 %v1190_v10, %v1189_v1  ;;  %v1184_v27 = vadd.f32 %v767_v3, %v766_v2  ;;  %v512_v52 = vld [vmem:[%s3484_s23 + $0x808] sm:$0xff]  ;;  %v509_v1 = vld [vmem:[%s3484_s23 + $0x7f0] sm:$0xff] }
  0xa2   : > { %1137 = vadd.xlane.f32.xlu0 %v1136_v55  ;;  %v808_v17 = vpop.xlane.xlu1 %807  ;;  %v499_v55 = vld [vmem:[%s3484_s23 + $0x7a0] sm:$0xff]  ;;  %v1235_v3 = vld [vmem:[%s4016_s27 + $0x30] sm:$0xff]  ;;  %v789_v10 = vmul.f32 %v3479_v9, %v512_v52 }
  0xa3   : > { %v798_v24 = vpop.xlane.xlu0 %797  ;;  %v1318_v57 = vadd.f32 %v1231_v40, %v808_v17  ;;  %v776_v12 = vmul.f32 %v3477_v8, %v499_v55  ;;  %v774_v17 = vmul.f32 %v3479_v9, %v497_v63  ;;  %v788_v63 = vmul.f32 %v3477_v8, %v511_v46 }
  0xa4   : > { %v1316_v36 = vadd.f32 %v1229_v14, %v798_v24  ;;  %v777_v14 = vmul.f32 %v3479_v9, %v500_v56 }
  0xa5   : > { %1152 = vadd.xlane.f32.xlu1 %v1151_v13  ;;  %v1230_v13 = vld [vmem:[%s4016_s27 + $0x8] sm:$0xff]  ;;  %v2978_v20 = vmul.f32 -1.442695, %v1318_v57  ;;  %v1199_v35 = vadd.f32 %v776_v12, %v775_v11  ;;  %v1195_v40 = vsel %vm794_vm0, %v774_v17, 0.0  ;;  %v507_v57 = vld [vmem:[%s3484_s23 + $0x7e0] sm:$0xff]  ;;  %v786_v17 = vmul.f32 %v3479_v9, %v509_v1 }
  0xa6   : > { %1147 = vadd.xlane.f32.xlu0 %v1146_v18  ;;  %v813_v41 = vpop.xlane.xlu1 %812  ;;  %v2976_v58 = vmul.f32 -1.442695, %v1316_v36  ;;  %v504_v18 = vld [vmem:[%s3484_s23 + $0x7c8] sm:$0xff]  ;;  %v1200_v38 = vsel %vm794_vm0, %v777_v14, 0.0  ;;  %v1196_v60 = vadd.f32 %v1195_v40, %v1194_v39  ;;  %v513_v14 = vld [vmem:[%s3484_s23 + $0x810] sm:$0xff] }
  0xa7   : > { %v803_v45 = vpop.xlane.xlu0 %802  ;;  %v1319_v24 = vadd.f32 %v1232_v5, %v813_v41  ;;  %v781_v36 = vmul.f32 %v3475_v7, %v504_v18  ;;  %v783_v41 = vmul.f32 %v3479_v9, %v506_v23  ;;  %v1201_v55 = vadd.f32 %v1200_v38, %v1199_v35  ;;  %v514_v18 = vld [vmem:[%s3484_s23 + $0x818] sm:$0xff]  ;;  %v515_v23 = vld [vmem:[%s3484_s23 + $0x820] sm:$0xff]  ;;  %v1238_v38 = vld [vmem:[%s4016_s27 + $0x48] sm:$0xff] }
  0xa8   : > { %3079 = vpow2.f32 %v2976_v58  ;;  %v1317_v32 = vadd.f32 %v1230_v13, %v803_v45  ;;  %v510_v45 = vld [vmem:[%s3484_s23 + $0x7f8] sm:$0xff]  ;;  %v508_v58 = vld [vmem:[%s3484_s23 + $0x7e8] sm:$0xff]  ;;  %v784_v13 = vmul.f32 %v3475_v7, %v507_v57 }
  0xa9   : > { %1162 = vadd.xlane.f32.xlu1 %v1161_v19  ;;  %v505_v19 = vld [vmem:[%s3484_s23 + $0x7d0] sm:$0xff]  ;;  %3081 = vpow2.f32 %v2978_v20  ;;  %v2979_v47 = vmul.f32 -1.442695, %v1319_v24  ;;  %v1210_v61 = vsel %vm794_vm0, %v783_v41, 0.0  ;;  %v787_v62 = vmul.f32 %v3475_v7, %v510_v45 }
  0xaa   : > { %1157 = vadd.xlane.f32.xlu0 %v1156_v42  ;;  %v4055_v0 = vpop.xlane.xlu1 %822  ;;  %v782_v37 = vmul.f32 %v3477_v8, %v505_v19  ;;  %v778_v42 = vmul.f32 %v3475_v7, %v501_v29  ;;  %v2977_v53 = vmul.f32 -1.442695, %v1317_v32  ;;  %v790_v29 = vmul.f32 %v3475_v7, %v513_v14 }
  0xab   : > { %v818_v6 = vpop.xlane.xlu0 %817  ;;  %v1321_v2 = vadd.f32 %v1234_v48, %v4055_v0  ;;  %3083 = vpow2.f32 %v2979_v47  ;;  %v785_v0 = vmul.f32 %v3477_v8, %v508_v58 }
  0xac   : > { %v1320_v49 = vadd.f32 %v1233_v33, %v818_v6  ;;  %v1209_v56 = vadd.f32 %v782_v37, %v781_v36  ;;  %v1204_v5 = vadd.f32 %v779_v43, %v778_v42  ;;  %v1205_v6 = vsel %vm794_vm0, %v780_v44, 0.0  ;;  %v1243_v42 = vld [vmem:[%s4016_s27 + $0x70] sm:$0xff]  ;;  %v1237_v44 = vld [vmem:[%s4016_s27 + $0x40] sm:$0xff] }
  0xad   : > { %1172 = vadd.xlane.f32.xlu1 %v1171_v50  ;;  %3085 = vpow2.f32 %v2977_v53  ;;  %v2981_v24 = vmul.f32 -1.442695, %v1321_v2  ;;  %v1214_v32 = vadd.f32 %v785_v0, %v784_v13  ;;  %v791_v33 = vmul.f32 %v3477_v8, %v514_v18 }
  0xae   : > { %1167 = vadd.xlane.f32.xlu0 %v1166_v51  ;;  %v833_v25 = vpop.xlane.xlu1 %832  ;;  %v1186_v51 = vadd.f32 %v1185_v28, %v1184_v27  ;;  %v2980_v11 = vmul.f32 -1.442695, %v1320_v49  ;;  %v1241_v27 = vld [vmem:[%s4016_s27 + $0x60] sm:$0xff]  ;;  %v1220_v28 = vsel %vm794_vm0, %v789_v10, 0.0  ;;  %v1215_v36 = vsel %vm794_vm0, %v786_v17, 0.0 }
  0xaf   : > { %v828_v34 = vpop.xlane.xlu0 %827  ;;  %v1323_v15 = vadd.f32 %v1236_v59, %v833_v25  ;;  %v792_v37 = vmul.f32 %v3479_v9, %v515_v23  ;;  %v1216_v46 = vadd.f32 %v1215_v36, %v1214_v32  ;;  %v1224_v47 = vadd.f32 %v791_v33, %v790_v29  ;;  %v1251_v29 = vld [vmem:[%s4016_s27 + $0xb0] sm:$0xff] }
  0xb0   : > { %v1322_v19 = vadd.f32 %v1235_v3, %v828_v34  ;;  %3087 = vpow2.f32 %v2980_v11  ;;  %v1242_v11 = vld [vmem:[%s4016_s27 + $0x68] sm:$0xff] }
  0xb1   : > { %1182 = vadd.xlane.f32.xlu1 %v1181_v21  ;;  %v1211_v21 = vadd.f32 %v1210_v61, %v1209_v56  ;;  %v2983_v34 = vmul.f32 -1.442695, %v1323_v15  ;;  %3089 = vpow2.f32 %v2981_v24  ;;  %v1225_v49 = vsel %vm794_vm0, %v792_v37, 0.0  ;;  %v1240_v56 = vld [vmem:[%s4016_s27 + $0x58] sm:$0xff] }
  0xb2   : > { %1177 = vadd.xlane.f32.xlu0 %v1176_v22  ;;  %v4088_v50 = vpop.xlane.xlu1 %842  ;;  %v1219_v22 = vadd.f32 %v788_v63, %v787_v62  ;;  %v2982_v39 = vmul.f32 -1.442695, %v1322_v19  ;;  %v1226_v59 = vadd.f32 %v1225_v49, %v1224_v47  ;;  %v1244_v24 = vld [vmem:[%s4016_s27 + $0x78] sm:$0xff] }
  0xb3   : > { %v4091_v54 = vpop.xlane.xlu0 %837  ;;  %v1325_v9 = vadd.f32 %v1238_v38, %v4088_v50 }
  0xb4   : > { %v1221_v41 = vadd.f32 %v1220_v28, %v1219_v22  ;;  %v1324_v53 = vadd.f32 %v1237_v44, %v4091_v54  ;;  %v1247_v54 = vld [vmem:[%s4016_s27 + $0x90] sm:$0xff] }
  0xb5   : > { %1192 = vadd.xlane.f32.xlu1 %v1191_v26  ;;  %v1206_v26 = vadd.f32 %v1205_v6, %v1204_v5  ;;  %v3080_v30 = vpop.eup %3079  ;;  %v2985_v50 = vmul.f32 -1.442695, %v1325_v9 }
  0xb6   : > { %1187 = vadd.xlane.f32.xlu0 %v1186_v51  ;;  %v4105_v12 = vpop.xlane.xlu1 %852  ;;  %v1664_v40 = vadd.f32 1.0, %v3080_v30  ;;  %v3082_v43 = vpop.eup %3081  ;;  %v2984_v2 = vmul.f32 -1.442695, %v1324_v53 }
  0xb7   : > { %v848_v16 = vpop.xlane.xlu0 %847  ;;  %v1666_v52 = vadd.f32 1.0, %v3082_v43  ;;  %v1327_v1 = vadd.f32 %v1240_v56, %v4105_v12  ;;  %v1249_v12 = vld [vmem:[%s4016_s27 + $0xa0] sm:$0xff]  ;;  %v1248_v43 = vld [vmem:[%s4016_s27 + $0x98] sm:$0xff] }
  0xb8   : > { %v1326_v20 = vadd.f32 %v1239_v4, %v848_v16 }
  0xb9   : > { %1202 = vadd.xlane.f32.xlu1 %v1201_v55  ;;  %v1245_v55 = vld [vmem:[%s4016_s27 + $0x80] sm:$0xff]  ;;  %v2987_v14 = vmul.f32 -1.442695, %v1327_v1  ;;  %v1252_v1 = vld [vmem:[%s4016_s27 + $0xb8] sm:$0xff] }
  0xba   : > { %1197 = vadd.xlane.f32.xlu0 %v1196_v60  ;;  %v4116_v25 = vpop.xlane.xlu1 %862  ;;  %v2986_v31 = vmul.f32 -1.442695, %v1326_v20  ;;  %v3084_v60 = vpop.eup %3083 }
  0xbb   : > { %v858_v35 = vpop.xlane.xlu0 %857  ;;  %v3086_v62 = vpop.eup %3085  ;;  %v1667_v3 = vadd.f32 1.0, %v3084_v60  ;;  %v1329_v17 = vadd.f32 %v1242_v11, %v4116_v25 }
  0xbc   : > { %v1328_v7 = vadd.f32 %v1241_v27, %v858_v35  ;;  %3091 = vpow2.f32 %v2986_v31  ;;  %v1665_v10 = vadd.f32 1.0, %v3086_v62  ;;  %v1246_v31 = vld [vmem:[%s4016_s27 + $0x88] sm:$0xff] }
  0xbd   : > { %1212 = vadd.xlane.f32.xlu1 %v1211_v21  ;;  %3093 = vpow2.f32 %v2983_v34  ;;  %v3088_v6 = vpop.eup %3087  ;;  %v2989_v25 = vmul.f32 -1.442695, %v1329_v17 }
  0xbe   : > { %1207 = vadd.xlane.f32.xlu0 %v1206_v26  ;;  %v4124_v8 = vpop.xlane.xlu1 %872  ;;  %v2988_v45 = vmul.f32 -1.442695, %v1328_v7  ;;  %3095 = vpow2.f32 %v2982_v39  ;;  %v3090_v15 = vpop.eup %3089  ;;  %v1668_v16 = vadd.f32 1.0, %v3088_v6 }
  0xbf   : > { %v868_v48 = vpop.xlane.xlu0 %867  ;;  %3097 = vrcp.f32 %v1664_v40  ;;  %v1669_v28 = vadd.f32 1.0, %v3090_v15  ;;  %v1331_v35 = vadd.f32 %v1244_v24, %v4124_v8  ;;  %v1253_v40 = vld [vmem:[%s4016_s27 + $0xc0] sm:$0xff] }
  0xc0   : > { %v1330_v51 = vadd.f32 %v1243_v42, %v868_v48  ;;  %3099 = vpow2.f32 %v2988_v45 }
  0xc1   : > { %1222 = vadd.xlane.f32.xlu1 %v1221_v41  ;;  %3101 = vrcp.f32 %v1666_v52  ;;  %v2991_v8 = vmul.f32 -1.442695, %v1331_v35 }
  0xc2   : > { %1217 = vadd.xlane.f32.xlu0 %v1216_v46  ;;  %v883_v57 = vpop.xlane.xlu1 %882  ;;  %v2990_v58 = vmul.f32 -1.442695, %v1330_v51 }
  0xc3   : > { %v878_v61 = vpop.xlane.xlu0 %877  ;;  %v1333_v7 = vadd.f32 %v1246_v31, %v883_v57  ;;  %v1250_v57 = vld [vmem:[%s4016_s27 + $0xa8] sm:$0xff] }
  0xc4   : > { %v1332_v63 = vadd.f32 %v1245_v55, %v878_v61  ;;  %3103 = vpow2.f32 %v2990_v58  ;;  %v1255_v55 = vld [vmem:[%s4016_s27 + $0xd0] sm:$0xff] }
  0xc5   : > { %3105 = vpow2.f32 %v2985_v50  ;;  %v2993_v52 = vmul.f32 -1.442695, %v1333_v7 }
  0xc6   : > { %1227 = vadd.xlane.f32.xlu0 %v1226_v59  ;;  %v4133_v4 = vpop.xlane.xlu1 %892  ;;  %v2992_v5 = vmul.f32 -1.442695, %v1332_v63 }
  0xc7   : > { %v888_v13 = vpop.xlane.xlu0 %887  ;;  %v1335_v53 = vadd.f32 %v1248_v43, %v4133_v4 }
  0xc8   : > { %3107 = vpow2.f32 %v2992_v5  ;;  %v1334_v0 = vadd.f32 %v1247_v54, %v888_v13  ;;  %v1257_v5 = vld [vmem:[%s4016_s27 + $0xe0] sm:$0xff] }
  0xc9   : > { %3109 = vpow2.f32 %v2984_v2  ;;  %v3092_v20 = vpop.eup %3091 }
  0xca   : > { %3111 = vrcp.f32 %v1667_v3  ;;  %v4138_v18 = vpop.xlane.xlu1 %902  ;;  %v2994_v19 = vmul.f32 -1.442695, %v1334_v0  ;;  %v3094_v22 = vpop.eup %3093  ;;  %v1674_v23 = vadd.f32 1.0, %v3092_v20  ;;  %v2995_v3 = vmul.f32 -1.442695, %v1335_v53  ;;  %v1259_v20 = vld [vmem:[%s4016_s27 + $0xf0] sm:$0xff] }
  0xcb   : > { %3113 = vrcp.f32 %v1665_v10  ;;  %v898_v21 = vpop.xlane.xlu0 %897  ;;  %v3096_v27 = vpop.eup %3095  ;;  %v1671_v39 = vadd.f32 1.0, %v3094_v22  ;;  %v1337_v4 = vadd.f32 %v1250_v57, %v4138_v18 }
  0xcc   : > { %3115 = vpow2.f32 %v2994_v19  ;;  %v1336_v26 = vadd.f32 %v1249_v12, %v898_v21  ;;  %v3098_v30 = vpop.eup %3097  ;;  %v1670_v42 = vadd.f32 1.0, %v3096_v27  ;;  %v1254_v27 = vld [vmem:[%s4016_s27 + $0xc8] sm:$0xff] }
  0xcd   : > { %3117 = vpow2.f32 %v2987_v14  ;;  %v3100_v34 = vpop.eup %3099  ;;  %v2997_v19 = vmul.f32 -1.442695, %v1337_v4 }
  0xce   : > { %3119 = vrcp.f32 %v1668_v16  ;;  %v913_v32 = vpop.xlane.xlu1 %912  ;;  %v2996_v33 = vmul.f32 -1.442695, %v1336_v26  ;;  %v1676_v37 = vadd.f32 1.0, %v3100_v34  ;;  %v3102_v41 = vpop.eup %3101 }
  0xcf   : > { %3121 = vrcp.f32 %v1674_v23  ;;  %v908_v36 = vpop.xlane.xlu0 %907  ;;  %v1339_v14 = vadd.f32 %v1252_v1, %v913_v32  ;;  %v1258_v1 = vld [vmem:[%s4016_s27 + $0xe8] sm:$0xff] }
  0xd0   : > { %3123 = vpow2.f32 %v2996_v33  ;;  %v1338_v38 = vadd.f32 %v1251_v29, %v908_v36  ;;  %v1261_v33 = vld [vmem:[%s4016_s27 + $0x100] sm:$0xff] }
  0xd1   : > { %3125 = vrcp.f32 %v1669_v28  ;;  %v3104_v46 = vpop.eup %3103  ;;  %v2999_v26 = vmul.f32 -1.442695, %v1339_v14  ;;  %v1260_v14 = vld [vmem:[%s4016_s27 + $0xf8] sm:$0xff] }
  0xd2   : > { %3127 = vpow2.f32 %v2989_v25  ;;  %v4146_v44 = vpop.xlane.xlu1 %922  ;;  %2101 = vperm.xlu1 %3077, %v3098_v30   ;;  %v2998_v45 = vmul.f32 -1.442695, %v1338_v38  ;;  %v3106_v9 = vpop.eup %3105  ;;  %v1678_v48 = vadd.f32 1.0, %v3104_v46 }
  0xd3   : > { %3129 = vrcp.f32 %v1676_v37  ;;  %v918_v47 = vpop.xlane.xlu0 %917  ;;  %v1673_v50 = vadd.f32 1.0, %v3106_v9  ;;  %v1341_v35 = vadd.f32 %v1254_v27, %v4146_v44 }
  0xd4   : > { %3131 = vpow2.f32 %v2998_v45  ;;  %v1340_v49 = vadd.f32 %v1253_v40, %v918_v47  ;;  %v1263_v45 = vld [vmem:[%s4016_s27 + $0x110] sm:$0xff] }
  0xd5   : > { %v3108_v51 = vpop.eup %3107  ;;  %3133 = vrcp.f32 %v1671_v39  ;;  %v3001_v46 = vmul.f32 -1.442695, %v1341_v35 }
  0xd6   : > { %v3110_v56 = vpop.eup %3109  ;;  %3135 = vrcp.f32 %v1670_v42  ;;  %v4151_v58 = vpop.xlane.xlu1 %932  ;;  %2111 = vperm.xlu1 %3077, %v3102_v41   ;;  %v3000_v59 = vmul.f32 -1.442695, %v1340_v49  ;;  %v1680_v63 = vadd.f32 1.0, %v3108_v51 }
  0xd7   : > { %v3112_v60 = vpop.eup %3111  ;;  %3137 = vpow2.f32 %v2991_v8  ;;  %v928_v61 = vpop.xlane.xlu0 %927  ;;  %v1672_v0 = vadd.f32 1.0, %v3110_v56  ;;  %v1256_v8 = vld [vmem:[%s4016_s27 + $0xd8] sm:$0xff] }
  0xd8   : > { %v3114_v62 = vpop.eup %3113  ;;  %3139 = vrcp.f32 %v1678_v48  ;;  %v1342_v2 = vadd.f32 %v1255_v55, %v928_v61  ;;  %v1343_v57 = vadd.f32 %v1256_v8, %v4151_v58 }
  0xd9   : > { %v3116_v54 = vpop.eup %3115  ;;  %3141 = vpow2.f32 %v2993_v52 }
  0xda   : > { %v3118_v6 = vpop.eup %3117  ;;  %3143 = vpow2.f32 %v3000_v59  ;;  %v4156_v10 = vpop.xlane.xlu1 %942  ;;  %2116 = vperm.xlu1 %3077, %v3112_v60   ;;  %v3002_v11 = vmul.f32 -1.442695, %v1342_v2  ;;  %v1682_v16 = vadd.f32 1.0, %v3116_v54  ;;  %v1265_v59 = vld [vmem:[%s4016_s27 + $0x120] sm:$0xff] }
  0xdb   : > { %v3120_v13 = vpop.eup %3119  ;;  %3145 = vrcp.f32 %v1673_v50  ;;  %v938_v12 = vpop.xlane.xlu0 %937  ;;  %v1675_v32 = vadd.f32 1.0, %v3118_v6  ;;  %v1267_v6 = vld [vmem:[%s4016_s27 + $0x130] sm:$0xff] }
  0xdc   : > { %v3122_v15 = vpop.eup %3121  ;;  %3147 = vrcp.f32 %v1680_v63  ;;  %2106 = vperm.xlu0 %3078, %v3114_v62   ;;  %v1344_v17 = vadd.f32 %v1257_v5, %v938_v12  ;;  %v3003_v5 = vmul.f32 -1.442695, %v1343_v57 }
  0xdd   : > { %v3124_v18 = vpop.eup %3123  ;;  %3149 = vpow2.f32 %v2995_v3 }
  0xde   : > { %v3126_v21 = vpop.eup %3125  ;;  %3151 = vpow2.f32 %v3002_v11  ;;  %v4159_v22 = vpop.xlane.xlu1 %952  ;;  %2121 = vperm.xlu1 %3077, %v3120_v13   ;;  %v3004_v23 = vmul.f32 -1.442695, %v1344_v17  ;;  %v1684_v30 = vadd.f32 1.0, %v3124_v18 }
  0xdf   : > { %v3128_v24 = vpop.eup %3127  ;;  %3153 = vrcp.f32 %v1672_v0  ;;  %v948_v28 = vpop.xlane.xlu0 %947  ;;  %v1345_v0 = vadd.f32 %v1258_v1, %v4156_v10  ;;  %v1347_v10 = vadd.f32 %v1260_v14, %v4159_v22 }
  0xe0   : > { %v3130_v29 = vpop.eup %3129  ;;  %3155 = vrcp.f32 %v1682_v16  ;;  %2151 = vperm.xlu0 %3078, %v3122_v15   ;;  %v1346_v25 = vadd.f32 %v1259_v20, %v948_v28  ;;  %v1677_v43 = vadd.f32 1.0, %v3128_v24  ;;  %v1262_v20 = vld [vmem:[%s4016_s27 + $0x108] sm:$0xff] }
  0xe1   : > { %v3132_v31 = vpop.eup %3131  ;;  %3157 = vpow2.f32 %v2997_v19  ;;  %v3005_v28 = vmul.f32 -1.442695, %v1345_v0 }
  0xe2   : > { %v3134_v34 = vpop.eup %3133  ;;  %3159 = vpow2.f32 %v3004_v23  ;;  %v4164_v36 = vpop.xlane.xlu1 %962  ;;  %2126 = vperm.xlu1 %3077, %v3126_v21   ;;  %v3006_v37 = vmul.f32 -1.442695, %v1346_v25  ;;  %v1686_v39 = vadd.f32 1.0, %v3132_v31 }
  0xe3   : > { %v3136_v38 = vpop.eup %3135  ;;  %3161 = vpow2.f32 %v2999_v26  ;;  %v958_v7 = vpop.xlane.xlu0 %957  ;;  %v1269_v26 = vld [vmem:[%s4016_s27 + $0x140] sm:$0xff] }
  0xe4   : > { %v3138_v40 = vpop.eup %3137  ;;  %3163 = vrcp.f32 %v1684_v30  ;;  %2161 = vperm.xlu0 %3078, %v3130_v29   ;;  %v1348_v41 = vadd.f32 %v1261_v33, %v958_v7  ;;  %v1264_v29 = vld [vmem:[%s4016_s27 + $0x118] sm:$0xff]  ;;  %v1349_v33 = vadd.f32 %v1262_v20, %v4164_v36 }
  0xe5   : > { %v3140_v42 = vpop.eup %3139  ;;  %3165 = vrcp.f32 %v1675_v32  ;;  %v1679_v56 = vadd.f32 1.0, %v3138_v40  ;;  %v1271_v40 = vld [vmem:[%s4016_s27 + $0x150] sm:$0xff] }
  0xe6   : > { %v3142_v44 = vpop.eup %3141  ;;  %3167 = vpow2.f32 %v3006_v37  ;;  %v4168_v47 = vpop.xlane.xlu1 %972  ;;  %2131 = vperm.xlu1 %3077, %v3136_v38   ;;  %v3008_v9 = vmul.f32 -1.442695, %v1348_v41 }
  0xe7   : > { %v3144_v48 = vpop.eup %3143  ;;  %3169 = vrcp.f32 %v1686_v39  ;;  %v968_v49 = vpop.xlane.xlu0 %967  ;;  %v1681_v50 = vadd.f32 1.0, %v3142_v44  ;;  %v3007_v39 = vmul.f32 -1.442695, %v1347_v10  ;;  %v1351_v7 = vadd.f32 %v1264_v29, %v4168_v47 }
  0xe8   : > { %v3146_v51 = vpop.eup %3145  ;;  %v1688_v52 = vadd.f32 1.0, %v3144_v48  ;;  %3171 = vpow2.f32 %v3008_v9  ;;  %2171 = vperm.xlu0 %3078, %v3140_v42   ;;  %v1350_v53 = vadd.f32 %v1263_v45, %v968_v49  ;;  %v1266_v42 = vld [vmem:[%s4016_s27 + $0x128] sm:$0xff]  ;;  %v3009_v44 = vmul.f32 -1.442695, %v1349_v33  ;;  %v1268_v48 = vld [vmem:[%s4016_s27 + $0x138] sm:$0xff] }
  0xe9   : > { %v3148_v55 = vpop.eup %3147  ;;  %3173 = vrcp.f32 %v1677_v43 }
  0xea   : > { %v3150_v60 = vpop.eup %3149  ;;  %3175 = vpow2.f32 %v3001_v46  ;;  %v4172_v61 = vpop.xlane.xlu1 %982  ;;  %2136 = vperm.xlu1 %3077, %v3134_v34   ;;  %v3010_v62 = vmul.f32 -1.442695, %v1350_v53  ;;  %v1273_v53 = vld [vmem:[%s4016_s27 + $0x160] sm:$0xff] }
  0xeb   : > { %v3152_v63 = vpop.eup %3151  ;;  %3177 = vrcp.f32 %v1688_v52  ;;  %v978_v2 = vpop.xlane.xlu0 %977  ;;  %v1683_v13 = vadd.f32 1.0, %v3150_v60  ;;  %v1353_v52 = vadd.f32 %v1266_v42, %v4172_v61 }
  0xec   : > { %v3154_v54 = vpop.eup %3153  ;;  %v1690_v3 = vadd.f32 1.0, %v3152_v63  ;;  %3179 = vpow2.f32 %v3010_v62  ;;  %2181 = vperm.xlu0 %3078, %v3148_v55   ;;  %v1352_v4 = vadd.f32 %v1265_v59, %v978_v2 }
  0xed   : > { %v3156_v58 = vpop.eup %3155  ;;  %3181 = vrcp.f32 %v1679_v56 }
  0xee   : > { %v3158_v11 = vpop.eup %3157  ;;  %3183 = vrcp.f32 %v1681_v50  ;;  %v4178_v12 = vpop.xlane.xlu1 %992  ;;  %2141 = vperm.xlu1 %3077, %v3154_v54   ;;  %v3012_v15 = vmul.f32 -1.442695, %v1352_v4  ;;  %v3013_v54 = vmul.f32 -1.442695, %v1353_v52 }
  0xef   : > { %v3160_v16 = vpop.eup %3159  ;;  %3185 = vrcp.f32 %v1690_v3  ;;  %v988_v17 = vpop.xlane.xlu0 %987  ;;  %v1685_v24 = vadd.f32 1.0, %v3158_v11  ;;  %v1355_v50 = vadd.f32 %v1268_v48, %v4178_v12  ;;  %v1275_v3 = vld [vmem:[%s4016_s27 + $0x170] sm:$0xff] }
  0xf0   : > { %v3162_v18 = vpop.eup %3161  ;;  %v1692_v19 = vadd.f32 1.0, %v3160_v16  ;;  %3187 = vpow2.f32 %v3012_v15  ;;  %2191 = vperm.xlu0 %3078, %v3156_v58   ;;  %v1354_v21 = vadd.f32 %v1267_v6, %v988_v17  ;;  %v1270_v58 = vld [vmem:[%s4016_s27 + $0x148] sm:$0xff] }
  0xf1   : > { %v3164_v23 = vpop.eup %3163  ;;  %3189 = vpow2.f32 %v3003_v5  ;;  %v1687_v32 = vadd.f32 1.0, %v3162_v18 }
  0xf2   : > { %v3166_v27 = vpop.eup %3165  ;;  %3191 = vrcp.f32 %v1683_v13  ;;  %v4184_v30 = vpop.xlane.xlu1 %1002  ;;  %2146 = vperm.xlu1 %3077, %v3146_v51   ;;  %v3014_v25 = vmul.f32 -1.442695, %v1354_v21  ;;  %v3011_v51 = vmul.f32 -1.442695, %v1351_v7  ;;  %v3015_v13 = vmul.f32 -1.442695, %v1355_v50 }
  0xf3   : > { %v3168_v31 = vpop.eup %3167  ;;  %3193 = vrcp.f32 %v1692_v19  ;;  %v998_v34 = vpop.xlane.xlu0 %997  ;;  %v1357_v18 = vadd.f32 %v1270_v58, %v4184_v30  ;;  %v1277_v19 = vld [vmem:[%s4016_s27 + $0x180] sm:$0xff]  ;;  %v1272_v21 = vld [vmem:[%s4016_s27 + $0x158] sm:$0xff] }
  0xf4   : > { %v3170_v35 = vpop.eup %3169  ;;  %v1694_v37 = vadd.f32 1.0, %v3168_v31  ;;  %3195 = vpow2.f32 %v3014_v25  ;;  %2201 = vperm.xlu0 %3078, %v3164_v23   ;;  %v1356_v22 = vadd.f32 %v1269_v26, %v998_v34  ;;  %v1276_v50 = vld [vmem:[%s4016_s27 + $0x178] sm:$0xff] }
  0xf5   : > { %v3172_v38 = vpop.eup %3171  ;;  %3197 = vrcp.f32 %v1685_v24  ;;  %v3017_v30 = vmul.f32 -1.442695, %v1357_v18 }
  0xf6   : > { %v3174_v41 = vpop.eup %3173  ;;  %3199 = vpow2.f32 %v3005_v28  ;;  %v4190_v43 = vpop.xlane.xlu1 %1012  ;;  %2156 = vperm.xlu1 %3077, %v3166_v27   ;;  %v3016_v36 = vmul.f32 -1.442695, %v1356_v22  ;;  %v1696_v9 = vadd.f32 1.0, %v3172_v38 }
  0xf7   : > { %v3176_v45 = vpop.eup %3175  ;;  %3201 = vrcp.f32 %v1687_v32  ;;  %v1008_v46 = vpop.xlane.xlu0 %1007  ;;  %v1359_v31 = vadd.f32 %v1272_v21, %v4190_v43  ;;  %v1279_v32 = vld [vmem:[%s4016_s27 + $0x190] sm:$0xff]  ;;  %v1281_v43 = vld [vmem:[%s4016_s27 + $0x1a0] sm:$0xff]  ;;  %v1280_v21 = vld [vmem:[%s4016_s27 + $0x198] sm:$0xff] }
  0xf8   : > { %v3178_v8 = vpop.eup %3177  ;;  %3203 = vrcp.f32 %v1694_v37  ;;  %2211 = vperm.xlu0 %3078, %v3170_v35   ;;  %v1358_v49 = vadd.f32 %v1271_v40, %v1008_v46  ;;  %v1689_v60 = vadd.f32 1.0, %v3176_v45 }
  0xf9   : > { %v3180_v47 = vpop.eup %3179  ;;  %3205 = vpow2.f32 %v3007_v39  ;;  %v3019_v42 = vmul.f32 -1.442695, %v1359_v31 }
  0xfa   : > { %v3182_v55 = vpop.eup %3181  ;;  %3207 = vpow2.f32 %v3016_v36  ;;  %v4195_v56 = vpop.xlane.xlu1 %1022  ;;  %2166 = vperm.xlu1 %3077, %v3174_v41   ;;  %v3018_v57 = vmul.f32 -1.442695, %v1358_v49  ;;  %v1698_v1 = vadd.f32 1.0, %v3180_v47 }
  0xfb   : > { %v3184_v59 = vpop.eup %3183  ;;  %3209 = vpow2.f32 %v3009_v44  ;;  %v1018_v62 = vpop.xlane.xlu0 %1017  ;;  %v1274_v44 = vld [vmem:[%s4016_s27 + $0x168] sm:$0xff] }
  0xfc   : > { %v3186_v63 = vpop.eup %3185  ;;  %3211 = vrcp.f32 %v1696_v9  ;;  %2221 = vperm.xlu0 %3078, %v3178_v8   ;;  %v1360_v61 = vadd.f32 %v1273_v53, %v1018_v62 }
  0xfd   : > { %v3188_v2 = vpop.eup %3187  ;;  %3213 = vpow2.f32 %v3011_v51 }
  0xfe   : > { %v3190_v4 = vpop.eup %3189  ;;  %3215 = vpow2.f32 %v3018_v57  ;;  %v4200_v5 = vpop.xlane.xlu1 %1032  ;;  %2176 = vperm.xlu1 %3077, %v3182_v55   ;;  %v3020_v6 = vmul.f32 -1.442695, %v1360_v61  ;;  %v1700_v12 = vadd.f32 1.0, %v3188_v2  ;;  %v1361_v55 = vadd.f32 %v1274_v44, %v4195_v56  ;;  %v1283_v57 = vld [vmem:[%s4016_s27 + $0x1b0] sm:$0xff] }
  0xff   : > { %v3192_v11 = vpop.eup %3191  ;;  %3217 = vrcp.f32 %v1689_v60  ;;  %v1028_v0 = vpop.xlane.xlu0 %1027  ;;  %v1691_v17 = vadd.f32 1.0, %v3190_v4 }
 0x100   : > { %v3194_v14 = vpop.eup %3193  ;;  %3219 = vrcp.f32 %v1698_v1  ;;  %2231 = vperm.xlu0 %3078, %v3186_v63   ;;  %v1362_v15 = vadd.f32 %v1275_v3, %v1028_v0  ;;  %v1278_v3 = vld [vmem:[%s4016_s27 + $0x188] sm:$0xff]  ;;  %v3021_v58 = vmul.f32 -1.442695, %v1361_v55 }
 0x101   : > { %v3196_v16 = vpop.eup %3195  ;;  %3221 = vpow2.f32 %v3013_v54 }
 0x102   : > { %v3198_v20 = vpop.eup %3197  ;;  %3223 = vpow2.f32 %v3020_v6  ;;  %v4205_v23 = vpop.xlane.xlu1 %1042  ;;  %2186 = vperm.xlu1 %3077, %v3184_v59   ;;  %v3022_v24 = vmul.f32 -1.442695, %v1362_v15  ;;  %v1702_v26 = vadd.f32 1.0, %v3196_v16  ;;  %v1363_v6 = vadd.f32 %v1276_v50, %v4200_v5 }
 0x103   : > { %v3200_v10 = vpop.eup %3199  ;;  %3225 = vpow2.f32 %v3015_v13  ;;  %v1038_v27 = vpop.xlane.xlu0 %1037 }
 0x104   : > { %v3202_v28 = vpop.eup %3201  ;;  %3227 = vrcp.f32 %v1700_v12  ;;  %2241 = vperm.xlu0 %3078, %v3194_v14   ;;  %v1364_v29 = vadd.f32 %v1277_v19, %v1038_v27  ;;  %v1693_v34 = vadd.f32 1.0, %v3200_v10  ;;  %v3023_v10 = vmul.f32 -1.442695, %v1363_v6 }
 0x105   : > { %v3204_v25 = vpop.eup %3203  ;;  %3229 = vrcp.f32 %v1691_v17  ;;  %v1365_v17 = vadd.f32 %v1278_v3, %v4205_v23 }
 0x106   : > { %v3206_v33 = vpop.eup %3205  ;;  %3231 = vpow2.f32 %v3022_v24  ;;  %v4209_v35 = vpop.xlane.xlu1 %1052  ;;  %2196 = vperm.xlu1 %3077, %v3192_v11   ;;  %v3024_v37 = vmul.f32 -1.442695, %v1364_v29  ;;  %v1285_v11 = vld [vmem:[%s4016_s27 + $0x1c0] sm:$0xff] }
 0x107   : > { %v3208_v22 = vpop.eup %3207  ;;  %3233 = vrcp.f32 %v1702_v26  ;;  %v1048_v38 = vpop.xlane.xlu0 %1047  ;;  %v1695_v45 = vadd.f32 1.0, %v3206_v33  ;;  %v1287_v26 = vld [vmem:[%s4016_s27 + $0x1d0] sm:$0xff] }
 0x108   : > { %v3210_v39 = vpop.eup %3209  ;;  %v1704_v7 = vadd.f32 1.0, %v3208_v22  ;;  %3235 = vpow2.f32 %v3024_v37  ;;  %2251 = vperm.xlu0 %3078, %v3204_v25   ;;  %v1366_v40 = vadd.f32 %v1279_v32, %v1048_v38  ;;  %v3025_v25 = vmul.f32 -1.442695, %v1365_v17  ;;  %v1295_v17 = vld [vmem:[%s4016_s27 + $0x210] sm:$0xff] }
 0x109   : > { %v3212_v41 = vpop.eup %3211  ;;  %3237 = vpow2.f32 %v3017_v30  ;;  %v1697_v53 = vadd.f32 1.0, %v3210_v39  ;;  %v1367_v30 = vadd.f32 %v1280_v21, %v4209_v35  ;;  %v1289_v39 = vld [vmem:[%s4016_s27 + $0x1e0] sm:$0xff] }
 0x10a   : > { %v3214_v36 = vpop.eup %3213  ;;  %3239 = vrcp.f32 %v1693_v34  ;;  %v4213_v46 = vpop.xlane.xlu1 %1062  ;;  %2206 = vperm.xlu1 %3077, %v3198_v20   ;;  %v3026_v8 = vmul.f32 -1.442695, %v1366_v40  ;;  %v1282_v34 = vld [vmem:[%s4016_s27 + $0x1a8] sm:$0xff]  ;;  %v1284_v40 = vld [vmem:[%s4016_s27 + $0x1b8] sm:$0xff] }
 0x10b   : > { %v3216_v9 = vpop.eup %3215  ;;  %3241 = vrcp.f32 %v1704_v7  ;;  %v1058_v48 = vpop.xlane.xlu0 %1057  ;;  %v1699_v60 = vadd.f32 1.0, %v3214_v36  ;;  %v1369_v36 = vadd.f32 %v1282_v34, %v4213_v46  ;;  %v1290_v34 = vld [vmem:[%s4016_s27 + $0x1e8] sm:$0xff] }
 0x10c   : > { %v3218_v49 = vpop.eup %3217  ;;  %v1706_v47 = vadd.f32 1.0, %v3216_v9  ;;  %3243 = vpow2.f32 %v3026_v8  ;;  %2261 = vperm.xlu0 %3078, %v3212_v41   ;;  %v1368_v51 = vadd.f32 %v1281_v43, %v1058_v48  ;;  %v3027_v43 = vmul.f32 -1.442695, %v1367_v30 }
 0x10d   : > { %v3220_v52 = vpop.eup %3219  ;;  %3245 = vpow2.f32 %v3019_v42 }
 0x10e   : > { %v3222_v59 = vpop.eup %3221  ;;  %3247 = vrcp.f32 %v1695_v45  ;;  %v4218_v62 = vpop.xlane.xlu1 %1072  ;;  %2216 = vperm.xlu1 %3077, %v3202_v28   ;;  %v3028_v63 = vmul.f32 -1.442695, %v1368_v51  ;;  %v1291_v51 = vld [vmem:[%s4016_s27 + $0x1f0] sm:$0xff] }
 0x10f   : > { %v3224_v1 = vpop.eup %3223  ;;  %3249 = vrcp.f32 %v1706_v47  ;;  %v1068_v61 = vpop.xlane.xlu0 %1067  ;;  %v1701_v0 = vadd.f32 1.0, %v3222_v59  ;;  %v1371_v47 = vadd.f32 %v1284_v40, %v4218_v62  ;;  %v1286_v59 = vld [vmem:[%s4016_s27 + $0x1c8] sm:$0xff]  ;;  %v1299_v40 = vld [vmem:[%s4016_s27 + $0x230] sm:$0xff] }
 0x110   : > { %v3226_v2 = vpop.eup %3225  ;;  %v1708_v54 = vadd.f32 1.0, %v3224_v1  ;;  %3251 = vpow2.f32 %v3028_v63  ;;  %2271 = vperm.xlu0 %3078, %v3220_v52   ;;  %v1370_v4 = vadd.f32 %v1283_v57, %v1068_v61  ;;  %v3029_v57 = vmul.f32 -1.442695, %v1369_v36  ;;  %v1292_v36 = vld [vmem:[%s4016_s27 + $0x1f8] sm:$0xff] }
 0x111   : > { %v3228_v56 = vpop.eup %3227  ;;  %3253 = vrcp.f32 %v1697_v53  ;;  %v1703_v16 = vadd.f32 1.0, %v3226_v2  ;;  %v3031_v61 = vmul.f32 -1.442695, %v1371_v47  ;;  %v1293_v2 = vld [vmem:[%s4016_s27 + $0x200] sm:$0xff] }
 0x112   : > { %v3230_v13 = vpop.eup %3229  ;;  %3255 = vrcp.f32 %v1699_v60  ;;  %v4223_v14 = vpop.xlane.xlu1 %1082  ;;  %2226 = vperm.xlu1 %3077, %v3218_v49   ;;  %v3030_v12 = vmul.f32 -1.442695, %v1370_v4 }
 0x113   : > { %v3232_v15 = vpop.eup %3231  ;;  %3257 = vrcp.f32 %v1708_v54  ;;  %v1078_v18 = vpop.xlane.xlu0 %1077  ;;  %v1373_v3 = vadd.f32 %v1286_v59, %v4223_v14  ;;  %v1294_v59 = vld [vmem:[%s4016_s27 + $0x208] sm:$0xff] }
 0x114   : > { %v3234_v19 = vpop.eup %3233  ;;  %v1710_v20 = vadd.f32 1.0, %v3232_v15  ;;  %3259 = vpow2.f32 %v3030_v12  ;;  %2281 = vperm.xlu0 %3078, %v3228_v56   ;;  %v1372_v5 = vadd.f32 %v1285_v11, %v1078_v18  ;;  %v1288_v11 = vld [vmem:[%s4016_s27 + $0x1d8] sm:$0xff] }
 0x115   : > { %v3236_v24 = vpop.eup %3235  ;;  %3261 = vpow2.f32 %v3021_v58  ;;  %v3033_v18 = vmul.f32 -1.442695, %v1373_v3 }
 0x116   : > { %v3238_v27 = vpop.eup %3237  ;;  %3263 = vrcp.f32 %v1701_v0  ;;  %v4228_v28 = vpop.xlane.xlu1 %1092  ;;  %2236 = vperm.xlu1 %3077, %v3230_v13   ;;  %v3032_v29 = vmul.f32 -1.442695, %v1372_v5  ;;  %v1712_v33 = vadd.f32 1.0, %v3236_v24 }
 0x117   : > { %v3240_v23 = vpop.eup %3239  ;;  %3265 = vrcp.f32 %v1703_v16  ;;  %v1088_v31 = vpop.xlane.xlu0 %1087  ;;  %v1705_v38 = vadd.f32 1.0, %v3238_v27 }
 0x118   : > { %v3242_v32 = vpop.eup %3241  ;;  %3267 = vrcp.f32 %v1710_v20  ;;  %2291 = vperm.xlu0 %3078, %v3234_v19   ;;  %v1374_v37 = vadd.f32 %v1287_v26, %v1088_v31  ;;  %v1375_v19 = vadd.f32 %v1288_v11, %v4228_v28  ;;  %v1296_v11 = vld [vmem:[%s4016_s27 + $0x218] sm:$0xff] }
 0x119   : > { %v3244_v22 = vpop.eup %3243  ;;  %3269 = vpow2.f32 %v3023_v10 }
 0x11a   : > { %v3246_v7 = vpop.eup %3245  ;;  %3271 = vpow2.f32 %v3032_v29  ;;  %v4234_v41 = vpop.xlane.xlu1 %1102  ;;  %2246 = vperm.xlu1 %3077, %v3240_v23   ;;  %v3034_v42 = vmul.f32 -1.442695, %v1374_v37  ;;  %v1714_v8 = vadd.f32 1.0, %v3244_v22  ;;  %v3035_v30 = vmul.f32 -1.442695, %v1375_v19 }
 0x11b   : > { %v3248_v35 = vpop.eup %3247  ;;  %3273 = vpow2.f32 %v3025_v25  ;;  %v1098_v45 = vpop.xlane.xlu0 %1097  ;;  %v1707_v49 = vadd.f32 1.0, %v3246_v7  ;;  %v1297_v25 = vld [vmem:[%s4016_s27 + $0x220] sm:$0xff] }
 0x11c   : > { %v3250_v44 = vpop.eup %3249  ;;  %3275 = vrcp.f32 %v1712_v33  ;;  %2301 = vperm.xlu0 %3078, %v3242_v32   ;;  %v1376_v9 = vadd.f32 %v1289_v39, %v1098_v45 }
 0x11d   : > { %v3252_v48 = vpop.eup %3251  ;;  %3277 = vrcp.f32 %v1705_v38 }
 0x11e   : > { %v3254_v52 = vpop.eup %3253  ;;  %3279 = vpow2.f32 %v3034_v42  ;;  %v4239_v53 = vpop.xlane.xlu1 %1112  ;;  %2256 = vperm.xlu1 %3077, %v3248_v35   ;;  %v3036_v46 = vmul.f32 -1.442695, %v1376_v9  ;;  %v1716_v63 = vadd.f32 1.0, %v3252_v48 }
 0x11f   : > { %v3256_v55 = vpop.eup %3255  ;;  %3281 = vpow2.f32 %v3027_v43  ;;  %v1108_v60 = vpop.xlane.xlu0 %1107  ;;  %v1377_v43 = vadd.f32 %v1290_v34, %v4234_v41  ;;  %v1301_v41 = vld [vmem:[%s4016_s27 + $0x240] sm:$0xff] }
 0x120   : > { %v3258_v50 = vpop.eup %3257  ;;  %3283 = vrcp.f32 %v1714_v8  ;;  %2311 = vperm.xlu0 %3078, %v3250_v44   ;;  %v1378_v1 = vadd.f32 %v1291_v51, %v1108_v60 }
 0x121   : > { %v3260_v62 = vpop.eup %3259  ;;  %3285 = vrcp.f32 %v1707_v49 }
 0x122   : > { %v3262_v54 = vpop.eup %3261  ;;  %3287 = vpow2.f32 %v3036_v46  ;;  %v4244_v4 = vpop.xlane.xlu1 %1122  ;;  %2266 = vperm.xlu1 %3077, %v3254_v52   ;;  %v3038_v56 = vmul.f32 -1.442695, %v1378_v1  ;;  %v1718_v6 = vadd.f32 1.0, %v3260_v62  ;;  %v1379_v46 = vadd.f32 %v1292_v36, %v4239_v53 }
 0x123   : > { %v3264_v58 = vpop.eup %3263  ;;  %3289 = vpow2.f32 %v3029_v57  ;;  %v1118_v13 = vpop.xlane.xlu0 %1117  ;;  %v1709_v16 = vadd.f32 1.0, %v3262_v54  ;;  %v3037_v57 = vmul.f32 -1.442695, %v1377_v43 }
 0x124   : > { %v3266_v0 = vpop.eup %3265  ;;  %3291 = vrcp.f32 %v1716_v63  ;;  %2321 = vperm.xlu0 %3078, %v3258_v50   ;;  %v1380_v12 = vadd.f32 %v1293_v2, %v1118_v13  ;;  %v3039_v3 = vmul.f32 -1.442695, %v1379_v46 }
 0x125   : > { %v3268_v15 = vpop.eup %3267  ;;  %3293 = vpow2.f32 %v3031_v61 }
 0x126   : > { %v3270_v14 = vpop.eup %3269  ;;  %3295 = vpow2.f32 %v3038_v56  ;;  %v4249_v20 = vpop.xlane.xlu1 %1132  ;;  %2276 = vperm.xlu1 %3077, %v3256_v55   ;;  %v3040_v21 = vmul.f32 -1.442695, %v1380_v12  ;;  %v1381_v56 = vadd.f32 %v1294_v59, %v4244_v4 }
 0x127   : > { %v3272_v5 = vpop.eup %3271  ;;  %3297 = vrcp.f32 %v1718_v6  ;;  %v1128_v24 = vpop.xlane.xlu0 %1127  ;;  %v1711_v23 = vadd.f32 1.0, %v3270_v14 }
 0x128   : > { %v3274_v10 = vpop.eup %3273  ;;  %v1720_v26 = vadd.f32 1.0, %v3272_v5  ;;  %3299 = vpow2.f32 %v3040_v21  ;;  %2331 = vperm.xlu0 %3078, %v3268_v15   ;;  %v1382_v27 = vadd.f32 %v1295_v17, %v1128_v24  ;;  %v3041_v19 = vmul.f32 -1.442695, %v1381_v56  ;;  %v1305_v5 = vld [vmem:[%s4016_s27 + $0x260] sm:$0xff] }
 0x129   : > { %v3276_v29 = vpop.eup %3275  ;;  %3301 = vrcp.f32 %v1709_v16  ;;  %v1713_v35 = vadd.f32 1.0, %v3274_v10  ;;  %v1383_v21 = vadd.f32 %v1296_v11, %v4249_v20  ;;  %v1298_v10 = vld [vmem:[%s4016_s27 + $0x228] sm:$0xff] }
 0x12a   : > { %v3278_v28 = vpop.eup %3277  ;;  %3303 = vpow2.f32 %v3033_v18  ;;  %v4252_v31 = vpop.xlane.xlu1 %1142  ;;  %2286 = vperm.xlu1 %3077, %v3264_v58   ;;  %v3042_v32 = vmul.f32 -1.442695, %v1382_v27  ;;  %v1303_v58 = vld [vmem:[%s4016_s27 + $0x250] sm:$0xff] }
 0x12b   : > { %v3280_v33 = vpop.eup %3279  ;;  %3305 = vrcp.f32 %v1720_v26  ;;  %v1138_v37 = vpop.xlane.xlu0 %1137  ;;  %v1385_v34 = vadd.f32 %v1298_v10, %v4252_v31  ;;  %v1926_v10 = vld [vmem:[%s4296_s5 + $0x8] sm:$0xff] }
 0x12c   : > { %v3282_v22 = vpop.eup %3281  ;;  %v1722_v38 = vadd.f32 1.0, %v3280_v33  ;;  %3307 = vpow2.f32 %v3042_v32  ;;  %2341 = vperm.xlu0 %3078, %v3276_v29   ;;  %v1384_v39 = vadd.f32 %v1297_v25, %v1138_v37  ;;  %v3043_v33 = vmul.f32 -1.442695, %v1383_v21  ;;  %v1307_v37 = vld [vmem:[%s4016_s27 + $0x270] sm:$0xff] }
 0x12d   : > { %v3284_v7 = vpop.eup %3283  ;;  %3309 = vrcp.f32 %v1711_v23  ;;  %v1715_v52 = vadd.f32 1.0, %v3282_v22  ;;  %v1300_v22 = vld [vmem:[%s4016_s27 + $0x238] sm:$0xff]  ;;  %v3045_v31 = vmul.f32 -1.442695, %v1385_v34 }
 0x12e   : > { %v3286_v42 = vpop.eup %3285  ;;  %3311 = vpow2.f32 %v3035_v30  ;;  %v4258_v45 = vpop.xlane.xlu1 %1152  ;;  %2296 = vperm.xlu1 %3077, %v3266_v0   ;;  %v3044_v44 = vmul.f32 -1.442695, %v1384_v39 }
 0x12f   : > { %v3288_v8 = vpop.eup %3287  ;;  %3313 = vrcp.f32 %v1722_v38  ;;  %v1148_v9 = vpop.xlane.xlu0 %1147 }
 0x130   : > { %v3290_v48 = vpop.eup %3289  ;;  %v1724_v49 = vadd.f32 1.0, %v3288_v8  ;;  %3315 = vpow2.f32 %v3044_v44  ;;  %2351 = vperm.xlu0 %3078, %v3284_v7   ;;  %v1386_v47 = vadd.f32 %v1299_v40, %v1148_v9  ;;  %v1387_v8 = vadd.f32 %v1300_v22, %v4258_v45  ;;  %v1309_v9 = vld [vmem:[%s4016_s27 + $0x280] sm:$0xff] }
 0x131   : > { %v3292_v51 = vpop.eup %3291  ;;  %3317 = vrcp.f32 %v1713_v35  ;;  %v1717_v1 = vadd.f32 1.0, %v3290_v48 }
 0x132   : > { %v3294_v55 = vpop.eup %3293  ;;  %v4263_v60 = vpop.xlane.xlu1 %1162  ;;  %2306 = vperm.xlu1 %3077, %v3278_v28   ;;  %v3046_v50 = vmul.f32 -1.442695, %v1386_v47  ;;  %3319 = vrcp.f32 %v1724_v49  ;;  %v3047_v59 = vmul.f32 -1.442695, %v1387_v8 }
 0x133   : > { %v3296_v63 = vpop.eup %3295  ;;  %v1158_v62 = vpop.xlane.xlu0 %1157  ;;  %v1719_v15 = vadd.f32 1.0, %v3294_v55 }
 0x134   : > { %v3298_v61 = vpop.eup %3297  ;;  %v1726_v2 = vadd.f32 1.0, %v3296_v63  ;;  %3321 = vpow2.f32 %v3046_v50  ;;  %2361 = vperm.xlu0 %3078, %v3292_v51   ;;  %v1388_v53 = vadd.f32 %v1301_v41, %v1158_v62  ;;  %v1311_v50 = vld [vmem:[%s4016_s27 + $0x290] sm:$0xff] }
 0x135   : > { %v3300_v54 = vpop.eup %3299  ;;  %3323 = vrcp.f32 %v1715_v52  ;;  %v1302_v52 = vld [vmem:[%s4016_s27 + $0x248] sm:$0xff] }
 0x136   : > { %v3302_v6 = vpop.eup %3301  ;;  %3325 = vpow2.f32 %v3037_v57  ;;  %v4268_v13 = vpop.xlane.xlu1 %1172  ;;  %2316 = vperm.xlu1 %3077, %v3286_v42   ;;  %v3048_v0 = vmul.f32 -1.442695, %v1388_v53  ;;  %v1728_v14 = vadd.f32 1.0, %v3300_v54  ;;  %v1389_v62 = vadd.f32 %v1302_v52, %v4263_v60  ;;  %v1304_v54 = vld [vmem:[%s4016_s27 + $0x258] sm:$0xff] }
 0x137   : > { %v3304_v12 = vpop.eup %3303  ;;  %3327 = vrcp.f32 %v1717_v1  ;;  %v1168_v16 = vpop.xlane.xlu0 %1167 }
 0x138   : > { %v3306_v17 = vpop.eup %3305  ;;  %3329 = vrcp.f32 %v1726_v2  ;;  %2371 = vperm.xlu0 %3078, %v3298_v61   ;;  %v1390_v18 = vadd.f32 %v1303_v58, %v1168_v16  ;;  %v1721_v23 = vadd.f32 1.0, %v3304_v12  ;;  %v1391_v16 = vadd.f32 %v1304_v54, %v4268_v13 }
 0x139   : > { %v3308_v4 = vpop.eup %3307  ;;  %3331 = vpow2.f32 %v3039_v3 }
 0x13a   : > { %v3310_v24 = vpop.eup %3309  ;;  %3333 = vpow2.f32 %v3048_v0  ;;  %v4273_v26 = vpop.xlane.xlu1 %1182  ;;  %2326 = vperm.xlu1 %3077, %v3302_v6   ;;  %v3050_v27 = vmul.f32 -1.442695, %v1390_v18  ;;  %v1730_v30 = vadd.f32 1.0, %v3308_v4  ;;  %v1313_v0 = vld [vmem:[%s4016_s27 + $0x2a0] sm:$0xff]  ;;  %v1306_v4 = vld [vmem:[%s4016_s27 + $0x268] sm:$0xff] }
 0x13b   : > { %v3312_v29 = vpop.eup %3311  ;;  %3335 = vrcp.f32 %v1719_v15  ;;  %v1178_v25 = vpop.xlane.xlu0 %1177  ;;  %v3049_v15 = vmul.f32 -1.442695, %v1389_v62 }
 0x13c   : > { %v3314_v28 = vpop.eup %3313  ;;  %3337 = vrcp.f32 %v1728_v14  ;;  %2381 = vperm.xlu0 %3078, %v3306_v17   ;;  %v1392_v32 = vadd.f32 %v1305_v5, %v1178_v25  ;;  %v1723_v40 = vadd.f32 1.0, %v3312_v29 }
 0x13d   : > { %v3316_v20 = vpop.eup %3315  ;;  %3339 = vpow2.f32 %v3041_v19 }
 0x13e   : > { %3341 = vpow2.f32 %v3050_v27  ;;  %v4278_v38 = vpop.xlane.xlu1 %1192  ;;  %2336 = vperm.xlu1 %3077, %v3310_v24   ;;  %v3052_v39 = vmul.f32 -1.442695, %v1392_v32  ;;  %v3318_v7 = vpop.eup %3317  ;;  %v1732_v43 = vadd.f32 1.0, %v3316_v20  ;;  %v1925_v24 = vld [vmem:[%s4296_s5] sm:$0xff] }
 0x13f   : > { %3343 = vrcp.f32 %v1721_v23  ;;  %v1188_v42 = vpop.xlane.xlu0 %1187  ;;  %v3320_v35 = vpop.eup %3319  ;;  %v1315_v23 = vld [vmem:[%s4016_s27 + $0x2b0] sm:$0xff] }
 0x140   : > { %3345 = vrcp.f32 %v1730_v30  ;;  %2391 = vperm.xlu0 %3078, %v3314_v28   ;;  %v1394_v36 = vadd.f32 %v1307_v37, %v1188_v42  ;;  %v3051_v28 = vmul.f32 -1.442695, %v1391_v16  ;;  %v1393_v30 = vadd.f32 %v1306_v4, %v4273_v26  ;;  %v1930_v42 = vld [vmem:[%s4296_s5 + $0x28] sm:$0xff] }
 0x141   : > { %v3322_v44 = vpop.eup %3321  ;;  %3347 = vpow2.f32 %v3043_v33  ;;  %v1946_v4 = vld [vmem:[%s4296_s5 + $0xa8] sm:$0xff] }
 0x142   : > { %v3324_v48 = vpop.eup %3323  ;;  %3349 = vpow2.f32 %v3052_v39  ;;  %v4282_v49 = vpop.xlane.xlu1 %1202  ;;  %2346 = vperm.xlu1 %3077, %v3318_v7   ;;  %v3054_v47 = vmul.f32 -1.442695, %v1394_v36  ;;  %v1734_v46 = vadd.f32 1.0, %v3322_v44  ;;  %v1308_v7 = vld [vmem:[%s4016_s27 + $0x278] sm:$0xff] }
 0x143   : > { %v3326_v51 = vpop.eup %3325  ;;  %3351 = vrcp.f32 %v1723_v40  ;;  %v1198_v41 = vpop.xlane.xlu0 %1197  ;;  %v1929_v40 = vld [vmem:[%s4296_s5 + $0x20] sm:$0xff] }
 0x144   : > { %v3328_v55 = vpop.eup %3327  ;;  %3353 = vrcp.f32 %v1732_v43  ;;  %2401 = vperm.xlu0 %3078, %v3320_v35   ;;  %v1396_v57 = vadd.f32 %v1309_v9, %v1198_v41  ;;  %v1725_v1 = vadd.f32 1.0, %v3326_v51  ;;  %v1310_v51 = vld [vmem:[%s4016_s27 + $0x288] sm:$0xff] }
 0x145   : > { %v3330_v45 = vpop.eup %3329  ;;  %3355 = vpow2.f32 %v3045_v31  ;;  %v3053_v31 = vmul.f32 -1.442695, %v1393_v30  ;;  %v1397_v62 = vadd.f32 %v1310_v51, %v4282_v49 }
 0x146   : > { %v3332_v63 = vpop.eup %3331  ;;  %3357 = vpow2.f32 %v3054_v47  ;;  %v4287_v61 = vpop.xlane.xlu1 %1212  ;;  %2356 = vperm.xlu1 %3077, %v3324_v48   ;;  %v3056_v2 = vmul.f32 -1.442695, %v1396_v57  ;;  %v1395_v47 = vadd.f32 %v1308_v7, %v4278_v38  ;;  %v1931_v57 = vld [vmem:[%s4296_s5 + $0x30] sm:$0xff] }
 0x147   : > { %v3334_v53 = vpop.eup %3333  ;;  %3359 = vrcp.f32 %v1734_v46  ;;  %v1208_v3 = vpop.xlane.xlu0 %1207  ;;  %v1727_v60 = vadd.f32 1.0, %v3332_v63  ;;  %v1928_v63 = vld [vmem:[%s4296_s5 + $0x18] sm:$0xff] }
 0x148   : > { %v3336_v56 = vpop.eup %3335  ;;  %v1736_v58 = vadd.f32 1.0, %v3334_v53  ;;  %3361 = vpow2.f32 %v3056_v2  ;;  %2411 = vperm.xlu0 %3078, %v3330_v45   ;;  %v1398_v6 = vadd.f32 %v1311_v50, %v1208_v3  ;;  %v1932_v45 = vld [vmem:[%s4296_s5 + $0x38] sm:$0xff]  ;;  %v1927_v50 = vld [vmem:[%s4296_s5 + $0x10] sm:$0xff]  ;;  %v3055_v54 = vmul.f32 -1.442695, %v1395_v47  ;;  %v1938_v47 = vld [vmem:[%s4296_s5 + $0x68] sm:$0xff] }
 0x149   : > { %v3338_v11 = vpop.eup %3337  ;;  %3363 = vpow2.f32 %v3047_v59 }
 0x14a   : > { %v3340_v12 = vpop.eup %3339  ;;  %3365 = vrcp.f32 %v1725_v1  ;;  %v4300_v17 = vpop.xlane.xlu1 %1222  ;;  %2366 = vperm.xlu1 %3077, %v3328_v55   ;;  %v3058_v14 = vmul.f32 -1.442695, %v1398_v6 }
 0x14b   : > { %v3342_v18 = vpop.eup %3341  ;;  %3367 = vrcp.f32 %v1736_v58  ;;  %v1218_v19 = vpop.xlane.xlu0 %1217  ;;  %v1729_v13 = vadd.f32 1.0, %v3340_v12  ;;  %v1933_v12 = vld [vmem:[%s4296_s5 + $0x40] sm:$0xff] }
 0x14c   : > { %v3344_v21 = vpop.eup %3343  ;;  %v1738_v5 = vadd.f32 1.0, %v3342_v18  ;;  %3369 = vpow2.f32 %v3058_v14  ;;  %2421 = vperm.xlu0 %3078, %v3338_v11   ;;  %v1400_v27 = vadd.f32 %v1313_v0, %v1218_v19  ;;  %v1312_v11 = vld [vmem:[%s4016_s27 + $0x298] sm:$0xff]  ;;  %v1945_v18 = vld [vmem:[%s4296_s5 + $0xa0] sm:$0xff] }
 0x14d   : > { %v3346_v29 = vpop.eup %3345  ;;  %3371 = vrcp.f32 %v1727_v60 }
 0x14e   : > { %v3348_v25 = vpop.eup %3347  ;;  %3373 = vpow2.f32 %v3049_v15  ;;  %v2102_v32 = vpop.permute.xlu1 %2101  ;;  %2376 = vperm.xlu1 %3077, %v3336_v56   ;;  %v3060_v20 = vmul.f32 -1.442695, %v1400_v27  ;;  %v1934_v15 = vld [vmem:[%s4296_s5 + $0x48] sm:$0xff] }
 0x14f   : > { %v3350_v33 = vpop.eup %3349  ;;  %3375 = vrcp.f32 %v1738_v5  ;;  %v2534_v34 = vmul.f32 %v2102_v32, %v1925_v24  ;;  %v2535_v37 = vmul.f32 %v2102_v32, %v1926_v10  ;;  %v1228_v22 = vpop.xlane.xlu0 %1227  ;;  %v1731_v44 = vadd.f32 1.0, %v3348_v25  ;;  %v1314_v25 = vld [vmem:[%s4016_s27 + $0x2a8] sm:$0xff] }
 0x150   : > { %v3352_v39 = vpop.eup %3351  ;;  %v1740_v26 = vadd.f32 1.0, %v3350_v33  ;;  %3377 = vpow2.f32 %v3060_v20  ;;  %2431 = vperm.xlu0 %3078, %v3346_v29   ;;  %v1402_v35 = vadd.f32 %v1315_v23, %v1228_v22  ;;  %v1399_v10 = vadd.f32 %v1312_v11, %v4287_v61  ;;  %v1935_v20 = vld [vmem:[%s4296_s5 + $0x50] sm:$0xff]  ;;  %v1936_v33 = vld [vmem:[%s4296_s5 + $0x58] sm:$0xff]  ;;  %v1949_v61 = vld [vmem:[%s4296_s5 + $0xc0] sm:$0xff] }
 0x151   : > { %v3354_v43 = vpop.eup %3353  ;;  %3379 = vrcp.f32 %v1729_v13  ;;  %2708 = vst [vmem:[%s4312_s8] sm:$0xff] %v2534_v34  ;;  %2710 = vst.msk [vmem:[%s4312_s8 + $0x8] sm:$0xff] %vm2709_vm1, %v2535_v37  ;;  %v1950_v37 = vld [vmem:[%s4296_s5 + $0xc8] sm:$0xff] }
 0x152   : > { %v3356_v36 = vpop.eup %3355  ;;  %3381 = vpow2.f32 %v3051_v28  ;;  %v2112_v8 = vpop.permute.xlu1 %2111  ;;  %2386 = vperm.xlu1 %3077, %v3344_v21   ;;  %v3062_v9 = vmul.f32 -1.442695, %v1402_v35  ;;  %v3057_v21 = vmul.f32 -1.442695, %v1397_v62 }
 0x153   : > { %v3358_v48 = vpop.eup %3357  ;;  %3383 = vrcp.f32 %v1740_v26  ;;  %v2538_v52 = vmul.f32 %v2112_v8, %v1929_v40  ;;  %v2539_v46 = vmul.f32 %v2112_v8, %v1930_v42  ;;  %v1733_v38 = vadd.f32 1.0, %v3356_v36 }
 0x154   : > { %v3360_v41 = vpop.eup %3359  ;;  %v1742_v55 = vadd.f32 1.0, %v3358_v48  ;;  %3385 = vpow2.f32 %v3062_v9  ;;  %2441 = vperm.xlu0 %3078, %v3354_v43   ;;  %v3059_v40 = vmul.f32 -1.442695, %v1399_v10  ;;  %v1401_v42 = vadd.f32 %v1314_v25, %v4300_v17  ;;  %v1937_v48 = vld [vmem:[%s4296_s5 + $0x60] sm:$0xff]  ;;  %v1954_v17 = vld [vmem:[%s4296_s5 + $0xe8] sm:$0xff] }
 0x155   : > { %v3362_v59 = vpop.eup %3361  ;;  %2713 = vst [vmem:[%s4312_s8 + $0x20] sm:$0xff] %v2538_v52  ;;  %2714 = vst.msk [vmem:[%s4312_s8 + $0x28] sm:$0xff] %vm2709_vm1, %v2539_v46  ;;  %3387 = vrcp.f32 %v1731_v44  ;;  %v1953_v52 = vld [vmem:[%s4296_s5 + $0xe0] sm:$0xff] }
 0x156   : > { %v3364_v1 = vpop.eup %3363  ;;  %v2117_v2 = vpop.permute.xlu1 %2116  ;;  %2396 = vperm.xlu1 %3077, %v3352_v39   ;;  %3389 = vpow2.f32 %v3053_v31  ;;  %v1744_v60 = vadd.f32 1.0, %v3362_v59 }
 0x157   : > { %v3366_v53 = vpop.eup %3365  ;;  %v2540_v3 = vmul.f32 %v2117_v2, %v1931_v57  ;;  %v2541_v56 = vmul.f32 %v2117_v2, %v1932_v45  ;;  %v2107_v58 = vpop.permute.xlu0 %2106  ;;  %3391 = vrcp.f32 %v1742_v55  ;;  %v1735_v14 = vadd.f32 1.0, %v3364_v1  ;;  %v1939_v2 = vld [vmem:[%s4296_s5 + $0x70] sm:$0xff] }
 0x158   : > { %v3368_v6 = vpop.eup %3367  ;;  %v2536_v49 = vmul.f32 %v2107_v58, %v1927_v50  ;;  %v2537_v0 = vmul.f32 %v2107_v58, %v1928_v63  ;;  %2451 = vperm.xlu0 %3078, %v3360_v41   ;;  %3393 = vrcp.f32 %v1733_v38  ;;  %v3061_v57 = vmul.f32 -1.442695, %v1401_v42 }
 0x159   : > { %v3370_v16 = vpop.eup %3369  ;;  %2715 = vst [vmem:[%s4312_s8 + $0x30] sm:$0xff] %v2540_v3  ;;  %2716 = vst.msk [vmem:[%s4312_s8 + $0x38] sm:$0xff] %vm2709_vm1, %v2541_v56  ;;  %3395 = vpow2.f32 %v3055_v54  ;;  %v1957_v3 = vld [vmem:[%s4296_s5 + $0x100] sm:$0xff]  ;;  %v1958_v56 = vld [vmem:[%s4296_s5 + $0x108] sm:$0xff] }
 0x15a   : > { %v3372_v19 = vpop.eup %3371  ;;  %2711 = vst [vmem:[%s4312_s8 + $0x10] sm:$0xff] %v2536_v49  ;;  %2712 = vst.msk [vmem:[%s4312_s8 + $0x18] sm:$0xff] %vm2709_vm1, %v2537_v0  ;;  %v2122_v5 = vpop.permute.xlu1 %2121  ;;  %2406 = vperm.xlu1 %3077, %v3366_v53   ;;  %3397 = vrcp.f32 %v1744_v60  ;;  %v1746_v28 = vadd.f32 1.0, %v3370_v16  ;;  %v1940_v53 = vld [vmem:[%s4296_s5 + $0x78] sm:$0xff] }
 0x15b   : > { %v3374_v24 = vpop.eup %3373  ;;  %v2542_v27 = vmul.f32 %v2122_v5, %v1933_v12  ;;  %v2543_v29 = vmul.f32 %v2122_v5, %v1934_v15  ;;  %v2152_v13 = vpop.permute.xlu0 %2151  ;;  %3399 = vrcp.f32 %v1735_v14  ;;  %v1941_v14 = vld [vmem:[%s4296_s5 + $0x80] sm:$0xff] }
 0x15c   : > { %v3376_v23 = vpop.eup %3375  ;;  %v2554_v30 = vmul.f32 %v2152_v13, %v1945_v18  ;;  %v2555_v32 = vmul.f32 %v2152_v13, %v1946_v4  ;;  %2461 = vperm.xlu0 %3078, %v3368_v6   ;;  %v1737_v39 = vadd.f32 1.0, %v3374_v24  ;;  %3401 = vpow2.f32 %v3057_v21  ;;  %v1942_v18 = vld [vmem:[%s4296_s5 + $0x88] sm:$0xff] }
 0x15d   : > { %v3378_v34 = vpop.eup %3377  ;;  %2717 = vst [vmem:[%s4312_s8 + $0x40] sm:$0xff] %v2542_v27  ;;  %2718 = vst.msk [vmem:[%s4312_s8 + $0x48] sm:$0xff] %vm2709_vm1, %v2543_v29  ;;  %3403 = vrcp.f32 %v1746_v28  ;;  %v1962_v21 = vld [vmem:[%s4296_s5 + $0x128] sm:$0xff] }
 0x15e   : > { %v3380_v22 = vpop.eup %3379  ;;  %2729 = vst [vmem:[%s4312_s8 + $0xa0] sm:$0xff] %v2554_v30  ;;  %2730 = vst.msk [vmem:[%s4312_s8 + $0xa8] sm:$0xff] %vm2709_vm1, %v2555_v32  ;;  %v2127_v7 = vpop.permute.xlu1 %2126  ;;  %2416 = vperm.xlu1 %3077, %v3372_v19   ;;  %v1748_v31 = vadd.f32 1.0, %v3378_v34  ;;  %3405 = vrcp.f32 %v1737_v39  ;;  %v1961_v19 = vld [vmem:[%s4296_s5 + $0x120] sm:$0xff]  ;;  %v1943_v30 = vld [vmem:[%s4296_s5 + $0x90] sm:$0xff] }
 0x15f   : > { %v3382_v26 = vpop.eup %3381  ;;  %v2544_v35 = vmul.f32 %v2127_v7, %v1935_v20  ;;  %v2545_v43 = vmul.f32 %v2127_v7, %v1936_v33  ;;  %v2162_v36 = vpop.permute.xlu0 %2161  ;;  %3407 = vpow2.f32 %v3059_v40  ;;  %v1944_v32 = vld [vmem:[%s4296_s5 + $0x98] sm:$0xff]  ;;  %v1965_v33 = vld [vmem:[%s4296_s5 + $0x140] sm:$0xff]  ;;  %v1966_v34 = vld [vmem:[%s4296_s5 + $0x148] sm:$0xff] }
 0x160   : > { %v3384_v44 = vpop.eup %3383  ;;  %v2558_v8 = vmul.f32 %v2162_v36, %v1949_v61  ;;  %v2559_v9 = vmul.f32 %v2162_v36, %v1950_v37  ;;  %2471 = vperm.xlu0 %3078, %v3376_v23   ;;  %v1739_v46 = vadd.f32 1.0, %v3382_v26  ;;  %3409 = vrcp.f32 %v1748_v31  ;;  %v1948_v36 = vld [vmem:[%s4296_s5 + $0xb8] sm:$0xff]  ;;  %v1969_v31 = vld [vmem:[%s4296_s5 + $0x160] sm:$0xff] }
 0x161   : > { %v3386_v51 = vpop.eup %3385  ;;  %2719 = vst [vmem:[%s4312_s8 + $0x50] sm:$0xff] %v2544_v35  ;;  %2720 = vst.msk [vmem:[%s4312_s8 + $0x58] sm:$0xff] %vm2709_vm1, %v2545_v43  ;;  %v1947_v43 = vld [vmem:[%s4296_s5 + $0xb0] sm:$0xff] }
 0x162   : > { %2733 = vst [vmem:[%s4312_s8 + $0xc0] sm:$0xff] %v2558_v8  ;;  %2734 = vst.msk [vmem:[%s4312_s8 + $0xc8] sm:$0xff] %vm2709_vm1, %v2559_v9  ;;  %v2132_v41 = vpop.permute.xlu1 %2131  ;;  %2426 = vperm.xlu1 %3077, %v3380_v22   ;;  %v3388_v55 = vpop.eup %3387  ;;  %v1750_v1 = vadd.f32 1.0, %v3386_v51  ;;  %3411 = vrcp.f32 %v1739_v46  ;;  %v1970_v8 = vld [vmem:[%s4296_s5 + $0x168] sm:$0xff] }
 0x163   : > { %v2546_v45 = vmul.f32 %v2132_v41, %v1937_v48  ;;  %v2547_v59 = vmul.f32 %v2132_v41, %v1938_v47  ;;  %v2172_v50 = vpop.permute.xlu0 %2171  ;;  %v3390_v63 = vpop.eup %3389  ;;  %3413 = vpow2.f32 %v3061_v57  ;;  %v1951_v57 = vld [vmem:[%s4296_s5 + $0xd0] sm:$0xff] }
 0x164   : > { %v2562_v38 = vmul.f32 %v2172_v50, %v1953_v52  ;;  %v2563_v62 = vmul.f32 %v2172_v50, %v1954_v17  ;;  %2481 = vperm.xlu0 %3078, %v3384_v44   ;;  %v3392_v54 = vpop.eup %3391  ;;  %v1741_v12 = vadd.f32 1.0, %v3390_v63  ;;  %3415 = vrcp.f32 %v1750_v1  ;;  %v1973_v50 = vld [vmem:[%s4296_s5 + $0x180] sm:$0xff]  ;;  %v1974_v63 = vld [vmem:[%s4296_s5 + $0x188] sm:$0xff] }
 0x165   : > { %2721 = vst [vmem:[%s4312_s8 + $0x60] sm:$0xff] %v2546_v45  ;;  %2722 = vst.msk [vmem:[%s4312_s8 + $0x68] sm:$0xff] %vm2709_vm1, %v2547_v59  ;;  %v3394_v6 = vpop.eup %3393  ;;  %v1952_v45 = vld [vmem:[%s4296_s5 + $0xd8] sm:$0xff] }
 0x166   : > { %2737 = vst [vmem:[%s4312_s8 + $0xe0] sm:$0xff] %v2562_v38  ;;  %2738 = vst.msk [vmem:[%s4312_s8 + $0xe8] sm:$0xff] %vm2709_vm1, %v2563_v62  ;;  %v2137_v58 = vpop.permute.xlu1 %2136  ;;  %2436 = vperm.xlu1 %3077, %v3388_v55   ;;  %v3396_v0 = vpop.eup %3395  ;;  %3417 = vrcp.f32 %v1741_v12 }
 0x167   : > { %v2548_v11 = vmul.f32 %v2137_v58, %v1939_v2  ;;  %v2549_v60 = vmul.f32 %v2137_v58, %v1940_v53  ;;  %v2182_v49 = vpop.permute.xlu0 %2181  ;;  %v3398_v4 = vpop.eup %3397  ;;  %v1743_v23 = vadd.f32 1.0, %v3396_v0  ;;  %v1956_v58 = vld [vmem:[%s4296_s5 + $0xf8] sm:$0xff] }
 0x168   : > { %v2566_v15 = vmul.f32 %v2182_v49, %v1957_v3  ;;  %v2567_v16 = vmul.f32 %v2182_v49, %v1958_v56  ;;  %2491 = vperm.xlu0 %3078, %v3392_v54   ;;  %v3400_v5 = vpop.eup %3399  ;;  %v1955_v56 = vld [vmem:[%s4296_s5 + $0xf0] sm:$0xff] }
 0x169   : > { %2723 = vst [vmem:[%s4312_s8 + $0x70] sm:$0xff] %v2548_v11  ;;  %2724 = vst.msk [vmem:[%s4312_s8 + $0x78] sm:$0xff] %vm2709_vm1, %v2549_v60  ;;  %v3402_v10 = vpop.eup %3401  ;;  %3419 = vrcp.f32 %v1743_v23  ;;  %v1977_v11 = vld [vmem:[%s4296_s5 + $0x1a0] sm:$0xff]  ;;  %v1978_v60 = vld [vmem:[%s4296_s5 + $0x1a8] sm:$0xff] }
 0x16a   : > { %2741 = vst [vmem:[%s4312_s8 + $0x100] sm:$0xff] %v2566_v15  ;;  %2742 = vst.msk [vmem:[%s4312_s8 + $0x108] sm:$0xff] %vm2709_vm1, %v2567_v16  ;;  %2446 = vperm.xlu1 %3077, %v3394_v6   ;;  %v2142_v24 = vpop.permute.xlu1 %2141  ;;  %v3404_v20 = vpop.eup %3403  ;;  %v1745_v40 = vadd.f32 1.0, %v3402_v10 }
 0x16b   : > { %v2550_v27 = vmul.f32 %v2142_v24, %v1941_v14  ;;  %v2551_v29 = vmul.f32 %v2142_v24, %v1942_v18  ;;  %v2192_v13 = vpop.permute.xlu0 %2191  ;;  %v3406_v37 = vpop.eup %3405  ;;  %v1959_v18 = vld [vmem:[%s4296_s5 + $0x110] sm:$0xff] }
 0x16c   : > { %v2570_v25 = vmul.f32 %v2192_v13, %v1961_v19  ;;  %v2571_v28 = vmul.f32 %v2192_v13, %v1962_v21  ;;  %2501 = vperm.xlu0 %3078, %v3398_v4   ;;  %v3408_v26 = vpop.eup %3407  ;;  %3421 = vrcp.f32 %v1745_v40  ;;  %v1960_v4 = vld [vmem:[%s4296_s5 + $0x118] sm:$0xff]  ;;  %v1981_v21 = vld [vmem:[%s4296_s5 + $0x1c0] sm:$0xff] }
 0x16d   : > { %2725 = vst [vmem:[%s4312_s8 + $0x80] sm:$0xff] %v2550_v27  ;;  %2726 = vst.msk [vmem:[%s4312_s8 + $0x88] sm:$0xff] %vm2709_vm1, %v2551_v29  ;;  %v3410_v44 = vpop.eup %3409  ;;  %v1747_v46 = vadd.f32 1.0, %v3408_v26  ;;  %v1968_v26 = vld [vmem:[%s4296_s5 + $0x158] sm:$0xff] }
 0x16e   : > { %2745 = vst [vmem:[%s4312_s8 + $0x120] sm:$0xff] %v2570_v25  ;;  %2746 = vst.msk [vmem:[%s4312_s8 + $0x128] sm:$0xff] %vm2709_vm1, %v2571_v28  ;;  %2456 = vperm.xlu1 %3077, %v3400_v5   ;;  %v2147_v61 = vpop.permute.xlu1 %2146  ;;  %v1982_v5 = vld [vmem:[%s4296_s5 + $0x1c8] sm:$0xff]  ;;  %v1963_v25 = vld [vmem:[%s4296_s5 + $0x130] sm:$0xff] }
 0x16f   : > { %v2552_v22 = vmul.f32 %v2147_v61, %v1943_v30  ;;  %v2553_v39 = vmul.f32 %v2147_v61, %v1944_v32  ;;  %v2202_v7 = vpop.permute.xlu0 %2201  ;;  %v3412_v48 = vpop.eup %3411  ;;  %3423 = vrcp.f32 %v1747_v46  ;;  %v1964_v28 = vld [vmem:[%s4296_s5 + $0x138] sm:$0xff]  ;;  %v1985_v32 = vld [vmem:[%s4296_s5 + $0x1e0] sm:$0xff] }
 0x170   : > { %v2574_v42 = vmul.f32 %v2202_v7, %v1965_v33  ;;  %v2575_v35 = vmul.f32 %v2202_v7, %v1966_v34  ;;  %2511 = vperm.xlu0 %3078, %v3404_v20   ;;  %v3414_v17 = vpop.eup %3413  ;;  %v1986_v20 = vld [vmem:[%s4296_s5 + $0x1e8] sm:$0xff]  ;;  %v1967_v7 = vld [vmem:[%s4296_s5 + $0x150] sm:$0xff] }
 0x171   : > { %2727 = vst [vmem:[%s4312_s8 + $0x90] sm:$0xff] %v2552_v22  ;;  %2728 = vst.msk [vmem:[%s4312_s8 + $0x98] sm:$0xff] %vm2709_vm1, %v2553_v39  ;;  %v3416_v59 = vpop.eup %3415  ;;  %v1749_v53 = vadd.f32 1.0, %v3414_v17  ;;  %v1994_v17 = vld [vmem:[%s4296_s5 + $0x228] sm:$0xff] }
 0x172   : > { %2749 = vst [vmem:[%s4312_s8 + $0x140] sm:$0xff] %v2574_v42  ;;  %2750 = vst.msk [vmem:[%s4312_s8 + $0x148] sm:$0xff] %vm2709_vm1, %v2575_v35  ;;  %2466 = vperm.xlu1 %3077, %v3406_v37   ;;  %v2157_v9 = vpop.permute.xlu1 %2156  ;;  %v1989_v42 = vld [vmem:[%s4296_s5 + $0x200] sm:$0xff]  ;;  %v1990_v35 = vld [vmem:[%s4296_s5 + $0x208] sm:$0xff] }
 0x173   : > { %v2556_v47 = vmul.f32 %v2157_v9, %v1947_v43  ;;  %v2557_v51 = vmul.f32 %v2157_v9, %v1948_v36  ;;  %v2212_v52 = vpop.permute.xlu0 %2211  ;;  %v3418_v6 = vpop.eup %3417  ;;  %3425 = vrcp.f32 %v1749_v53 }
 0x174   : > { %v2578_v41 = vmul.f32 %v2212_v52, %v1969_v31  ;;  %v2579_v55 = vmul.f32 %v2212_v52, %v1970_v8  ;;  %2521 = vperm.xlu0 %3078, %v3410_v44   ;;  %v1993_v52 = vld [vmem:[%s4296_s5 + $0x220] sm:$0xff] }
 0x175   : > { %2731 = vst [vmem:[%s4312_s8 + $0xb0] sm:$0xff] %v2556_v47  ;;  %2732 = vst.msk [vmem:[%s4312_s8 + $0xb8] sm:$0xff] %vm2709_vm1, %v2557_v51  ;;  %v1972_v47 = vld [vmem:[%s4296_s5 + $0x178] sm:$0xff] }
 0x176   : > { %2753 = vst [vmem:[%s4312_s8 + $0x160] sm:$0xff] %v2578_v41  ;;  %2754 = vst.msk [vmem:[%s4312_s8 + $0x168] sm:$0xff] %vm2709_vm1, %v2579_v55  ;;  %2476 = vperm.xlu1 %3077, %v3412_v48   ;;  %v2167_v1 = vpop.permute.xlu1 %2166  ;;  %v3420_v19 = vpop.eup %3419  ;;  %v1971_v48 = vld [vmem:[%s4296_s5 + $0x170] sm:$0xff] }
 0x177   : > { %v2560_v38 = vmul.f32 %v2167_v1, %v1951_v57  ;;  %v2561_v62 = vmul.f32 %v2167_v1, %v1952_v45  ;;  %v2222_v2 = vpop.permute.xlu0 %2221  ;;  %v1997_v1 = vld [vmem:[%s4296_s5 + $0x240] sm:$0xff] }
 0x178   : > { %v2582_v54 = vmul.f32 %v2222_v2, %v1973_v50  ;;  %v2583_v3 = vmul.f32 %v2222_v2, %v1974_v63  ;;  %2531 = vperm.xlu0 %3078, %v3416_v59   ;;  %v1975_v50 = vld [vmem:[%s4296_s5 + $0x190] sm:$0xff]  ;;  %v1976_v63 = vld [vmem:[%s4296_s5 + $0x198] sm:$0xff] }
 0x179   : > { %2735 = vst [vmem:[%s4312_s8 + $0xd0] sm:$0xff] %v2560_v38  ;;  %2736 = vst.msk [vmem:[%s4312_s8 + $0xd8] sm:$0xff] %vm2709_vm1, %v2561_v62  ;;  %v3422_v30 = vpop.eup %3421  ;;  %v1998_v38 = vld [vmem:[%s4296_s5 + $0x248] sm:$0xff] }
 0x17a   : > { %2757 = vst [vmem:[%s4312_s8 + $0x180] sm:$0xff] %v2582_v54  ;;  %2758 = vst.msk [vmem:[%s4312_s8 + $0x188] sm:$0xff] %vm2709_vm1, %v2583_v3  ;;  %2486 = vperm.xlu1 %3077, %v3418_v6   ;;  %v2177_v49 = vpop.permute.xlu1 %2176  ;;  %v1980_v6 = vld [vmem:[%s4296_s5 + $0x1b8] sm:$0xff] }
 0x17b   : > { %v2564_v0 = vmul.f32 %v2177_v49, %v1955_v56  ;;  %v2565_v12 = vmul.f32 %v2177_v49, %v1956_v58  ;;  %v2232_v15 = vpop.permute.xlu0 %2231  ;;  %v1979_v58 = vld [vmem:[%s4296_s5 + $0x1b0] sm:$0xff] }
 0x17c   : > { %v2586_v16 = vmul.f32 %v2232_v15, %v1977_v11  ;;  %v2587_v14 = vmul.f32 %v2232_v15, %v1978_v60  ;;  %v3424_v40 = vpop.eup %3423  ;;  %v2001_v11 = vld [vmem:[%s4296_s5 + $0x260] sm:$0xff]  ;;  %v2002_v60 = vld [vmem:[%s4296_s5 + $0x268] sm:$0xff] }
 0x17d   : > { %2739 = vst [vmem:[%s4312_s8 + $0xf0] sm:$0xff] %v2564_v0  ;;  %2740 = vst.msk [vmem:[%s4312_s8 + $0xf8] sm:$0xff] %vm2709_vm1, %v2565_v12 }
 0x17e   : > { %2761 = vst [vmem:[%s4312_s8 + $0x1a0] sm:$0xff] %v2586_v16  ;;  %2762 = vst.msk [vmem:[%s4312_s8 + $0x1a8] sm:$0xff] %vm2709_vm1, %v2587_v14  ;;  %2496 = vperm.xlu1 %3077, %v3420_v19   ;;  %v2187_v24 = vpop.permute.xlu1 %2186  ;;  %v2005_v19 = vld [vmem:[%s4296_s5 + $0x280] sm:$0xff] }
 0x17f   : > { %v2568_v10 = vmul.f32 %v2187_v24, %v1959_v18  ;;  %v2569_v27 = vmul.f32 %v2187_v24, %v1960_v4  ;;  %v2242_v29 = vpop.permute.xlu0 %2241  ;;  %v1983_v18 = vld [vmem:[%s4296_s5 + $0x1d0] sm:$0xff]  ;;  %v1984_v4 = vld [vmem:[%s4296_s5 + $0x1d8] sm:$0xff] }
 0x180   : > { %v2590_v13 = vmul.f32 %v2242_v29, %v1981_v21  ;;  %v2591_v23 = vmul.f32 %v2242_v29, %v1982_v5  ;;  %v3426_v51 = vpop.eup %3425  ;;  %v2006_v21 = vld [vmem:[%s4296_s5 + $0x288] sm:$0xff] }
 0x181   : > { %2743 = vst [vmem:[%s4312_s8 + $0x110] sm:$0xff] %v2568_v10  ;;  %2744 = vst.msk [vmem:[%s4312_s8 + $0x118] sm:$0xff] %vm2709_vm1, %v2569_v27 }
 0x182   : > { %2765 = vst [vmem:[%s4312_s8 + $0x1c0] sm:$0xff] %v2590_v13  ;;  %2766 = vst.msk [vmem:[%s4312_s8 + $0x1c8] sm:$0xff] %vm2709_vm1, %v2591_v23  ;;  %2506 = vperm.xlu1 %3077, %v3422_v30   ;;  %v2197_v33 = vpop.permute.xlu1 %2196  ;;  %v1987_v23 = vld [vmem:[%s4296_s5 + $0x1f0] sm:$0xff]  ;;  %v2010_v30 = vld [vmem:[%s4296_s5 + $0x2a8] sm:$0xff] }
 0x183   : > { %v2572_v34 = vmul.f32 %v2197_v33, %v1963_v25  ;;  %v2573_v61 = vmul.f32 %v2197_v33, %v1964_v28  ;;  %v2252_v37 = vpop.permute.xlu0 %2251  ;;  %v1988_v25 = vld [vmem:[%s4296_s5 + $0x1f8] sm:$0xff]  ;;  %v2009_v28 = vld [vmem:[%s4296_s5 + $0x2a0] sm:$0xff] }
 0x184   : > { %v2594_v22 = vmul.f32 %v2252_v37, %v1985_v32  ;;  %v2595_v39 = vmul.f32 %v2252_v37, %v1986_v20 }
 0x185   : > { %2747 = vst [vmem:[%s4312_s8 + $0x130] sm:$0xff] %v2572_v34  ;;  %2748 = vst.msk [vmem:[%s4312_s8 + $0x138] sm:$0xff] %vm2709_vm1, %v2573_v61 }
 0x186   : > { %2769 = vst [vmem:[%s4312_s8 + $0x1e0] sm:$0xff] %v2594_v22  ;;  %2770 = vst.msk [vmem:[%s4312_s8 + $0x1e8] sm:$0xff] %vm2709_vm1, %v2595_v39  ;;  %2516 = vperm.xlu1 %3077, %v3424_v40   ;;  %v2207_v43 = vpop.permute.xlu1 %2206  ;;  %v1991_v22 = vld [vmem:[%s4296_s5 + $0x210] sm:$0xff]  ;;  %v1992_v39 = vld [vmem:[%s4296_s5 + $0x218] sm:$0xff] }
 0x187   : > { %v2576_v36 = vmul.f32 %v2207_v43, %v1967_v7  ;;  %v2577_v44 = vmul.f32 %v2207_v43, %v1968_v26  ;;  %v2262_v31 = vpop.permute.xlu0 %2261  ;;  %v2013_v7 = vld [vmem:[%s4296_s5 + $0x2c0] sm:$0xff]  ;;  %v2014_v26 = vld [vmem:[%s4296_s5 + $0x2c8] sm:$0xff] }
 0x188   : > { %v2598_v8 = vmul.f32 %v2262_v31, %v1989_v42  ;;  %v2599_v9 = vmul.f32 %v2262_v31, %v1990_v35  ;;  %v1995_v31 = vld [vmem:[%s4296_s5 + $0x230] sm:$0xff] }
 0x189   : > { %2751 = vst [vmem:[%s4312_s8 + $0x150] sm:$0xff] %v2576_v36  ;;  %2752 = vst.msk [vmem:[%s4312_s8 + $0x158] sm:$0xff] %vm2709_vm1, %v2577_v44 }
 0x18a   : > { %2773 = vst [vmem:[%s4312_s8 + $0x200] sm:$0xff] %v2598_v8  ;;  %2774 = vst.msk [vmem:[%s4312_s8 + $0x208] sm:$0xff] %vm2709_vm1, %v2599_v9  ;;  %2526 = vperm.xlu1 %3077, %v3426_v51   ;;  %v2217_v46 = vpop.permute.xlu1 %2216  ;;  %v1996_v8 = vld [vmem:[%s4296_s5 + $0x238] sm:$0xff]  ;;  %v2017_v9 = vld [vmem:[%s4296_s5 + $0x2e0] sm:$0xff] }
 0x18b   : > { %v2580_v41 = vmul.f32 %v2217_v46, %v1971_v48  ;;  %v2581_v55 = vmul.f32 %v2217_v46, %v1972_v47  ;;  %v2272_v57 = vpop.permute.xlu0 %2271  ;;  %v2018_v48 = vld [vmem:[%s4296_s5 + $0x2e8] sm:$0xff] }
 0x18c   : > { %v2602_v45 = vmul.f32 %v2272_v57, %v1993_v52  ;;  %v2603_v59 = vmul.f32 %v2272_v57, %v1994_v17  ;;  %v2000_v57 = vld [vmem:[%s4296_s5 + $0x258] sm:$0xff] }
 0x18d   : > { %2755 = vst [vmem:[%s4312_s8 + $0x170] sm:$0xff] %v2580_v41  ;;  %2756 = vst.msk [vmem:[%s4312_s8 + $0x178] sm:$0xff] %vm2709_vm1, %v2581_v55  ;;  %v1999_v55 = vld [vmem:[%s4296_s5 + $0x250] sm:$0xff] }
 0x18e   : > { %2777 = vst [vmem:[%s4312_s8 + $0x220] sm:$0xff] %v2602_v45  ;;  %2778 = vst.msk [vmem:[%s4312_s8 + $0x228] sm:$0xff] %vm2709_vm1, %v2603_v59  ;;  %v2227_v62 = vpop.permute.xlu1 %2226  ;;  %v2021_v45 = vld [vmem:[%s4296_s5 + $0x300] sm:$0xff]  ;;  %v2022_v59 = vld [vmem:[%s4296_s5 + $0x308] sm:$0xff] }
 0x18f   : > { %v2584_v2 = vmul.f32 %v2227_v62, %v1975_v50  ;;  %v2585_v53 = vmul.f32 %v2227_v62, %v1976_v63  ;;  %v2282_v54 = vpop.permute.xlu0 %2281 }
 0x190   : > { %v2606_v3 = vmul.f32 %v2282_v54, %v1997_v1  ;;  %v2607_v56 = vmul.f32 %v2282_v54, %v1998_v38  ;;  %v2004_v54 = vld [vmem:[%s4296_s5 + $0x278] sm:$0xff] }
 0x191   : > { %2759 = vst [vmem:[%s4312_s8 + $0x190] sm:$0xff] %v2584_v2  ;;  %2760 = vst.msk [vmem:[%s4312_s8 + $0x198] sm:$0xff] %vm2709_vm1, %v2585_v53  ;;  %v2003_v53 = vld [vmem:[%s4296_s5 + $0x270] sm:$0xff] }
 0x192   : > { %2781 = vst [vmem:[%s4312_s8 + $0x240] sm:$0xff] %v2606_v3  ;;  %2782 = vst.msk [vmem:[%s4312_s8 + $0x248] sm:$0xff] %vm2709_vm1, %v2607_v56  ;;  %v2237_v49 = vpop.permute.xlu1 %2236  ;;  %v2025_v3 = vld [vmem:[%s4296_s5 + $0x320] sm:$0xff]  ;;  %v2026_v56 = vld [vmem:[%s4296_s5 + $0x328] sm:$0xff] }
 0x193   : > { %v2588_v0 = vmul.f32 %v2237_v49, %v1979_v58  ;;  %v2589_v12 = vmul.f32 %v2237_v49, %v1980_v6  ;;  %v2292_v15 = vpop.permute.xlu0 %2291 }
 0x194   : > { %v2610_v16 = vmul.f32 %v2292_v15, %v2001_v11  ;;  %v2611_v14 = vmul.f32 %v2292_v15, %v2002_v60  ;;  %v2008_v15 = vld [vmem:[%s4296_s5 + $0x298] sm:$0xff] }
 0x195   : > { %2763 = vst [vmem:[%s4312_s8 + $0x1b0] sm:$0xff] %v2588_v0  ;;  %2764 = vst.msk [vmem:[%s4312_s8 + $0x1b8] sm:$0xff] %vm2709_vm1, %v2589_v12  ;;  %v2007_v12 = vld [vmem:[%s4296_s5 + $0x290] sm:$0xff] }
 0x196   : > { %2785 = vst [vmem:[%s4312_s8 + $0x260] sm:$0xff] %v2610_v16  ;;  %2786 = vst.msk [vmem:[%s4312_s8 + $0x268] sm:$0xff] %vm2709_vm1, %v2611_v14  ;;  %v2247_v5 = vpop.permute.xlu1 %2246  ;;  %v2029_v16 = vld [vmem:[%s4296_s5 + $0x340] sm:$0xff]  ;;  %v2030_v14 = vld [vmem:[%s4296_s5 + $0x348] sm:$0xff] }
 0x197   : > { %v2592_v24 = vmul.f32 %v2247_v5, %v1983_v18  ;;  %v2593_v10 = vmul.f32 %v2247_v5, %v1984_v4  ;;  %v2302_v27 = vpop.permute.xlu0 %2301 }
 0x198   : > { %v2614_v29 = vmul.f32 %v2302_v27, %v2005_v19  ;;  %v2615_v13 = vmul.f32 %v2302_v27, %v2006_v21  ;;  %v2012_v27 = vld [vmem:[%s4296_s5 + $0x2b8] sm:$0xff] }
 0x199   : > { %2767 = vst [vmem:[%s4312_s8 + $0x1d0] sm:$0xff] %v2592_v24  ;;  %2768 = vst.msk [vmem:[%s4312_s8 + $0x1d8] sm:$0xff] %vm2709_vm1, %v2593_v10  ;;  %v2011_v10 = vld [vmem:[%s4296_s5 + $0x2b0] sm:$0xff] }
 0x19a   : > { %2789 = vst [vmem:[%s4312_s8 + $0x280] sm:$0xff] %v2614_v29  ;;  %2790 = vst.msk [vmem:[%s4312_s8 + $0x288] sm:$0xff] %vm2709_vm1, %v2615_v13  ;;  %v2257_v32 = vpop.permute.xlu1 %2256  ;;  %v2033_v29 = vld [vmem:[%s4296_s5 + $0x360] sm:$0xff]  ;;  %v2034_v13 = vld [vmem:[%s4296_s5 + $0x368] sm:$0xff] }
 0x19b   : > { %v2596_v20 = vmul.f32 %v2257_v32, %v1987_v23  ;;  %v2597_v33 = vmul.f32 %v2257_v32, %v1988_v25  ;;  %v2312_v34 = vpop.permute.xlu0 %2311 }
 0x19c   : > { %v2618_v61 = vmul.f32 %v2312_v34, %v2009_v28  ;;  %v2619_v37 = vmul.f32 %v2312_v34, %v2010_v30  ;;  %v2016_v34 = vld [vmem:[%s4296_s5 + $0x2d8] sm:$0xff] }
 0x19d   : > { %2771 = vst [vmem:[%s4312_s8 + $0x1f0] sm:$0xff] %v2596_v20  ;;  %2772 = vst.msk [vmem:[%s4312_s8 + $0x1f8] sm:$0xff] %vm2709_vm1, %v2597_v33  ;;  %v2015_v33 = vld [vmem:[%s4296_s5 + $0x2d0] sm:$0xff] }
 0x19e   : > { %2793 = vst [vmem:[%s4312_s8 + $0x2a0] sm:$0xff] %v2618_v61  ;;  %2794 = vst.msk [vmem:[%s4312_s8 + $0x2a8] sm:$0xff] %vm2709_vm1, %v2619_v37  ;;  %v2267_v40 = vpop.permute.xlu1 %2266  ;;  %v2037_v61 = vld [vmem:[%s4296_s5 + $0x380] sm:$0xff]  ;;  %v2038_v37 = vld [vmem:[%s4296_s5 + $0x388] sm:$0xff] }
 0x19f   : > { %v2600_v42 = vmul.f32 %v2267_v40, %v1991_v22  ;;  %v2601_v35 = vmul.f32 %v2267_v40, %v1992_v39  ;;  %v2322_v43 = vpop.permute.xlu0 %2321 }
 0x1a0   : > { %v2622_v36 = vmul.f32 %v2322_v43, %v2013_v7  ;;  %v2623_v44 = vmul.f32 %v2322_v43, %v2014_v26  ;;  %v2020_v43 = vld [vmem:[%s4296_s5 + $0x2f8] sm:$0xff] }
 0x1a1   : > { %2775 = vst [vmem:[%s4312_s8 + $0x210] sm:$0xff] %v2600_v42  ;;  %2776 = vst.msk [vmem:[%s4312_s8 + $0x218] sm:$0xff] %vm2709_vm1, %v2601_v35  ;;  %v2019_v35 = vld [vmem:[%s4296_s5 + $0x2f0] sm:$0xff] }
 0x1a2   : > { %2797 = vst [vmem:[%s4312_s8 + $0x2c0] sm:$0xff] %v2622_v36  ;;  %2798 = vst.msk [vmem:[%s4312_s8 + $0x2c8] sm:$0xff] %vm2709_vm1, %v2623_v44  ;;  %v2277_v47 = vpop.permute.xlu1 %2276  ;;  %v2041_v36 = vld [vmem:[%s4296_s5 + $0x3a0] sm:$0xff]  ;;  %v2042_v44 = vld [vmem:[%s4296_s5 + $0x3a8] sm:$0xff] }
 0x1a3   : > { %v2604_v51 = vmul.f32 %v2277_v47, %v1995_v31  ;;  %v2605_v52 = vmul.f32 %v2277_v47, %v1996_v8  ;;  %v2332_v17 = vpop.permute.xlu0 %2331 }
 0x1a4   : > { %v2626_v46 = vmul.f32 %v2332_v17, %v2017_v9  ;;  %v2627_v41 = vmul.f32 %v2332_v17, %v2018_v48  ;;  %v2024_v17 = vld [vmem:[%s4296_s5 + $0x318] sm:$0xff] }
 0x1a5   : > { %2779 = vst [vmem:[%s4312_s8 + $0x230] sm:$0xff] %v2604_v51  ;;  %2780 = vst.msk [vmem:[%s4312_s8 + $0x238] sm:$0xff] %vm2709_vm1, %v2605_v52  ;;  %v2023_v52 = vld [vmem:[%s4296_s5 + $0x310] sm:$0xff] }
 0x1a6   : > { %2801 = vst [vmem:[%s4312_s8 + $0x2e0] sm:$0xff] %v2626_v46  ;;  %2802 = vst.msk [vmem:[%s4312_s8 + $0x2e8] sm:$0xff] %vm2709_vm1, %v2627_v41  ;;  %v2287_v50 = vpop.permute.xlu1 %2286  ;;  %v2045_v46 = vld [vmem:[%s4296_s5 + $0x3c0] sm:$0xff]  ;;  %v2046_v41 = vld [vmem:[%s4296_s5 + $0x3c8] sm:$0xff] }
 0x1a7   : > { %v2608_v63 = vmul.f32 %v2287_v50, %v1999_v55  ;;  %v2609_v1 = vmul.f32 %v2287_v50, %v2000_v57  ;;  %v2342_v38 = vpop.permute.xlu0 %2341 }
 0x1a8   : > { %v2630_v62 = vmul.f32 %v2342_v38, %v2021_v45  ;;  %v2631_v2 = vmul.f32 %v2342_v38, %v2022_v59  ;;  %v2028_v38 = vld [vmem:[%s4296_s5 + $0x338] sm:$0xff] }
 0x1a9   : > { %2783 = vst [vmem:[%s4312_s8 + $0x250] sm:$0xff] %v2608_v63  ;;  %2784 = vst.msk [vmem:[%s4312_s8 + $0x258] sm:$0xff] %vm2709_vm1, %v2609_v1  ;;  %v2027_v1 = vld [vmem:[%s4296_s5 + $0x330] sm:$0xff] }
 0x1aa   : > { %2805 = vst [vmem:[%s4312_s8 + $0x300] sm:$0xff] %v2630_v62  ;;  %2806 = vst.msk [vmem:[%s4312_s8 + $0x308] sm:$0xff] %vm2709_vm1, %v2631_v2  ;;  %v2297_v58 = vpop.permute.xlu1 %2296  ;;  %v2049_v62 = vld [vmem:[%s4296_s5 + $0x3e0] sm:$0xff]  ;;  %v2050_v2 = vld [vmem:[%s4296_s5 + $0x3e8] sm:$0xff] }
 0x1ab   : > { %v2612_v6 = vmul.f32 %v2297_v58, %v2003_v53  ;;  %v2613_v11 = vmul.f32 %v2297_v58, %v2004_v54  ;;  %v2352_v60 = vpop.permute.xlu0 %2351 }
 0x1ac   : > { %v2634_v49 = vmul.f32 %v2352_v60, %v2025_v3  ;;  %v2635_v0 = vmul.f32 %v2352_v60, %v2026_v56  ;;  %v2032_v60 = vld [vmem:[%s4296_s5 + $0x358] sm:$0xff] }
 0x1ad   : > { %2787 = vst [vmem:[%s4312_s8 + $0x270] sm:$0xff] %v2612_v6  ;;  %2788 = vst.msk [vmem:[%s4312_s8 + $0x278] sm:$0xff] %vm2709_vm1, %v2613_v11  ;;  %v2031_v11 = vld [vmem:[%s4296_s5 + $0x350] sm:$0xff] }
 0x1ae   : > { %2809 = vst [vmem:[%s4312_s8 + $0x320] sm:$0xff] %v2634_v49  ;;  %2810 = vst.msk [vmem:[%s4312_s8 + $0x328] sm:$0xff] %vm2709_vm1, %v2635_v0  ;;  %v2307_v18 = vpop.permute.xlu1 %2306  ;;  %v2053_v49 = vld [vmem:[%s4296_s5 + $0x400] sm:$0xff]  ;;  %v2054_v0 = vld [vmem:[%s4296_s5 + $0x408] sm:$0xff] }
 0x1af   : > { %v2616_v4 = vmul.f32 %v2307_v18, %v2007_v12  ;;  %v2617_v19 = vmul.f32 %v2307_v18, %v2008_v15  ;;  %v2362_v21 = vpop.permute.xlu0 %2361 }
 0x1b0   : > { %v2638_v5 = vmul.f32 %v2362_v21, %v2029_v16  ;;  %v2639_v24 = vmul.f32 %v2362_v21, %v2030_v14  ;;  %v2036_v21 = vld [vmem:[%s4296_s5 + $0x378] sm:$0xff] }
 0x1b1   : > { %2791 = vst [vmem:[%s4312_s8 + $0x290] sm:$0xff] %v2616_v4  ;;  %2792 = vst.msk [vmem:[%s4312_s8 + $0x298] sm:$0xff] %vm2709_vm1, %v2617_v19  ;;  %v2035_v19 = vld [vmem:[%s4296_s5 + $0x370] sm:$0xff] }
 0x1b2   : > { %2813 = vst [vmem:[%s4312_s8 + $0x340] sm:$0xff] %v2638_v5  ;;  %2814 = vst.msk [vmem:[%s4312_s8 + $0x348] sm:$0xff] %vm2709_vm1, %v2639_v24  ;;  %v2317_v23 = vpop.permute.xlu1 %2316  ;;  %v2057_v5 = vld [vmem:[%s4296_s5 + $0x420] sm:$0xff]  ;;  %v2058_v24 = vld [vmem:[%s4296_s5 + $0x428] sm:$0xff] }
 0x1b3   : > { %v2620_v25 = vmul.f32 %v2317_v23, %v2011_v10  ;;  %v2621_v28 = vmul.f32 %v2317_v23, %v2012_v27  ;;  %v2372_v30 = vpop.permute.xlu0 %2371 }
 0x1b4   : > { %v2642_v32 = vmul.f32 %v2372_v30, %v2033_v29  ;;  %v2643_v20 = vmul.f32 %v2372_v30, %v2034_v13  ;;  %v2040_v30 = vld [vmem:[%s4296_s5 + $0x398] sm:$0xff] }
 0x1b5   : > { %2795 = vst [vmem:[%s4312_s8 + $0x2b0] sm:$0xff] %v2620_v25  ;;  %2796 = vst.msk [vmem:[%s4312_s8 + $0x2b8] sm:$0xff] %vm2709_vm1, %v2621_v28  ;;  %v2039_v28 = vld [vmem:[%s4296_s5 + $0x390] sm:$0xff] }
 0x1b6   : > { %2817 = vst [vmem:[%s4312_s8 + $0x360] sm:$0xff] %v2642_v32  ;;  %2818 = vst.msk [vmem:[%s4312_s8 + $0x368] sm:$0xff] %vm2709_vm1, %v2643_v20  ;;  %v2327_v22 = vpop.permute.xlu1 %2326  ;;  %v2061_v32 = vld [vmem:[%s4296_s5 + $0x440] sm:$0xff]  ;;  %v2062_v20 = vld [vmem:[%s4296_s5 + $0x448] sm:$0xff] }
 0x1b7   : > { %v2624_v39 = vmul.f32 %v2327_v22, %v2015_v33  ;;  %v2625_v7 = vmul.f32 %v2327_v22, %v2016_v34  ;;  %v2382_v26 = vpop.permute.xlu0 %2381 }
 0x1b8   : > { %v2646_v40 = vmul.f32 %v2382_v26, %v2037_v61  ;;  %v2647_v42 = vmul.f32 %v2382_v26, %v2038_v37  ;;  %v2044_v26 = vld [vmem:[%s4296_s5 + $0x3b8] sm:$0xff] }
 0x1b9   : > { %2799 = vst [vmem:[%s4312_s8 + $0x2d0] sm:$0xff] %v2624_v39  ;;  %2800 = vst.msk [vmem:[%s4312_s8 + $0x2d8] sm:$0xff] %vm2709_vm1, %v2625_v7  ;;  %v2043_v7 = vld [vmem:[%s4296_s5 + $0x3b0] sm:$0xff] }
 0x1ba   : > { %2821 = vst [vmem:[%s4312_s8 + $0x380] sm:$0xff] %v2646_v40  ;;  %2822 = vst.msk [vmem:[%s4312_s8 + $0x388] sm:$0xff] %vm2709_vm1, %v2647_v42  ;;  %v2337_v31 = vpop.permute.xlu1 %2336  ;;  %v2065_v40 = vld [vmem:[%s4296_s5 + $0x460] sm:$0xff]  ;;  %v2066_v42 = vld [vmem:[%s4296_s5 + $0x468] sm:$0xff] }
 0x1bb   : > { %v2628_v8 = vmul.f32 %v2337_v31, %v2019_v35  ;;  %v2629_v9 = vmul.f32 %v2337_v31, %v2020_v43  ;;  %v2392_v48 = vpop.permute.xlu0 %2391 }
 0x1bc   : > { %v2650_v47 = vmul.f32 %v2392_v48, %v2041_v36  ;;  %v2651_v51 = vmul.f32 %v2392_v48, %v2042_v44  ;;  %v2048_v48 = vld [vmem:[%s4296_s5 + $0x3d8] sm:$0xff] }
 0x1bd   : > { %2803 = vst [vmem:[%s4312_s8 + $0x2f0] sm:$0xff] %v2628_v8  ;;  %2804 = vst.msk [vmem:[%s4312_s8 + $0x2f8] sm:$0xff] %vm2709_vm1, %v2629_v9  ;;  %v2047_v9 = vld [vmem:[%s4296_s5 + $0x3d0] sm:$0xff] }
 0x1be   : > { %2825 = vst [vmem:[%s4312_s8 + $0x3a0] sm:$0xff] %v2650_v47  ;;  %2826 = vst.msk [vmem:[%s4312_s8 + $0x3a8] sm:$0xff] %vm2709_vm1, %v2651_v51  ;;  %v2347_v55 = vpop.permute.xlu1 %2346  ;;  %v2069_v47 = vld [vmem:[%s4296_s5 + $0x480] sm:$0xff]  ;;  %v2070_v51 = vld [vmem:[%s4296_s5 + $0x488] sm:$0xff] }
 0x1bf   : > { %v2632_v57 = vmul.f32 %v2347_v55, %v2023_v52  ;;  %v2633_v45 = vmul.f32 %v2347_v55, %v2024_v17  ;;  %v2402_v59 = vpop.permute.xlu0 %2401 }
 0x1c0   : > { %v2654_v50 = vmul.f32 %v2402_v59, %v2045_v46  ;;  %v2655_v63 = vmul.f32 %v2402_v59, %v2046_v41  ;;  %v2052_v59 = vld [vmem:[%s4296_s5 + $0x3f8] sm:$0xff] }
 0x1c1   : > { %2807 = vst [vmem:[%s4312_s8 + $0x310] sm:$0xff] %v2632_v57  ;;  %2808 = vst.msk [vmem:[%s4312_s8 + $0x318] sm:$0xff] %vm2709_vm1, %v2633_v45  ;;  %v2051_v45 = vld [vmem:[%s4296_s5 + $0x3f0] sm:$0xff] }
 0x1c2   : > { %2829 = vst [vmem:[%s4312_s8 + $0x3c0] sm:$0xff] %v2654_v50  ;;  %2830 = vst.msk [vmem:[%s4312_s8 + $0x3c8] sm:$0xff] %vm2709_vm1, %v2655_v63  ;;  %v2357_v53 = vpop.permute.xlu1 %2356  ;;  %v2073_v50 = vld [vmem:[%s4296_s5 + $0x4a0] sm:$0xff]  ;;  %v2074_v63 = vld [vmem:[%s4296_s5 + $0x4a8] sm:$0xff] }
 0x1c3   : > { %v2636_v54 = vmul.f32 %v2357_v53, %v2027_v1  ;;  %v2637_v3 = vmul.f32 %v2357_v53, %v2028_v38  ;;  %v2412_v56 = vpop.permute.xlu0 %2411 }
 0x1c4   : > { %v2658_v58 = vmul.f32 %v2412_v56, %v2049_v62  ;;  %v2659_v6 = vmul.f32 %v2412_v56, %v2050_v2  ;;  %v2056_v56 = vld [vmem:[%s4296_s5 + $0x418] sm:$0xff] }
 0x1c5   : > { %2811 = vst [vmem:[%s4312_s8 + $0x330] sm:$0xff] %v2636_v54  ;;  %2812 = vst.msk [vmem:[%s4312_s8 + $0x338] sm:$0xff] %vm2709_vm1, %v2637_v3  ;;  %v2055_v3 = vld [vmem:[%s4296_s5 + $0x410] sm:$0xff] }
 0x1c6   : > { %2833 = vst [vmem:[%s4312_s8 + $0x3e0] sm:$0xff] %v2658_v58  ;;  %2834 = vst.msk [vmem:[%s4312_s8 + $0x3e8] sm:$0xff] %vm2709_vm1, %v2659_v6  ;;  %v2367_v12 = vpop.permute.xlu1 %2366  ;;  %v2077_v58 = vld [vmem:[%s4296_s5 + $0x4c0] sm:$0xff]  ;;  %v2078_v6 = vld [vmem:[%s4296_s5 + $0x4c8] sm:$0xff] }
 0x1c7   : > { %v2640_v15 = vmul.f32 %v2367_v12, %v2031_v11  ;;  %v2641_v16 = vmul.f32 %v2367_v12, %v2032_v60  ;;  %v2422_v14 = vpop.permute.xlu0 %2421 }
 0x1c8   : > { %v2662_v18 = vmul.f32 %v2422_v14, %v2053_v49  ;;  %v2663_v4 = vmul.f32 %v2422_v14, %v2054_v0  ;;  %v2060_v14 = vld [vmem:[%s4296_s5 + $0x438] sm:$0xff] }
 0x1c9   : > { %2815 = vst [vmem:[%s4312_s8 + $0x350] sm:$0xff] %v2640_v15  ;;  %2816 = vst.msk [vmem:[%s4312_s8 + $0x358] sm:$0xff] %vm2709_vm1, %v2641_v16  ;;  %v2059_v16 = vld [vmem:[%s4296_s5 + $0x430] sm:$0xff] }
 0x1ca   : > { %2837 = vst [vmem:[%s4312_s8 + $0x400] sm:$0xff] %v2662_v18  ;;  %2838 = vst.msk [vmem:[%s4312_s8 + $0x408] sm:$0xff] %vm2709_vm1, %v2663_v4  ;;  %v2377_v10 = vpop.permute.xlu1 %2376  ;;  %v2081_v18 = vld [vmem:[%s4296_s5 + $0x4e0] sm:$0xff]  ;;  %v2082_v4 = vld [vmem:[%s4296_s5 + $0x4e8] sm:$0xff] }
 0x1cb   : > { %v2644_v27 = vmul.f32 %v2377_v10, %v2035_v19  ;;  %v2645_v29 = vmul.f32 %v2377_v10, %v2036_v21  ;;  %v2432_v13 = vpop.permute.xlu0 %2431 }
 0x1cc   : > { %v2666_v23 = vmul.f32 %v2432_v13, %v2057_v5  ;;  %v2667_v25 = vmul.f32 %v2432_v13, %v2058_v24  ;;  %v2064_v13 = vld [vmem:[%s4296_s5 + $0x458] sm:$0xff] }
 0x1cd   : > { %2819 = vst [vmem:[%s4312_s8 + $0x370] sm:$0xff] %v2644_v27  ;;  %2820 = vst.msk [vmem:[%s4312_s8 + $0x378] sm:$0xff] %vm2709_vm1, %v2645_v29  ;;  %v2063_v29 = vld [vmem:[%s4296_s5 + $0x450] sm:$0xff] }
 0x1ce   : > { %2841 = vst [vmem:[%s4312_s8 + $0x420] sm:$0xff] %v2666_v23  ;;  %2842 = vst.msk [vmem:[%s4312_s8 + $0x428] sm:$0xff] %vm2709_vm1, %v2667_v25  ;;  %v2387_v33 = vpop.permute.xlu1 %2386  ;;  %v2085_v23 = vld [vmem:[%s4296_s5 + $0x500] sm:$0xff]  ;;  %v2086_v25 = vld [vmem:[%s4296_s5 + $0x508] sm:$0xff] }
 0x1cf   : > { %v2648_v34 = vmul.f32 %v2387_v33, %v2039_v28  ;;  %v2649_v61 = vmul.f32 %v2387_v33, %v2040_v30  ;;  %v2442_v37 = vpop.permute.xlu0 %2441 }
 0x1d0   : > { %v2670_v22 = vmul.f32 %v2442_v37, %v2061_v32  ;;  %v2671_v39 = vmul.f32 %v2442_v37, %v2062_v20  ;;  %v2068_v37 = vld [vmem:[%s4296_s5 + $0x478] sm:$0xff] }
 0x1d1   : > { %2823 = vst [vmem:[%s4312_s8 + $0x390] sm:$0xff] %v2648_v34  ;;  %2824 = vst.msk [vmem:[%s4312_s8 + $0x398] sm:$0xff] %vm2709_vm1, %v2649_v61  ;;  %v2067_v61 = vld [vmem:[%s4296_s5 + $0x470] sm:$0xff] }
 0x1d2   : > { %2845 = vst [vmem:[%s4312_s8 + $0x440] sm:$0xff] %v2670_v22  ;;  %2846 = vst.msk [vmem:[%s4312_s8 + $0x448] sm:$0xff] %vm2709_vm1, %v2671_v39  ;;  %v2397_v35 = vpop.permute.xlu1 %2396  ;;  %v2089_v22 = vld [vmem:[%s4296_s5 + $0x520] sm:$0xff]  ;;  %v2090_v39 = vld [vmem:[%s4296_s5 + $0x528] sm:$0xff] }
 0x1d3   : > { %v2652_v43 = vmul.f32 %v2397_v35, %v2043_v7  ;;  %v2653_v36 = vmul.f32 %v2397_v35, %v2044_v26  ;;  %v2452_v44 = vpop.permute.xlu0 %2451 }
 0x1d4   : > { %v2674_v31 = vmul.f32 %v2452_v44, %v2065_v40  ;;  %v2675_v8 = vmul.f32 %v2452_v44, %v2066_v42  ;;  %v2072_v44 = vld [vmem:[%s4296_s5 + $0x498] sm:$0xff] }
 0x1d5   : > { %2827 = vst [vmem:[%s4312_s8 + $0x3b0] sm:$0xff] %v2652_v43  ;;  %2828 = vst.msk [vmem:[%s4312_s8 + $0x3b8] sm:$0xff] %vm2709_vm1, %v2653_v36  ;;  %v2071_v36 = vld [vmem:[%s4296_s5 + $0x490] sm:$0xff] }
 0x1d6   : > { %2849 = vst [vmem:[%s4312_s8 + $0x460] sm:$0xff] %v2674_v31  ;;  %2850 = vst.msk [vmem:[%s4312_s8 + $0x468] sm:$0xff] %vm2709_vm1, %v2675_v8  ;;  %v2407_v52 = vpop.permute.xlu1 %2406  ;;  %v2093_v31 = vld [vmem:[%s4296_s5 + $0x540] sm:$0xff]  ;;  %v2094_v8 = vld [vmem:[%s4296_s5 + $0x548] sm:$0xff] }
 0x1d7   : > { %v2656_v17 = vmul.f32 %v2407_v52, %v2047_v9  ;;  %v2657_v46 = vmul.f32 %v2407_v52, %v2048_v48  ;;  %v2462_v41 = vpop.permute.xlu0 %2461 }
 0x1d8   : > { %v2678_v55 = vmul.f32 %v2462_v41, %v2069_v47  ;;  %v2679_v57 = vmul.f32 %v2462_v41, %v2070_v51  ;;  %v2076_v41 = vld [vmem:[%s4296_s5 + $0x4b8] sm:$0xff] }
 0x1d9   : > { %2831 = vst [vmem:[%s4312_s8 + $0x3d0] sm:$0xff] %v2656_v17  ;;  %2832 = vst.msk [vmem:[%s4312_s8 + $0x3d8] sm:$0xff] %vm2709_vm1, %v2657_v46  ;;  %v2075_v46 = vld [vmem:[%s4296_s5 + $0x4b0] sm:$0xff] }
 0x1da   : > { %2853 = vst [vmem:[%s4312_s8 + $0x480] sm:$0xff] %v2678_v55  ;;  %2854 = vst.msk [vmem:[%s4312_s8 + $0x488] sm:$0xff] %vm2709_vm1, %v2679_v57  ;;  %v2417_v1 = vpop.permute.xlu1 %2416  ;;  %v2097_v55 = vld [vmem:[%s4296_s5 + $0x560] sm:$0xff]  ;;  %v2098_v57 = vld [vmem:[%s4296_s5 + $0x568] sm:$0xff] }
 0x1db   : > { %v2660_v38 = vmul.f32 %v2417_v1, %v2051_v45  ;;  %v2661_v62 = vmul.f32 %v2417_v1, %v2052_v59  ;;  %v2472_v2 = vpop.permute.xlu0 %2471 }
 0x1dc   : > { %v2682_v53 = vmul.f32 %v2472_v2, %v2073_v50  ;;  %v2683_v54 = vmul.f32 %v2472_v2, %v2074_v63  ;;  %v2080_v2 = vld [vmem:[%s4296_s5 + $0x4d8] sm:$0xff] }
 0x1dd   : > { %2835 = vst [vmem:[%s4312_s8 + $0x3f0] sm:$0xff] %v2660_v38  ;;  %2836 = vst.msk [vmem:[%s4312_s8 + $0x3f8] sm:$0xff] %vm2709_vm1, %v2661_v62  ;;  %v2079_v62 = vld [vmem:[%s4296_s5 + $0x4d0] sm:$0xff] }
 0x1de   : > { %2857 = vst [vmem:[%s4312_s8 + $0x4a0] sm:$0xff] %v2682_v53  ;;  %2858 = vst.msk [vmem:[%s4312_s8 + $0x4a8] sm:$0xff] %vm2709_vm1, %v2683_v54  ;;  %v2427_v11 = vpop.permute.xlu1 %2426 }
 0x1df   : > { %v2664_v60 = vmul.f32 %v2427_v11, %v2055_v3  ;;  %v2665_v49 = vmul.f32 %v2427_v11, %v2056_v56  ;;  %v2482_v0 = vpop.permute.xlu0 %2481  ;;  %v2083_v56 = vld [vmem:[%s4296_s5 + $0x4f0] sm:$0xff] }
 0x1e0   : > { %v2686_v12 = vmul.f32 %v2482_v0, %v2077_v58  ;;  %v2687_v15 = vmul.f32 %v2482_v0, %v2078_v6  ;;  %v2084_v58 = vld [vmem:[%s4296_s5 + $0x4f8] sm:$0xff] }
 0x1e1   : > { %2839 = vst [vmem:[%s4312_s8 + $0x410] sm:$0xff] %v2664_v60  ;;  %2840 = vst.msk [vmem:[%s4312_s8 + $0x418] sm:$0xff] %vm2709_vm1, %v2665_v49  ;;  %v2087_v49 = vld [vmem:[%s4296_s5 + $0x510] sm:$0xff]  ;;  %v2088_v0 = vld [vmem:[%s4296_s5 + $0x518] sm:$0xff] }
 0x1e2   : > { %2861 = vst [vmem:[%s4312_s8 + $0x4c0] sm:$0xff] %v2686_v12  ;;  %2862 = vst.msk [vmem:[%s4312_s8 + $0x4c8] sm:$0xff] %vm2709_vm1, %v2687_v15  ;;  %v2437_v19 = vpop.permute.xlu1 %2436 }
 0x1e3   : > { %v2668_v21 = vmul.f32 %v2437_v19, %v2059_v16  ;;  %v2669_v5 = vmul.f32 %v2437_v19, %v2060_v14  ;;  %v2492_v24 = vpop.permute.xlu0 %2491  ;;  %v2091_v14 = vld [vmem:[%s4296_s5 + $0x530] sm:$0xff] }
 0x1e4   : > { %v2690_v10 = vmul.f32 %v2492_v24, %v2081_v18  ;;  %v2691_v27 = vmul.f32 %v2492_v24, %v2082_v4  ;;  %v2092_v18 = vld [vmem:[%s4296_s5 + $0x538] sm:$0xff] }
 0x1e5   : > { %2843 = vst [vmem:[%s4312_s8 + $0x430] sm:$0xff] %v2668_v21  ;;  %2844 = vst.msk [vmem:[%s4312_s8 + $0x438] sm:$0xff] %vm2709_vm1, %v2669_v5  ;;  %v2095_v5 = vld [vmem:[%s4296_s5 + $0x550] sm:$0xff]  ;;  %v2096_v24 = vld [vmem:[%s4296_s5 + $0x558] sm:$0xff] }
 0x1e6   : > { %2865 = vst [vmem:[%s4312_s8 + $0x4e0] sm:$0xff] %v2690_v10  ;;  %2866 = vst.msk [vmem:[%s4312_s8 + $0x4e8] sm:$0xff] %vm2709_vm1, %v2691_v27  ;;  %v2447_v28 = vpop.permute.xlu1 %2446 }
 0x1e7   : > { %v2672_v30 = vmul.f32 %v2447_v28, %v2063_v29  ;;  %v2673_v32 = vmul.f32 %v2447_v28, %v2064_v13  ;;  %v2502_v20 = vpop.permute.xlu0 %2501 }
 0x1e8   : > { %v2694_v33 = vmul.f32 %v2502_v20, %v2085_v23  ;;  %v2695_v34 = vmul.f32 %v2502_v20, %v2086_v25 }
 0x1e9   : > { %2847 = vst [vmem:[%s4312_s8 + $0x450] sm:$0xff] %v2672_v30  ;;  %2848 = vst.msk [vmem:[%s4312_s8 + $0x458] sm:$0xff] %vm2709_vm1, %v2673_v32 }
 0x1ea   : > { %2869 = vst [vmem:[%s4312_s8 + $0x500] sm:$0xff] %v2694_v33  ;;  %2870 = vst.msk [vmem:[%s4312_s8 + $0x508] sm:$0xff] %vm2709_vm1, %v2695_v34  ;;  %v2457_v7 = vpop.permute.xlu1 %2456 }
 0x1eb   : > { %v2676_v26 = vmul.f32 %v2457_v7, %v2067_v61  ;;  %v2677_v40 = vmul.f32 %v2457_v7, %v2068_v37  ;;  %v2512_v42 = vpop.permute.xlu0 %2511 }
 0x1ec   : > { %v2698_v35 = vmul.f32 %v2512_v42, %v2089_v22  ;;  %v2699_v43 = vmul.f32 %v2512_v42, %v2090_v39 }
 0x1ed   : > { %2851 = vst [vmem:[%s4312_s8 + $0x470] sm:$0xff] %v2676_v26  ;;  %2852 = vst.msk [vmem:[%s4312_s8 + $0x478] sm:$0xff] %vm2709_vm1, %v2677_v40 }
 0x1ee   : > { %2873 = vst [vmem:[%s4312_s8 + $0x520] sm:$0xff] %v2698_v35  ;;  %2874 = vst.msk [vmem:[%s4312_s8 + $0x528] sm:$0xff] %vm2709_vm1, %v2699_v43  ;;  %v2467_v9 = vpop.permute.xlu1 %2466 }
 0x1ef   : > { %v2680_v48 = vmul.f32 %v2467_v9, %v2071_v36  ;;  %v2681_v47 = vmul.f32 %v2467_v9, %v2072_v44  ;;  %v2522_v51 = vpop.permute.xlu0 %2521 }
 0x1f0   : > { %v2702_v52 = vmul.f32 %v2522_v51, %v2093_v31  ;;  %v2703_v17 = vmul.f32 %v2522_v51, %v2094_v8 }
 0x1f1   : > { %2855 = vst [vmem:[%s4312_s8 + $0x490] sm:$0xff] %v2680_v48  ;;  %2856 = vst.msk [vmem:[%s4312_s8 + $0x498] sm:$0xff] %vm2709_vm1, %v2681_v47 }
 0x1f2   : > { %2877 = vst [vmem:[%s4312_s8 + $0x540] sm:$0xff] %v2702_v52  ;;  %2878 = vst.msk [vmem:[%s4312_s8 + $0x548] sm:$0xff] %vm2709_vm1, %v2703_v17  ;;  %v2477_v45 = vpop.permute.xlu1 %2476 }
 0x1f3   : > { %v2684_v59 = vmul.f32 %v2477_v45, %v2075_v46  ;;  %v2685_v50 = vmul.f32 %v2477_v45, %v2076_v41  ;;  %v2532_v63 = vpop.permute.xlu0 %2531 }
 0x1f4   : > { %v2706_v1 = vmul.f32 %v2532_v63, %v2097_v55  ;;  %v2707_v38 = vmul.f32 %v2532_v63, %v2098_v57 }
 0x1f5   : > { %2859 = vst [vmem:[%s4312_s8 + $0x4b0] sm:$0xff] %v2684_v59  ;;  %2860 = vst.msk [vmem:[%s4312_s8 + $0x4b8] sm:$0xff] %vm2709_vm1, %v2685_v50 }
 0x1f6   : > { %2881 = vst [vmem:[%s4312_s8 + $0x560] sm:$0xff] %v2706_v1  ;;  %2882 = vst.msk [vmem:[%s4312_s8 + $0x568] sm:$0xff] %vm2709_vm1, %v2707_v38  ;;  %v2487_v53 = vpop.permute.xlu1 %2486 }
 0x1f7   : > { %v2688_v54 = vmul.f32 %v2487_v53, %v2079_v62  ;;  %v2689_v3 = vmul.f32 %v2487_v53, %v2080_v2 }
 0x1f9   : > { %2863 = vst [vmem:[%s4312_s8 + $0x4d0] sm:$0xff] %v2688_v54  ;;  %2864 = vst.msk [vmem:[%s4312_s8 + $0x4d8] sm:$0xff] %vm2709_vm1, %v2689_v3 }
 0x1fa   : > { %v2497_v6 = vpop.permute.xlu1 %2496 }
 0x1fb   : > { %v2692_v11 = vmul.f32 %v2497_v6, %v2083_v56  ;;  %v2693_v60 = vmul.f32 %v2497_v6, %v2084_v58 }
 0x1fd   : > { %2867 = vst [vmem:[%s4312_s8 + $0x4f0] sm:$0xff] %v2692_v11  ;;  %2868 = vst.msk [vmem:[%s4312_s8 + $0x4f8] sm:$0xff] %vm2709_vm1, %v2693_v60 }
 0x1fe   : > { %v2507_v12 = vpop.permute.xlu1 %2506 }
 0x1ff   : > { %v2696_v15 = vmul.f32 %v2507_v12, %v2087_v49  ;;  %v2697_v16 = vmul.f32 %v2507_v12, %v2088_v0 }
 0x201   : > { %2871 = vst [vmem:[%s4312_s8 + $0x510] sm:$0xff] %v2696_v15  ;;  %2872 = vst.msk [vmem:[%s4312_s8 + $0x518] sm:$0xff] %vm2709_vm1, %v2697_v16 }
 0x202   : > { %v2517_v4 = vpop.permute.xlu1 %2516 }
 0x203   : > { %v2700_v19 = vmul.f32 %v2517_v4, %v2091_v14  ;;  %v2701_v21 = vmul.f32 %v2517_v4, %v2092_v18 }
 0x205   : > { %2875 = vst [vmem:[%s4312_s8 + $0x530] sm:$0xff] %v2700_v19  ;;  %2876 = vst.msk [vmem:[%s4312_s8 + $0x538] sm:$0xff] %vm2709_vm1, %v2701_v21 }
 0x206   : > { %v2527_v10 = vpop.permute.xlu1 %2526 }
 0x207   : > { %v2704_v27 = vmul.f32 %v2527_v10, %v2095_v5  ;;  %v2705_v29 = vmul.f32 %v2527_v10, %v2096_v24 }
 0x209   : > { %2879 = vst [vmem:[%s4312_s8 + $0x550] sm:$0xff] %v2704_v27  ;;  %2880 = vst.msk [vmem:[%s4312_s8 + $0x558] sm:$0xff] %vm2709_vm1, %v2705_v29 }
 0x20a PF: > { %s14_s15 = sadd.s32 1, %s3433_s15  }
 0x20b   : > { %p11_p4 = scmp.ge.s32.totalorder %s14_s15, 4  }
 0x20d   :  { %13 = sbr.rel (!%p11_p4) target bundleno = 1 (0x1), region = 72 }

</bundles_post_ra>
